<compile_context>
chip_gen: v7x
topology: tpu7x:2x2x1
jax: 0.10.0
libtpu: 0.0.40
codegen_flags: <defaults>
</compile_context>

<pallas_src>
import functools

import jax
import jax.numpy as jnp
from jax import lax
from jax.experimental import pallas as pl
from jax.experimental.pallas import tpu as pltpu

EPS = 1e-5  # torch BatchNorm2d default


# ----------------------------- sizing helpers -------------------------------

def _vmem_limit_bytes():
    """Per-generation scoped-VMEM limit: ~3/4 of physical, capped at 100 MiB."""
    try:
        cap = pltpu.get_tpu_info().vmem_capacity_bytes
    except Exception:
        cap = 128 * 1024 * 1024
    return int(min(cap * 3 // 4, 100 * 1024 * 1024))


def _pass2_vmem_estimate(th, w, c, pad_l, itemsize):
    """Rough per-step VMEM bytes of the dominant pass (BN1+ReLU -> conv2)."""
    wp = pad_l + w + 1
    tile = th * w * c * itemsize
    io = 2 * tile + 2 * 2 * w * c * itemsize + 2 * tile      # 2-deep in (+halos) / out
    weights = 2 * 9 * c * c * itemsize                       # resident conv2 weights
    scratch = (th + 2) * wp * c * itemsize                   # padded VMEM scratch
    acc_f32 = 2 * th * w * c * 4                             # f32 accumulator + temp
    return int(1.25 * (io + weights + scratch + acc_f32))


def _choose_tile_h(h, w, c, pad_l, itemsize, budget):
    best = 1
    for th in range(1, h + 1):
        if h % th:
            continue
        if _pass2_vmem_estimate(th, w, c, pad_l, itemsize) <= budget:
            best = th
    return best


# ----------------------------- kernel helpers -------------------------------

def _conv3x3(pad_ref, w_ref, th, w, c, pad_l):
    """3x3 conv on the padded VMEM scratch -> (th*w, cout) f32 accumulator.

    c >= 128: nine per-tap MXU matmuls (K = c) accumulated in f32 — no
    materialized (th*w, 9*c) im2col buffer and no lane re-packing.
    c < 128 (small first layer): one im2col matmul.
    """
    if c >= 128:
        acc = None
        t = 0
        for ky in range(3):
            for kx in range(3):
                tap = pad_ref[:, ky:ky + th, pad_l - 1 + kx:pad_l - 1 + kx + w, :]
                part = jnp.dot(tap.reshape(th * w, c),
                               w_ref[t * c:(t + 1) * c, :],
                               preferred_element_type=jnp.float32)
                acc = part if acc is None else acc + part
                t += 1
        return acc
    taps = [pad_ref[:, ky:ky + th, pad_l - 1 + kx:pad_l - 1 + kx + w, :]
            for ky in range(3) for kx in range(3)]
    col = jnp.concatenate(taps, axis=-1).reshape(th * w, 9 * c)
    return jnp.dot(col, w_ref[...], preferred_element_type=jnp.float32)


def _fill_padded(pad_ref, interior, above, below, th, w, c, pad_l):
    """Write one row tile (+1-row halos) into the W-padded VMEM scratch.

    Halo rows/columns are rewritten every grid step (no program_id==0 init),
    so the kernel is safe under 'parallel' grid semantics / megacore sharding.
    Border tiles get zero halo rows (= the conv's zero padding).
    """
    t = pl.program_id(1)
    nt = pl.num_programs(1)
    zc = jnp.zeros((1, th + 2, 1, c), pad_ref.dtype)
    zr = jnp.zeros((1, 1, w, c), pad_ref.dtype)
    pad_ref[:, :, pad_l - 1:pad_l, :] = zc                 # left halo column
    pad_ref[:, :, pad_l + w:pad_l + w + 1, :] = zc         # right halo column
    pad_ref[:, 1:th + 1, pad_l:pad_l + w, :] = interior    # sublane-aligned interior

    @pl.when(t == 0)
    def _():
        pad_ref[:, 0:1, pad_l:pad_l + w, :] = zr

    @pl.when(t > 0)
    def _():
        pad_ref[:, 0:1, pad_l:pad_l + w, :] = above

    @pl.when(t == nt - 1)
    def _():
        pad_ref[:, th + 1:th + 2, pad_l:pad_l + w, :] = zr

    @pl.when(t < nt - 1)
    def _():
        pad_ref[:, th + 1:th + 2, pad_l:pad_l + w, :] = below


def _partial_stats(acc, count):
    """Per-tile (sum, centered M2) in f32 for a Chan-style combine in the
    wrapper (avoids the E[x^2]-E[x]^2 catastrophic cancellation)."""
    s = jnp.sum(acc, axis=0, keepdims=True)
    mu = s * (1.0 / count)
    d = acc - mu
    m2 = jnp.sum(d * d, axis=0, keepdims=True)
    return jnp.concatenate([s, m2], axis=0)                # (2, c)


# --------------------------------- kernels -----------------------------------

def conv1_stats_kernel(x_ref, xa_ref, xb_ref, w_ref, y_ref, st_ref, xpad_ref, *,
                       pad_l):
    """conv1 (im2col matmul, no bias) + per-tile partial BN statistics."""
    _, th, w, cin = x_ref.shape
    cpad = w_ref.shape[-1]
    _fill_padded(xpad_ref, x_ref[...], xa_ref[...], xb_ref[...], th, w, cin, pad_l)
    acc = _conv3x3(xpad_ref, w_ref, th, w, cin, pad_l)      # (th*w, cpad) f32
    y_ref[...] = acc.reshape(1, th, w, cpad).astype(y_ref.dtype)
    st_ref[...] = _partial_stats(acc, th * w).reshape(1, 1, 2, cpad)


def bn_conv2_stats_kernel(y1_ref, ya_ref, yb_ref, sc_ref, sh_ref, w_ref,
                          y2_ref, st_ref, hpad_ref, *, pad_l):
    """fused BN1+ReLU (scale/shift) -> conv2 (per-tap matmuls) + partial stats."""
    _, th, w, c = y1_ref.shape
    sc = sc_ref[...].reshape(1, 1, 1, c)
    sh = sh_ref[...].reshape(1, 1, 1, c)

    def bn_relu(v):                                          # one FMA + max pass
        return jnp.maximum(v.astype(jnp.float32) * sc + sh, 0.0).astype(hpad_ref.dtype)

    _fill_padded(hpad_ref, bn_relu(y1_ref[...]), bn_relu(ya_ref[...]),
                 bn_relu(yb_ref[...]), th, w, c, pad_l)
    acc = _conv3x3(hpad_ref, w_ref, th, w, c, pad_l)
    y2_ref[...] = acc.reshape(1, th, w, c).astype(y2_ref.dtype)
    st_ref[...] = _partial_stats(acc, th * w).reshape(1, 1, 2, c)


def bn_relu_kernel(y_ref, sc_ref, sh_ref, o_ref):
    """fused BN2 + ReLU."""
    c = o_ref.shape[-1]
    a = y_ref[...].astype(jnp.float32)
    o_ref[...] = jnp.maximum(a * sc_ref[...].reshape(1, 1, 1, c)
                             + sh_ref[...].reshape(1, 1, 1, c), 0.0).astype(o_ref.dtype)


# --------------------------------- wrapper ------------------------------------

def _bn_scale_shift(stats, gamma, beta, tile_count, total_count):
    """Training-mode BN folded into per-channel scale/shift via a Chan-style
    combine of per-tile (sum, M2) partials (robust to mean >> std)."""
    sums = stats[:, :, 0, :].astype(jnp.float32)            # (n, nt, c)
    m2s = stats[:, :, 1, :].astype(jnp.float32)
    mean = jnp.sum(sums, axis=(0, 1)) / total_count
    tile_mean = sums / tile_count
    m2 = jnp.sum(m2s, axis=(0, 1)) + jnp.sum(
        tile_count * (tile_mean - mean) ** 2, axis=(0, 1))
    var = jnp.maximum(m2 / total_count, 0.0)                # biased, like torch
    scale = gamma.astype(jnp.float32) * lax.rsqrt(var + EPS)
    shift = beta.astype(jnp.float32) - mean * scale
    return scale.reshape(1, -1), shift.reshape(1, -1)


def _pad_channels(a, axis, to):
    pad = to - a.shape[axis]
    if pad == 0:
        return a
    widths = [(0, 0)] * a.ndim
    widths[axis] = (0, pad)
    return jnp.pad(a, widths)


@functools.partial(jax.jit, static_argnames=("compute_dtype", "tile_h", "out_dtype"))
def double_conv(x_nchw, w1, b1, g1, be1, w2, b2, g2, be2, *,
                compute_dtype=jnp.float32, tile_h=None, out_dtype=None):
    """x_nchw: (N, Cin, H, W). Conv weights are HWIO: w1 (3,3,Cin,Cout), w2 (3,3,Cout,Cout)."""
    n, cin, hh, ww = x_nchw.shape
    cout = w1.shape[-1]
    del b1, b2  # conv biases cancel exactly under training-mode BatchNorm

    cdt = jnp.dtype(compute_dtype)
    odt = jnp.dtype(out_dtype) if out_dtype is not None else cdt
    itemsize = cdt.itemsize
    pad_l = 8 if itemsize >= 4 else 16                       # packed-sublane aligned
    cpad = max(128, ((cout + 127) // 128) * 128)             # lane-dense channels

    vmem_limit = _vmem_limit_bytes()
    if tile_h is None:
        tile_h = _choose_tile_h(hh, ww, cpad, pad_l, itemsize, int(0.9 * vmem_limit))
    if hh % tile_h:
        raise ValueError("tile_h must divide H")
    n_th = hh // tile_h
    wp = pad_l + ww + 1
    tile_count = tile_h * ww
    total_count = n * hh * ww

    x_nhwc = jnp.transpose(x_nchw, (0, 2, 3, 1)).astype(cdt)              # (N,H,W,Cin)
    w1_flat = _pad_channels(w1, 3, cpad).reshape(9 * cin, cpad).astype(cdt)
    w2_flat = _pad_channels(_pad_channels(w2, 3, cpad), 2, cpad
                            ).reshape(9 * cpad, cpad).astype(cdt)
    g1p, be1p = _pad_channels(g1, 0, cpad), _pad_channels(be1, 0, cpad)
    g2p, be2p = _pad_channels(g2, 0, cpad), _pad_channels(be2, 0, cpad)

    params = pltpu.CompilerParams(
        dimension_semantics=("parallel", "parallel"),   # partial stats -> no revisits
        vmem_limit_bytes=vmem_limit)

    def tile_spec(c):
        return pl.BlockSpec((1, tile_h, ww, c), lambda b, t: (b, t, 0, 0))

    def halo_above(c):
        return pl.BlockSpec((1, 1, ww, c),
                            lambda b, t: (b, jnp.maximum(t * tile_h - 1, 0), 0, 0))

    def halo_below(c):
        return pl.BlockSpec((1, 1, ww, c),
                            lambda b, t: (b, jnp.minimum((t + 1) * tile_h, hh - 1), 0, 0))

    chan_spec = pl.BlockSpec((1, cpad), lambda b, t: (0, 0))
    stats_spec = pl.BlockSpec((1, 1, 2, cpad), lambda b, t: (b, t, 0, 0))
    stats_shape = jax.ShapeDtypeStruct((n, n_th, 2, cpad), jnp.float32)
    act_shape = jax.ShapeDtypeStruct((n, hh, ww, cpad), cdt)

    # ---- pass 1: conv1 + per-tile partial stats ----
    y1, stats1 = pl.pallas_call(
        functools.partial(conv1_stats_kernel, pad_l=pad_l),
        grid=(n, n_th),
        in_specs=[tile_spec(cin), halo_above(cin), halo_below(cin),
                  pl.BlockSpec((9 * cin, cpad), lambda b, t: (0, 0))],
        out_specs=[tile_spec(cpad), stats_spec],
        out_shape=(act_shape, stats_shape),
        scratch_shapes=[pltpu.VMEM((1, tile_h + 2, wp, cin), cdt)],
        compiler_params=params,
    )(x_nhwc, x_nhwc, x_nhwc, w1_flat)

    sc1, sh1 = _bn_scale_shift(stats1, g1p, be1p, tile_count, total_count)

    # ---- pass 2: fused BN1+ReLU -> conv2 + per-tile partial stats ----
    y2, stats2 = pl.pallas_call(
        functools.partial(bn_conv2_stats_kernel, pad_l=pad_l),
        grid=(n, n_th),
        in_specs=[tile_spec(cpad), halo_above(cpad), halo_below(cpad),
                  chan_spec, chan_spec,
                  pl.BlockSpec((9 * cpad, cpad), lambda b, t: (0, 0))],
        out_specs=[tile_spec(cpad), stats_spec],
        out_shape=(act_shape, stats_shape),
        scratch_shapes=[pltpu.VMEM((1, tile_h + 2, wp, cpad), cdt)],
        compiler_params=params,
    )(y1, y1, y1, sc1, sh1, w2_flat)

    sc2, sh2 = _bn_scale_shift(stats2, g2p, be2p, tile_count, total_count)

    # ---- pass 3: fused BN2 + ReLU (output in compute_dtype) ----
    out = pl.pallas_call(
        bn_relu_kernel,
        grid=(n, n_th),
        in_specs=[tile_spec(cpad), chan_spec, chan_spec],
        out_specs=tile_spec(cpad),
        out_shape=jax.ShapeDtypeStruct((n, hh, ww, cpad), odt),
        compiler_params=params,
    )(y2, sc2, sh2)

    out = out[:, :, :, :cout]                                # drop channel padding
    return jnp.transpose(out, (0, 3, 1, 2))                  # back to NCHW


# --------------------------------- reference ----------------------------------

def double_conv_reference(x_nchw, w1, b1, g1, be1, w2, b2, g2, be2):
    """Pure-JAX reference (NHWC conv via lax, training-mode BN, with conv biases)."""
    x = jnp.transpose(x_nchw, (0, 2, 3, 1)).astype(jnp.float32)

    def conv(x, w, b):
        y = lax.conv_general_dilated(
            x, w, window_strides=(1, 1), padding=((1, 1), (1, 1)),
            dimension_numbers=("NHWC", "HWIO", "NHWC"),
            precision=lax.Precision.HIGHEST)
        return y + b.reshape(1, 1, 1, -1)

    def bn_relu(y, g, be):
        mean = jnp.mean(y, axis=(0, 1, 2), keepdims=True)
        var = jnp.mean((y - mean) ** 2, axis=(0, 1, 2), keepdims=True)
        z = (y - mean) * lax.rsqrt(var + EPS) * g.reshape(1, 1, 1, -1) + be.reshape(1, 1, 1, -1)
        return jnp.maximum(z, 0.0)

    y = bn_relu(conv(x, w1, b1), g1, be1)
    y = bn_relu(conv(y, w2, b2), g2, be2)
    return jnp.transpose(y, (0, 3, 1, 2))


if __name__ == "__main__":
    N, CIN, COUT, H, W = 2, 4, 8, 16, 16

    key = jax.random.PRNGKey(0)
    ks = jax.random.split(key, 9)
    x = jax.random.normal(ks[0], (N, CIN, H, W), jnp.float32)

    # Deterministic synthetic parameters (HWIO conv weights; a torch state_dict
    # weight (OIHW) would be converted via w.transpose(2, 3, 1, 0)).
    w1 = 0.1 * jax.random.normal(ks[1], (3, 3, CIN, COUT), jnp.float32)
    b1 = 0.1 * jax.random.normal(ks[2], (COUT,), jnp.float32)
    g1 = 1.0 + 0.1 * jax.random.normal(ks[3], (COUT,), jnp.float32)
    be1 = 0.1 * jax.random.normal(ks[4], (COUT,), jnp.float32)

    w2 = 0.1 * jax.random.normal(ks[5], (3, 3, COUT, COUT), jnp.float32)
    b2 = 0.1 * jax.random.normal(ks[6], (COUT,), jnp.float32)
    g2 = 1.0 + 0.1 * jax.random.normal(ks[7], (COUT,), jnp.float32)
    be2 = 0.1 * jax.random.normal(ks[8], (COUT,), jnp.float32)

    ref = jax.block_until_ready(
        double_conv_reference(x, w1, b1, g1, be1, w2, b2, g2, be2))

    # f32 path with explicit row tiling (tile_h=8 -> 2 row tiles, exercises the
    # halo handling at tile seams and image borders).
    out = jax.block_until_ready(
        double_conv(x, w1, b1, g1, be1, w2, b2, g2, be2,
                    compute_dtype=jnp.float32, tile_h=8))
    assert out.shape == (N, COUT, H, W)
    err = float(jnp.max(jnp.abs(out.astype(jnp.float32) - ref)))
    assert jnp.allclose(out.astype(jnp.float32), ref, rtol=2e-2, atol=2e-2), (
        "f32 max abs err = %g" % err)

    # bf16 MXU operands (recommended on v6e/v7x), auto row-tile, bf16 output.
    # f32 accumulation + f32 BN statistics -> only operand rounding shows up.
    out_bf16 = jax.block_until_ready(
        double_conv(x, w1, b1, g1, be1, w2, b2, g2, be2,
                    compute_dtype=jnp.bfloat16))
    assert out_bf16.shape == (N, COUT, H, W)
    err_bf16 = float(jnp.max(jnp.abs(out_bf16.astype(jnp.float32) - ref)))
    assert jnp.allclose(out_bf16.astype(jnp.float32), ref, rtol=0.25, atol=0.25), (
        "bf16 max abs err = %g" % err_bf16)

    print("KERNEL_OK")
</pallas_src>

<mosaic_0001>
module attributes {stable_mosaic.version = 11 : i64} {
  func.func @conv1_stats_kernel(%arg0: i32, %arg1: i32, %arg2: memref<1x8x16x4xf32, #tpu.memory_space<vmem>>, %arg3: memref<1x1x16x4xf32, #tpu.memory_space<vmem>>, %arg4: memref<1x1x16x4xf32, #tpu.memory_space<vmem>>, %arg5: memref<36x128xf32, #tpu.memory_space<vmem>>, %arg6: memref<1x8x16x128xf32, #tpu.memory_space<vmem>>, %arg7: memref<1x1x2x128xf32, #tpu.memory_space<vmem>>, %arg8: memref<1x10x25x4xf32, #tpu.memory_space<vmem>>) attributes {dimension_semantics = [#tpu.dimension_semantics<parallel>, #tpu.dimension_semantics<parallel>], iteration_bounds = array<i64: 2, 2>, scalar_prefetch = 0 : i64, scratch_operands = 1 : i64, tpu.core_type = #tpu.core_type<tc>, window_params = [{transform_indices = @transform_0, window_bounds = array<i64: 1, 8, 16, 4>}, {transform_indices = @transform_1, window_bounds = array<i64: 1, 1, 16, 4>}, {transform_indices = @transform_2, window_bounds = array<i64: 1, 1, 16, 4>}, {pipeline_mode = #tpu.pipeline_mode<synchronous>, transform_indices = @transform_3, window_bounds = array<i64: 36, 128>}, {transform_indices = @transform_4, window_bounds = array<i64: 1, 8, 16, 128>}, {transform_indices = @transform_5, window_bounds = array<i64: 1, 1, 2, 128>}]} {
    %c0 = arith.constant 0 : index
    %c0_0 = arith.constant 0 : index
    %c0_1 = arith.constant 0 : index
    %c0_2 = arith.constant 0 : index
    %0 = vector.load %arg2[%c0, %c0_0, %c0_1, %c0_2] : memref<1x8x16x4xf32, #tpu.memory_space<vmem>>, vector<1x8x16x4xf32>
    %c0_3 = arith.constant 0 : index
    %c0_4 = arith.constant 0 : index
    %c0_5 = arith.constant 0 : index
    %c0_6 = arith.constant 0 : index
    %1 = vector.load %arg3[%c0_3, %c0_4, %c0_5, %c0_6] : memref<1x1x16x4xf32, #tpu.memory_space<vmem>>, vector<1x1x16x4xf32>
    %c0_7 = arith.constant 0 : index
    %c0_8 = arith.constant 0 : index
    %c0_9 = arith.constant 0 : index
    %c0_10 = arith.constant 0 : index
    %2 = vector.load %arg4[%c0_7, %c0_8, %c0_9, %c0_10] : memref<1x1x16x4xf32, #tpu.memory_space<vmem>>, vector<1x1x16x4xf32>
    %cst = arith.constant 0.000000e+00 : f32
    %3 = vector.broadcast %cst : f32 to vector<1x10x1x4xf32>
    %cst_11 = arith.constant 0.000000e+00 : f32
    %4 = vector.broadcast %cst_11 : f32 to vector<1x1x16x4xf32>
    %c0_12 = arith.constant 0 : index
    %c0_13 = arith.constant 0 : index
    %c7 = arith.constant 7 : index
    %c0_14 = arith.constant 0 : index
    %5 = vector.load %arg8[%c0_12, %c0_13, %c7, %c0_14] : memref<1x10x25x4xf32, #tpu.memory_space<vmem>>, vector<1x10x1x4xf32>
    tpu.vector_store %arg8[%c0_12, %c0_13, %c7, %c0_14], %3 {strides = array<i32>} : memref<1x10x25x4xf32, #tpu.memory_space<vmem>>, vector<1x10x1x4xf32>,
    %c0_15 = arith.constant 0 : index
    %c0_16 = arith.constant 0 : index
    %c24 = arith.constant 24 : index
    %c0_17 = arith.constant 0 : index
    %6 = vector.load %arg8[%c0_15, %c0_16, %c24, %c0_17] : memref<1x10x25x4xf32, #tpu.memory_space<vmem>>, vector<1x10x1x4xf32>
    tpu.vector_store %arg8[%c0_15, %c0_16, %c24, %c0_17], %3 {strides = array<i32>} : memref<1x10x25x4xf32, #tpu.memory_space<vmem>>, vector<1x10x1x4xf32>,
    %c0_18 = arith.constant 0 : index
    %c1 = arith.constant 1 : index
    %c8 = arith.constant 8 : index
    %c0_19 = arith.constant 0 : index
    %7 = vector.load %arg8[%c0_18, %c1, %c8, %c0_19] : memref<1x10x25x4xf32, #tpu.memory_space<vmem>>, vector<1x8x16x4xf32>
    tpu.vector_store %arg8[%c0_18, %c1, %c8, %c0_19], %0 {strides = array<i32>} : memref<1x10x25x4xf32, #tpu.memory_space<vmem>>, vector<1x8x16x4xf32>,
    %c0_i32 = arith.constant 0 : i32
    %8 = arith.cmpi eq, %arg1, %c0_i32 : i32
    %9 = arith.extui %8 : i1 to i32
    %c0_i32_20 = arith.constant 0 : i32
    %10 = arith.cmpi ne, %9, %c0_i32_20 : i32
    scf.if %10 {
      %c0_74 = arith.constant 0 : index
      %c0_75 = arith.constant 0 : index
      %c8_76 = arith.constant 8 : index
      %c0_77 = arith.constant 0 : index
      %47 = vector.load %arg8[%c0_74, %c0_75, %c8_76, %c0_77] : memref<1x10x25x4xf32, #tpu.memory_space<vmem>>, vector<1x1x16x4xf32>
      tpu.vector_store %arg8[%c0_74, %c0_75, %c8_76, %c0_77], %4 {strides = array<i32>} : memref<1x10x25x4xf32, #tpu.memory_space<vmem>>, vector<1x1x16x4xf32>,
    } else {
    }
    %c0_i32_21 = arith.constant 0 : i32
    %11 = arith.cmpi sgt, %arg1, %c0_i32_21 : i32
    %12 = arith.extui %11 : i1 to i32
    %c0_i32_22 = arith.constant 0 : i32
    %13 = arith.cmpi ne, %12, %c0_i32_22 : i32
    scf.if %13 {
      %c0_74 = arith.constant 0 : index
      %c0_75 = arith.constant 0 : index
      %c8_76 = arith.constant 8 : index
      %c0_77 = arith.constant 0 : index
      %47 = vector.load %arg8[%c0_74, %c0_75, %c8_76, %c0_77] : memref<1x10x25x4xf32, #tpu.memory_space<vmem>>, vector<1x1x16x4xf32>
      tpu.vector_store %arg8[%c0_74, %c0_75, %c8_76, %c0_77], %1 {strides = array<i32>} : memref<1x10x25x4xf32, #tpu.memory_space<vmem>>, vector<1x1x16x4xf32>,
    } else {
    }
    %c1_i32 = arith.constant 1 : i32
    %14 = arith.cmpi eq, %arg1, %c1_i32 : i32
    %15 = arith.extui %14 : i1 to i32
    %c0_i32_23 = arith.constant 0 : i32
    %16 = arith.cmpi ne, %15, %c0_i32_23 : i32
    scf.if %16 {
      %c0_74 = arith.constant 0 : index
      %c9_75 = arith.constant 9 : index
      %c8_76 = arith.constant 8 : index
      %c0_77 = arith.constant 0 : index
      %47 = vector.load %arg8[%c0_74, %c9_75, %c8_76, %c0_77] : memref<1x10x25x4xf32, #tpu.memory_space<vmem>>, vector<1x1x16x4xf32>
      tpu.vector_store %arg8[%c0_74, %c9_75, %c8_76, %c0_77], %4 {strides = array<i32>} : memref<1x10x25x4xf32, #tpu.memory_space<vmem>>, vector<1x1x16x4xf32>,
    } else {
    }
    %c1_i32_24 = arith.constant 1 : i32
    %17 = arith.cmpi slt, %arg1, %c1_i32_24 : i32
    %18 = arith.extui %17 : i1 to i32
    %c0_i32_25 = arith.constant 0 : i32
    %19 = arith.cmpi ne, %18, %c0_i32_25 : i32
    scf.if %19 {
      %c0_74 = arith.constant 0 : index
      %c9_75 = arith.constant 9 : index
      %c8_76 = arith.constant 8 : index
      %c0_77 = arith.constant 0 : index
      %47 = vector.load %arg8[%c0_74, %c9_75, %c8_76, %c0_77] : memref<1x10x25x4xf32, #tpu.memory_space<vmem>>, vector<1x1x16x4xf32>
      tpu.vector_store %arg8[%c0_74, %c9_75, %c8_76, %c0_77], %2 {strides = array<i32>} : memref<1x10x25x4xf32, #tpu.memory_space<vmem>>, vector<1x1x16x4xf32>,
    } else {
    }
    %c0_26 = arith.constant 0 : index
    %c0_27 = arith.constant 0 : index
    %c7_28 = arith.constant 7 : index
    %c0_29 = arith.constant 0 : index
    %20 = vector.load %arg8[%c0_26, %c0_27, %c7_28, %c0_29] : memref<1x10x25x4xf32, #tpu.memory_space<vmem>>, vector<1x8x16x4xf32>
    %c0_30 = arith.constant 0 : index
    %c0_31 = arith.constant 0 : index
    %c8_32 = arith.constant 8 : index
    %c0_33 = arith.constant 0 : index
    %21 = vector.load %arg8[%c0_30, %c0_31, %c8_32, %c0_33] : memref<1x10x25x4xf32, #tpu.memory_space<vmem>>, vector<1x8x16x4xf32>
    %c0_34 = arith.constant 0 : index
    %c0_35 = arith.constant 0 : index
    %c9 = arith.constant 9 : index
    %c0_36 = arith.constant 0 : index
    %22 = vector.load %arg8[%c0_34, %c0_35, %c9, %c0_36] : memref<1x10x25x4xf32, #tpu.memory_space<vmem>>, vector<1x8x16x4xf32>
    %c0_37 = arith.constant 0 : index
    %c1_38 = arith.constant 1 : index
    %c7_39 = arith.constant 7 : index
    %c0_40 = arith.constant 0 : index
    %23 = vector.load %arg8[%c0_37, %c1_38, %c7_39, %c0_40] : memref<1x10x25x4xf32, #tpu.memory_space<vmem>>, vector<1x8x16x4xf32>
    %c0_41 = arith.constant 0 : index
    %c1_42 = arith.constant 1 : index
    %c8_43 = arith.constant 8 : index
    %c0_44 = arith.constant 0 : index
    %24 = vector.load %arg8[%c0_41, %c1_42, %c8_43, %c0_44] : memref<1x10x25x4xf32, #tpu.memory_space<vmem>>, vector<1x8x16x4xf32>
    %c0_45 = arith.constant 0 : index
    %c1_46 = arith.constant 1 : index
    %c9_47 = arith.constant 9 : index
    %c0_48 = arith.constant 0 : index
    %25 = vector.load %arg8[%c0_45, %c1_46, %c9_47, %c0_48] : memref<1x10x25x4xf32, #tpu.memory_space<vmem>>, vector<1x8x16x4xf32>
    %c0_49 = arith.constant 0 : index
    %c2 = arith.constant 2 : index
    %c7_50 = arith.constant 7 : index
    %c0_51 = arith.constant 0 : index
    %26 = vector.load %arg8[%c0_49, %c2, %c7_50, %c0_51] : memref<1x10x25x4xf32, #tpu.memory_space<vmem>>, vector<1x8x16x4xf32>
    %c0_52 = arith.constant 0 : index
    %c2_53 = arith.constant 2 : index
    %c8_54 = arith.constant 8 : index
    %c0_55 = arith.constant 0 : index
    %27 = vector.load %arg8[%c0_52, %c2_53, %c8_54, %c0_55] : memref<1x10x25x4xf32, #tpu.memory_space<vmem>>, vector<1x8x16x4xf32>
    %c0_56 = arith.constant 0 : index
    %c2_57 = arith.constant 2 : index
    %c9_58 = arith.constant 9 : index
    %c0_59 = arith.constant 0 : index
    %28 = vector.load %arg8[%c0_56, %c2_57, %c9_58, %c0_59] : memref<1x10x25x4xf32, #tpu.memory_space<vmem>>, vector<1x8x16x4xf32>
    %29 = tpu.concatenate %20, %21, %22, %23, %24, %25, %26, %27, %28 in 3 : vector<1x8x16x4xf32>, vector<1x8x16x4xf32>, vector<1x8x16x4xf32>, vector<1x8x16x4xf32>, vector<1x8x16x4xf32>, vector<1x8x16x4xf32>, vector<1x8x16x4xf32>, vector<1x8x16x4xf32>, vector<1x8x16x4xf32> -> vector<1x8x16x36xf32>
    %30 = vector.shape_cast %29 : vector<1x8x16x36xf32> to vector<128x36xf32>
    %c0_60 = arith.constant 0 : index
    %c0_61 = arith.constant 0 : index
    %31 = vector.load %arg5[%c0_60, %c0_61] : memref<36x128xf32, #tpu.memory_space<vmem>>, vector<36x128xf32>
    %cst_62 = arith.constant dense<0.000000e+00> : vector<128x128xf32>
    %32 = tpu.matmul %30, %31, %cst_62 {dimension_numbers = #tpu.dot_dimension_numbers<[1], [0], [0], [1], [0, 0, 1, 1], [], []>} : vector<128x36xf32>, vector<36x128xf32>, vector<128x128xf32> -> vector<128x128xf32>
    %33 = vector.shape_cast %32 : vector<128x128xf32> to vector<1x8x16x128xf32>
    %c0_63 = arith.constant 0 : index
    %c0_64 = arith.constant 0 : index
    %c0_65 = arith.constant 0 : index
    %c0_66 = arith.constant 0 : index
    %34 = vector.load %arg6[%c0_63, %c0_64, %c0_65, %c0_66] : memref<1x8x16x128xf32, #tpu.memory_space<vmem>>, vector<1x8x16x128xf32>
    tpu.vector_store %arg6[%c0_63, %c0_64, %c0_65, %c0_66], %33 {strides = array<i32>} : memref<1x8x16x128xf32, #tpu.memory_space<vmem>>, vector<1x8x16x128xf32>,
    %cst_67 = arith.constant dense<0.000000e+00> : vector<128xf32>
    %35 = vector.multi_reduction <add>, %32, %cst_67 [0] : vector<128x128xf32> to vector<128xf32>
    %36 = vector.shape_cast %35 : vector<128xf32> to vector<1x128xf32>
    %cst_68 = arith.constant 7.812500e-03 : f32
    %37 = vector.broadcast %cst_68 : f32 to vector<1x128xf32>
    %38 = arith.mulf %36, %37 : vector<1x128xf32>
    %39 = vector.broadcast %38 : vector<1x128xf32> to vector<128x128xf32>
    %40 = arith.subf %32, %39 : vector<128x128xf32>
    %41 = arith.mulf %40, %40 : vector<128x128xf32>
    %cst_69 = arith.constant dense<0.000000e+00> : vector<128xf32>
    %42 = vector.multi_reduction <add>, %41, %cst_69 [0] : vector<128x128xf32> to vector<128xf32>
    %43 = vector.shape_cast %42 : vector<128xf32> to vector<1x128xf32>
    %44 = tpu.concatenate %36, %43 in 0 : vector<1x128xf32>, vector<1x128xf32> -> vector<2x128xf32>
    %45 = vector.shape_cast %44 : vector<2x128xf32> to vector<1x1x2x128xf32>
    %c0_70 = arith.constant 0 : index
    %c0_71 = arith.constant 0 : index
    %c0_72 = arith.constant 0 : index
    %c0_73 = arith.constant 0 : index
    %46 = vector.load %arg7[%c0_70, %c0_71, %c0_72, %c0_73] : memref<1x1x2x128xf32, #tpu.memory_space<vmem>>, vector<1x1x2x128xf32>
    tpu.vector_store %arg7[%c0_70, %c0_71, %c0_72, %c0_73], %45 {strides = array<i32>} : memref<1x1x2x128xf32, #tpu.memory_space<vmem>>, vector<1x1x2x128xf32>,
    return
  }
  func.func @transform_0(%arg0: i32, %arg1: i32) -> (i32, i32, i32, i32) {
    %c0_i32 = arith.constant 0 : i32
    %c0_i32_0 = arith.constant 0 : i32
    %c0_i32_1 = arith.constant 0 : i32
    return %arg0, %arg1, %c0_i32, %c0_i32_0 : i32, i32, i32, i32
  }
  func.func @transform_1(%arg0: i32, %arg1: i32) -> (i32, i32, i32, i32) {
    %c8_i32 = arith.constant 8 : i32
    %0 = arith.muli %arg1, %c8_i32 : i32
    %c1_i32 = arith.constant 1 : i32
    %1 = arith.subi %0, %c1_i32 : i32
    %c0_i32 = arith.constant 0 : i32
    %2 = arith.maxsi %1, %c0_i32 : i32
    %c0_i32_0 = arith.constant 0 : i32
    %c0_i32_1 = arith.constant 0 : i32
    %c0_i32_2 = arith.constant 0 : i32
    return %arg0, %2, %c0_i32_0, %c0_i32_1 : i32, i32, i32, i32
  }
  func.func @transform_2(%arg0: i32, %arg1: i32) -> (i32, i32, i32, i32) {
    %c1_i32 = arith.constant 1 : i32
    %0 = arith.addi %arg1, %c1_i32 : i32
    %c8_i32 = arith.constant 8 : i32
    %1 = arith.muli %0, %c8_i32 : i32
    %c15_i32 = arith.constant 15 : i32
    %2 = arith.minsi %1, %c15_i32 : i32
    %c0_i32 = arith.constant 0 : i32
    %c0_i32_0 = arith.constant 0 : i32
    %c0_i32_1 = arith.constant 0 : i32
    return %arg0, %2, %c0_i32, %c0_i32_0 : i32, i32, i32, i32
  }
  func.func @transform_3(%arg0: i32, %arg1: i32) -> (i32, i32) {
    %c0_i32 = arith.constant 0 : i32
    %c0_i32_0 = arith.constant 0 : i32
    %c0_i32_1 = arith.constant 0 : i32
    return %c0_i32, %c0_i32_0 : i32, i32
  }
  func.func @transform_4(%arg0: i32, %arg1: i32) -> (i32, i32, i32, i32) {
    %c0_i32 = arith.constant 0 : i32
    %c0_i32_0 = arith.constant 0 : i32
    %c0_i32_1 = arith.constant 0 : i32
    return %arg0, %arg1, %c0_i32, %c0_i32_0 : i32, i32, i32, i32
  }
  func.func @transform_5(%arg0: i32, %arg1: i32) -> (i32, i32, i32, i32) {
    %c0_i32 = arith.constant 0 : i32
    %c0_i32_0 = arith.constant 0 : i32
    %c0_i32_1 = arith.constant 0 : i32
    return %arg0, %arg1, %c0_i32, %c0_i32_0 : i32, i32, i32, i32
  }
}

module attributes {stable_mosaic.version = 11 : i64} {
  func.func @bn_conv2_stats_kernel(%arg0: i32, %arg1: i32, %arg2: memref<1x8x16x128xf32, #tpu.memory_space<vmem>>, %arg3: memref<1x1x16x128xf32, #tpu.memory_space<vmem>>, %arg4: memref<1x1x16x128xf32, #tpu.memory_space<vmem>>, %arg5: memref<1x128xf32, #tpu.memory_space<vmem>>, %arg6: memref<1x128xf32, #tpu.memory_space<vmem>>, %arg7: memref<1152x128xf32, #tpu.memory_space<vmem>>, %arg8: memref<1x8x16x128xf32, #tpu.memory_space<vmem>>, %arg9: memref<1x1x2x128xf32, #tpu.memory_space<vmem>>, %arg10: memref<1x10x25x128xf32, #tpu.memory_space<vmem>>) attributes {dimension_semantics = [#tpu.dimension_semantics<parallel>, #tpu.dimension_semantics<parallel>], iteration_bounds = array<i64: 2, 2>, scalar_prefetch = 0 : i64, scratch_operands = 1 : i64, tpu.core_type = #tpu.core_type<tc>, window_params = [{transform_indices = @transform_0, window_bounds = array<i64: 1, 8, 16, 128>}, {transform_indices = @transform_1, window_bounds = array<i64: 1, 1, 16, 128>}, {transform_indices = @transform_2, window_bounds = array<i64: 1, 1, 16, 128>}, {pipeline_mode = #tpu.pipeline_mode<synchronous>, transform_indices = @transform_3, window_bounds = array<i64: 1, 128>}, {pipeline_mode = #tpu.pipeline_mode<synchronous>, transform_indices = @transform_4, window_bounds = array<i64: 1, 128>}, {pipeline_mode = #tpu.pipeline_mode<synchronous>, transform_indices = @transform_5, window_bounds = array<i64: 1152, 128>}, {transform_indices = @transform_6, window_bounds = array<i64: 1, 8, 16, 128>}, {transform_indices = @transform_7, window_bounds = array<i64: 1, 1, 2, 128>}]} {
    %c0 = arith.constant 0 : index
    %c0_0 = arith.constant 0 : index
    %0 = vector.load %arg5[%c0, %c0_0] : memref<1x128xf32, #tpu.memory_space<vmem>>, vector<1x128xf32>
    %1 = vector.shape_cast %0 : vector<1x128xf32> to vector<1x1x1x128xf32>
    %c0_1 = arith.constant 0 : index
    %c0_2 = arith.constant 0 : index
    %2 = vector.load %arg6[%c0_1, %c0_2] : memref<1x128xf32, #tpu.memory_space<vmem>>, vector<1x128xf32>
    %3 = vector.shape_cast %2 : vector<1x128xf32> to vector<1x1x1x128xf32>
    %c0_3 = arith.constant 0 : index
    %c0_4 = arith.constant 0 : index
    %c0_5 = arith.constant 0 : index
    %c0_6 = arith.constant 0 : index
    %4 = vector.load %arg2[%c0_3, %c0_4, %c0_5, %c0_6] : memref<1x8x16x128xf32, #tpu.memory_space<vmem>>, vector<1x8x16x128xf32>
    %5 = vector.broadcast %1 : vector<1x1x1x128xf32> to vector<1x8x16x128xf32>
    %6 = arith.mulf %4, %5 : vector<1x8x16x128xf32>
    %7 = vector.broadcast %3 : vector<1x1x1x128xf32> to vector<1x8x16x128xf32>
    %8 = arith.addf %6, %7 : vector<1x8x16x128xf32>
    %cst = arith.constant 0.000000e+00 : f32
    %9 = vector.broadcast %cst : f32 to vector<1x8x16x128xf32>
    %10 = arith.maximumf %8, %9 : vector<1x8x16x128xf32>
    %c0_7 = arith.constant 0 : index
    %c0_8 = arith.constant 0 : index
    %c0_9 = arith.constant 0 : index
    %c0_10 = arith.constant 0 : index
    %11 = vector.load %arg3[%c0_7, %c0_8, %c0_9, %c0_10] : memref<1x1x16x128xf32, #tpu.memory_space<vmem>>, vector<1x1x16x128xf32>
    %12 = vector.broadcast %1 : vector<1x1x1x128xf32> to vector<1x1x16x128xf32>
    %13 = arith.mulf %11, %12 : vector<1x1x16x128xf32>
    %14 = vector.broadcast %3 : vector<1x1x1x128xf32> to vector<1x1x16x128xf32>
    %15 = arith.addf %13, %14 : vector<1x1x16x128xf32>
    %cst_11 = arith.constant 0.000000e+00 : f32
    %16 = vector.broadcast %cst_11 : f32 to vector<1x1x16x128xf32>
    %17 = arith.maximumf %15, %16 : vector<1x1x16x128xf32>
    %c0_12 = arith.constant 0 : index
    %c0_13 = arith.constant 0 : index
    %c0_14 = arith.constant 0 : index
    %c0_15 = arith.constant 0 : index
    %18 = vector.load %arg4[%c0_12, %c0_13, %c0_14, %c0_15] : memref<1x1x16x128xf32, #tpu.memory_space<vmem>>, vector<1x1x16x128xf32>
    %19 = vector.broadcast %1 : vector<1x1x1x128xf32> to vector<1x1x16x128xf32>
    %20 = arith.mulf %18, %19 : vector<1x1x16x128xf32>
    %21 = vector.broadcast %3 : vector<1x1x1x128xf32> to vector<1x1x16x128xf32>
    %22 = arith.addf %20, %21 : vector<1x1x16x128xf32>
    %cst_16 = arith.constant 0.000000e+00 : f32
    %23 = vector.broadcast %cst_16 : f32 to vector<1x1x16x128xf32>
    %24 = arith.maximumf %22, %23 : vector<1x1x16x128xf32>
    %cst_17 = arith.constant 0.000000e+00 : f32
    %25 = vector.broadcast %cst_17 : f32 to vector<1x10x1x128xf32>
    %cst_18 = arith.constant 0.000000e+00 : f32
    %26 = vector.broadcast %cst_18 : f32 to vector<1x1x16x128xf32>
    %c0_19 = arith.constant 0 : index
    %c0_20 = arith.constant 0 : index
    %c7 = arith.constant 7 : index
    %c0_21 = arith.constant 0 : index
    %27 = vector.load %arg10[%c0_19, %c0_20, %c7, %c0_21] : memref<1x10x25x128xf32, #tpu.memory_space<vmem>>, vector<1x10x1x128xf32>
    tpu.vector_store %arg10[%c0_19, %c0_20, %c7, %c0_21], %25 {strides = array<i32>} : memref<1x10x25x128xf32, #tpu.memory_space<vmem>>, vector<1x10x1x128xf32>,
    %c0_22 = arith.constant 0 : index
    %c0_23 = arith.constant 0 : index
    %c24 = arith.constant 24 : index
    %c0_24 = arith.constant 0 : index
    %28 = vector.load %arg10[%c0_22, %c0_23, %c24, %c0_24] : memref<1x10x25x128xf32, #tpu.memory_space<vmem>>, vector<1x10x1x128xf32>
    tpu.vector_store %arg10[%c0_22, %c0_23, %c24, %c0_24], %25 {strides = array<i32>} : memref<1x10x25x128xf32, #tpu.memory_space<vmem>>, vector<1x10x1x128xf32>,
    %c0_25 = arith.constant 0 : index
    %c1 = arith.constant 1 : index
    %c8 = arith.constant 8 : index
    %c0_26 = arith.constant 0 : index
    %29 = vector.load %arg10[%c0_25, %c1, %c8, %c0_26] : memref<1x10x25x128xf32, #tpu.memory_space<vmem>>, vector<1x8x16x128xf32>
    tpu.vector_store %arg10[%c0_25, %c1, %c8, %c0_26], %10 {strides = array<i32>} : memref<1x10x25x128xf32, #tpu.memory_space<vmem>>, vector<1x8x16x128xf32>,
    %c0_i32 = arith.constant 0 : i32
    %30 = arith.cmpi eq, %arg1, %c0_i32 : i32
    %31 = arith.extui %30 : i1 to i32
    %c0_i32_27 = arith.constant 0 : i32
    %32 = arith.cmpi ne, %31, %c0_i32_27 : i32
    scf.if %32 {
      %c0_97 = arith.constant 0 : index
      %c0_98 = arith.constant 0 : index
      %c8_99 = arith.constant 8 : index
      %c0_100 = arith.constant 0 : index
      %100 = vector.load %arg10[%c0_97, %c0_98, %c8_99, %c0_100] : memref<1x10x25x128xf32, #tpu.memory_space<vmem>>, vector<1x1x16x128xf32>
      tpu.vector_store %arg10[%c0_97, %c0_98, %c8_99, %c0_100], %26 {strides = array<i32>} : memref<1x10x25x128xf32, #tpu.memory_space<vmem>>, vector<1x1x16x128xf32>,
    } else {
    }
    %c0_i32_28 = arith.constant 0 : i32
    %33 = arith.cmpi sgt, %arg1, %c0_i32_28 : i32
    %34 = arith.extui %33 : i1 to i32
    %c0_i32_29 = arith.constant 0 : i32
    %35 = arith.cmpi ne, %34, %c0_i32_29 : i32
    scf.if %35 {
      %c0_97 = arith.constant 0 : index
      %c0_98 = arith.constant 0 : index
      %c8_99 = arith.constant 8 : index
      %c0_100 = arith.constant 0 : index
      %100 = vector.load %arg10[%c0_97, %c0_98, %c8_99, %c0_100] : memref<1x10x25x128xf32, #tpu.memory_space<vmem>>, vector<1x1x16x128xf32>
      tpu.vector_store %arg10[%c0_97, %c0_98, %c8_99, %c0_100], %17 {strides = array<i32>} : memref<1x10x25x128xf32, #tpu.memory_space<vmem>>, vector<1x1x16x128xf32>,
    } else {
    }
    %c1_i32 = arith.constant 1 : i32
    %36 = arith.cmpi eq, %arg1, %c1_i32 : i32
    %37 = arith.extui %36 : i1 to i32
    %c0_i32_30 = arith.constant 0 : i32
    %38 = arith.cmpi ne, %37, %c0_i32_30 : i32
    scf.if %38 {
      %c0_97 = arith.constant 0 : index
      %c9_98 = arith.constant 9 : index
      %c8_99 = arith.constant 8 : index
      %c0_100 = arith.constant 0 : index
      %100 = vector.load %arg10[%c0_97, %c9_98, %c8_99, %c0_100] : memref<1x10x25x128xf32, #tpu.memory_space<vmem>>, vector<1x1x16x128xf32>
      tpu.vector_store %arg10[%c0_97, %c9_98, %c8_99, %c0_100], %26 {strides = array<i32>} : memref<1x10x25x128xf32, #tpu.memory_space<vmem>>, vector<1x1x16x128xf32>,
    } else {
    }
    %c1_i32_31 = arith.constant 1 : i32
    %39 = arith.cmpi slt, %arg1, %c1_i32_31 : i32
    %40 = arith.extui %39 : i1 to i32
    %c0_i32_32 = arith.constant 0 : i32
    %41 = arith.cmpi ne, %40, %c0_i32_32 : i32
    scf.if %41 {
      %c0_97 = arith.constant 0 : index
      %c9_98 = arith.constant 9 : index
      %c8_99 = arith.constant 8 : index
      %c0_100 = arith.constant 0 : index
      %100 = vector.load %arg10[%c0_97, %c9_98, %c8_99, %c0_100] : memref<1x10x25x128xf32, #tpu.memory_space<vmem>>, vector<1x1x16x128xf32>
      tpu.vector_store %arg10[%c0_97, %c9_98, %c8_99, %c0_100], %24 {strides = array<i32>} : memref<1x10x25x128xf32, #tpu.memory_space<vmem>>, vector<1x1x16x128xf32>,
    } else {
    }
    %c0_33 = arith.constant 0 : index
    %c0_34 = arith.constant 0 : index
    %c7_35 = arith.constant 7 : index
    %c0_36 = arith.constant 0 : index
    %42 = vector.load %arg10[%c0_33, %c0_34, %c7_35, %c0_36] : memref<1x10x25x128xf32, #tpu.memory_space<vmem>>, vector<1x8x16x128xf32>
    %43 = vector.shape_cast %42 : vector<1x8x16x128xf32> to vector<128x128xf32>
    %c0_37 = arith.constant 0 : index
    %c0_38 = arith.constant 0 : index
    %44 = vector.load %arg7[%c0_37, %c0_38] : memref<1152x128xf32, #tpu.memory_space<vmem>>, vector<128x128xf32>
    %cst_39 = arith.constant dense<0.000000e+00> : vector<128x128xf32>
    %45 = tpu.matmul %43, %44, %cst_39 {dimension_numbers = #tpu.dot_dimension_numbers<[1], [0], [0], [1], [0, 0, 1, 1], [], []>} : vector<128x128xf32>, vector<128x128xf32>, vector<128x128xf32> -> vector<128x128xf32>
    %c0_40 = arith.constant 0 : index
    %c0_41 = arith.constant 0 : index
    %c8_42 = arith.constant 8 : index
    %c0_43 = arith.constant 0 : index
    %46 = vector.load %arg10[%c0_40, %c0_41, %c8_42, %c0_43] : memref<1x10x25x128xf32, #tpu.memory_space<vmem>>, vector<1x8x16x128xf32>
    %47 = vector.shape_cast %46 : vector<1x8x16x128xf32> to vector<128x128xf32>
    %c128 = arith.constant 128 : index
    %c0_44 = arith.constant 0 : index
    %48 = vector.load %arg7[%c128, %c0_44] : memref<1152x128xf32, #tpu.memory_space<vmem>>, vector<128x128xf32>
    %cst_45 = arith.constant dense<0.000000e+00> : vector<128x128xf32>
    %49 = tpu.matmul %47, %48, %cst_45 {dimension_numbers = #tpu.dot_dimension_numbers<[1], [0], [0], [1], [0, 0, 1, 1], [], []>} : vector<128x128xf32>, vector<128x128xf32>, vector<128x128xf32> -> vector<128x128xf32>
    %50 = arith.addf %45, %49 : vector<128x128xf32>
    %c0_46 = arith.constant 0 : index
    %c0_47 = arith.constant 0 : index
    %c9 = arith.constant 9 : index
    %c0_48 = arith.constant 0 : index
    %51 = vector.load %arg10[%c0_46, %c0_47, %c9, %c0_48] : memref<1x10x25x128xf32, #tpu.memory_space<vmem>>, vector<1x8x16x128xf32>
    %52 = vector.shape_cast %51 : vector<1x8x16x128xf32> to vector<128x128xf32>
    %c256 = arith.constant 256 : index
    %c0_49 = arith.constant 0 : index
    %53 = vector.load %arg7[%c256, %c0_49] : memref<1152x128xf32, #tpu.memory_space<vmem>>, vector<128x128xf32>
    %cst_50 = arith.constant dense<0.000000e+00> : vector<128x128xf32>
    %54 = tpu.matmul %52, %53, %cst_50 {dimension_numbers = #tpu.dot_dimension_numbers<[1], [0], [0], [1], [0, 0, 1, 1], [], []>} : vector<128x128xf32>, vector<128x128xf32>, vector<128x128xf32> -> vector<128x128xf32>
    %55 = arith.addf %50, %54 : vector<128x128xf32>
    %c0_51 = arith.constant 0 : index
    %c1_52 = arith.constant 1 : index
    %c7_53 = arith.constant 7 : index
    %c0_54 = arith.constant 0 : index
    %56 = vector.load %arg10[%c0_51, %c1_52, %c7_53, %c0_54] : memref<1x10x25x128xf32, #tpu.memory_space<vmem>>, vector<1x8x16x128xf32>
    %57 = vector.shape_cast %56 : vector<1x8x16x128xf32> to vector<128x128xf32>
    %c384 = arith.constant 384 : index
    %c0_55 = arith.constant 0 : index
    %58 = vector.load %arg7[%c384, %c0_55] : memref<1152x128xf32, #tpu.memory_space<vmem>>, vector<128x128xf32>
    %cst_56 = arith.constant dense<0.000000e+00> : vector<128x128xf32>
    %59 = tpu.matmul %57, %58, %cst_56 {dimension_numbers = #tpu.dot_dimension_numbers<[1], [0], [0], [1], [0, 0, 1, 1], [], []>} : vector<128x128xf32>, vector<128x128xf32>, vector<128x128xf32> -> vector<128x128xf32>
    %60 = arith.addf %55, %59 : vector<128x128xf32>
    %c0_57 = arith.constant 0 : index
    %c1_58 = arith.constant 1 : index
    %c8_59 = arith.constant 8 : index
    %c0_60 = arith.constant 0 : index
    %61 = vector.load %arg10[%c0_57, %c1_58, %c8_59, %c0_60] : memref<1x10x25x128xf32, #tpu.memory_space<vmem>>, vector<1x8x16x128xf32>
    %62 = vector.shape_cast %61 : vector<1x8x16x128xf32> to vector<128x128xf32>
    %c512 = arith.constant 512 : index
    %c0_61 = arith.constant 0 : index
    %63 = vector.load %arg7[%c512, %c0_61] : memref<1152x128xf32, #tpu.memory_space<vmem>>, vector<128x128xf32>
    %cst_62 = arith.constant dense<0.000000e+00> : vector<128x128xf32>
    %64 = tpu.matmul %62, %63, %cst_62 {dimension_numbers = #tpu.dot_dimension_numbers<[1], [0], [0], [1], [0, 0, 1, 1], [], []>} : vector<128x128xf32>, vector<128x128xf32>, vector<128x128xf32> -> vector<128x128xf32>
    %65 = arith.addf %60, %64 : vector<128x128xf32>
    %c0_63 = arith.constant 0 : index
    %c1_64 = arith.constant 1 : index
    %c9_65 = arith.constant 9 : index
    %c0_66 = arith.constant 0 : index
    %66 = vector.load %arg10[%c0_63, %c1_64, %c9_65, %c0_66] : memref<1x10x25x128xf32, #tpu.memory_space<vmem>>, vector<1x8x16x128xf32>
    %67 = vector.shape_cast %66 : vector<1x8x16x128xf32> to vector<128x128xf32>
    %c640 = arith.constant 640 : index
    %c0_67 = arith.constant 0 : index
    %68 = vector.load %arg7[%c640, %c0_67] : memref<1152x128xf32, #tpu.memory_space<vmem>>, vector<128x128xf32>
    %cst_68 = arith.constant dense<0.000000e+00> : vector<128x128xf32>
    %69 = tpu.matmul %67, %68, %cst_68 {dimension_numbers = #tpu.dot_dimension_numbers<[1], [0], [0], [1], [0, 0, 1, 1], [], []>} : vector<128x128xf32>, vector<128x128xf32>, vector<128x128xf32> -> vector<128x128xf32>
    %70 = arith.addf %65, %69 : vector<128x128xf32>
    %c0_69 = arith.constant 0 : index
    %c2 = arith.constant 2 : index
    %c7_70 = arith.constant 7 : index
    %c0_71 = arith.constant 0 : index
    %71 = vector.load %arg10[%c0_69, %c2, %c7_70, %c0_71] : memref<1x10x25x128xf32, #tpu.memory_space<vmem>>, vector<1x8x16x128xf32>
    %72 = vector.shape_cast %71 : vector<1x8x16x128xf32> to vector<128x128xf32>
    %c768 = arith.constant 768 : index
    %c0_72 = arith.constant 0 : index
    %73 = vector.load %arg7[%c768, %c0_72] : memref<1152x128xf32, #tpu.memory_space<vmem>>, vector<128x128xf32>
    %cst_73 = arith.constant dense<0.000000e+00> : vector<128x128xf32>
    %74 = tpu.matmul %72, %73, %cst_73 {dimension_numbers = #tpu.dot_dimension_numbers<[1], [0], [0], [1], [0, 0, 1, 1], [], []>} : vector<128x128xf32>, vector<128x128xf32>, vector<128x128xf32> -> vector<128x128xf32>
    %75 = arith.addf %70, %74 : vector<128x128xf32>
    %c0_74 = arith.constant 0 : index
    %c2_75 = arith.constant 2 : index
    %c8_76 = arith.constant 8 : index
    %c0_77 = arith.constant 0 : index
    %76 = vector.load %arg10[%c0_74, %c2_75, %c8_76, %c0_77] : memref<1x10x25x128xf32, #tpu.memory_space<vmem>>, vector<1x8x16x128xf32>
    %77 = vector.shape_cast %76 : vector<1x8x16x128xf32> to vector<128x128xf32>
    %c896 = arith.constant 896 : index
    %c0_78 = arith.constant 0 : index
    %78 = vector.load %arg7[%c896, %c0_78] : memref<1152x128xf32, #tpu.memory_space<vmem>>, vector<128x128xf32>
    %cst_79 = arith.constant dense<0.000000e+00> : vector<128x128xf32>
    %79 = tpu.matmul %77, %78, %cst_79 {dimension_numbers = #tpu.dot_dimension_numbers<[1], [0], [0], [1], [0, 0, 1, 1], [], []>} : vector<128x128xf32>, vector<128x128xf32>, vector<128x128xf32> -> vector<128x128xf32>
    %80 = arith.addf %75, %79 : vector<128x128xf32>
    %c0_80 = arith.constant 0 : index
    %c2_81 = arith.constant 2 : index
    %c9_82 = arith.constant 9 : index
    %c0_83 = arith.constant 0 : index
    %81 = vector.load %arg10[%c0_80, %c2_81, %c9_82, %c0_83] : memref<1x10x25x128xf32, #tpu.memory_space<vmem>>, vector<1x8x16x128xf32>
    %82 = vector.shape_cast %81 : vector<1x8x16x128xf32> to vector<128x128xf32>
    %c1024 = arith.constant 1024 : index
    %c0_84 = arith.constant 0 : index
    %83 = vector.load %arg7[%c1024, %c0_84] : memref<1152x128xf32, #tpu.memory_space<vmem>>, vector<128x128xf32>
    %cst_85 = arith.constant dense<0.000000e+00> : vector<128x128xf32>
    %84 = tpu.matmul %82, %83, %cst_85 {dimension_numbers = #tpu.dot_dimension_numbers<[1], [0], [0], [1], [0, 0, 1, 1], [], []>} : vector<128x128xf32>, vector<128x128xf32>, vector<128x128xf32> -> vector<128x128xf32>
    %85 = arith.addf %80, %84 : vector<128x128xf32>
    %86 = vector.shape_cast %85 : vector<128x128xf32> to vector<1x8x16x128xf32>
    %c0_86 = arith.constant 0 : index
    %c0_87 = arith.constant 0 : index
    %c0_88 = arith.constant 0 : index
    %c0_89 = arith.constant 0 : index
    %87 = vector.load %arg8[%c0_86, %c0_87, %c0_88, %c0_89] : memref<1x8x16x128xf32, #tpu.memory_space<vmem>>, vector<1x8x16x128xf32>
    tpu.vector_store %arg8[%c0_86, %c0_87, %c0_88, %c0_89], %86 {strides = array<i32>} : memref<1x8x16x128xf32, #tpu.memory_space<vmem>>, vector<1x8x16x128xf32>,
    %cst_90 = arith.constant dense<0.000000e+00> : vector<128xf32>
    %88 = vector.multi_reduction <add>, %85, %cst_90 [0] : vector<128x128xf32> to vector<128xf32>
    %89 = vector.shape_cast %88 : vector<128xf32> to vector<1x128xf32>
    %cst_91 = arith.constant 7.812500e-03 : f32
    %90 = vector.broadcast %cst_91 : f32 to vector<1x128xf32>
    %91 = arith.mulf %89, %90 : vector<1x128xf32>
    %92 = vector.broadcast %91 : vector<1x128xf32> to vector<128x128xf32>
    %93 = arith.subf %85, %92 : vector<128x128xf32>
    %94 = arith.mulf %93, %93 : vector<128x128xf32>
    %cst_92 = arith.constant dense<0.000000e+00> : vector<128xf32>
    %95 = vector.multi_reduction <add>, %94, %cst_92 [0] : vector<128x128xf32> to vector<128xf32>
    %96 = vector.shape_cast %95 : vector<128xf32> to vector<1x128xf32>
    %97 = tpu.concatenate %89, %96 in 0 : vector<1x128xf32>, vector<1x128xf32> -> vector<2x128xf32>
    %98 = vector.shape_cast %97 : vector<2x128xf32> to vector<1x1x2x128xf32>
    %c0_93 = arith.constant 0 : index
    %c0_94 = arith.constant 0 : index
    %c0_95 = arith.constant 0 : index
    %c0_96 = arith.constant 0 : index
    %99 = vector.load %arg9[%c0_93, %c0_94, %c0_95, %c0_96] : memref<1x1x2x128xf32, #tpu.memory_space<vmem>>, vector<1x1x2x128xf32>
    tpu.vector_store %arg9[%c0_93, %c0_94, %c0_95, %c0_96], %98 {strides = array<i32>} : memref<1x1x2x128xf32, #tpu.memory_space<vmem>>, vector<1x1x2x128xf32>,
    return
  }
  func.func @transform_0(%arg0: i32, %arg1: i32) -> (i32, i32, i32, i32) {
    %c0_i32 = arith.constant 0 : i32
    %c0_i32_0 = arith.constant 0 : i32
    %c0_i32_1 = arith.constant 0 : i32
    return %arg0, %arg1, %c0_i32, %c0_i32_0 : i32, i32, i32, i32
  }
  func.func @transform_1(%arg0: i32, %arg1: i32) -> (i32, i32, i32, i32) {
    %c8_i32 = arith.constant 8 : i32
    %0 = arith.muli %arg1, %c8_i32 : i32
    %c1_i32 = arith.constant 1 : i32
    %1 = arith.subi %0, %c1_i32 : i32
    %c0_i32 = arith.constant 0 : i32
    %2 = arith.maxsi %1, %c0_i32 : i32
    %c0_i32_0 = arith.constant 0 : i32
    %c0_i32_1 = arith.constant 0 : i32
    %c0_i32_2 = arith.constant 0 : i32
    return %arg0, %2, %c0_i32_0, %c0_i32_1 : i32, i32, i32, i32
  }
  func.func @transform_2(%arg0: i32, %arg1: i32) -> (i32, i32, i32, i32) {
    %c1_i32 = arith.constant 1 : i32
    %0 = arith.addi %arg1, %c1_i32 : i32
    %c8_i32 = arith.constant 8 : i32
    %1 = arith.muli %0, %c8_i32 : i32
    %c15_i32 = arith.constant 15 : i32
    %2 = arith.minsi %1, %c15_i32 : i32
    %c0_i32 = arith.constant 0 : i32
    %c0_i32_0 = arith.constant 0 : i32
    %c0_i32_1 = arith.constant 0 : i32
    return %arg0, %2, %c0_i32, %c0_i32_0 : i32, i32, i32, i32
  }
  func.func @transform_3(%arg0: i32, %arg1: i32) -> (i32, i32) {
    %c0_i32 = arith.constant 0 : i32
    %c0_i32_0 = arith.constant 0 : i32
    %c0_i32_1 = arith.constant 0 : i32
    return %c0_i32, %c0_i32_0 : i32, i32
  }
  func.func @transform_4(%arg0: i32, %arg1: i32) -> (i32, i32) {
    %c0_i32 = arith.constant 0 : i32
    %c0_i32_0 = arith.constant 0 : i32
    %c0_i32_1 = arith.constant 0 : i32
    return %c0_i32, %c0_i32_0 : i32, i32
  }
  func.func @transform_5(%arg0: i32, %arg1: i32) -> (i32, i32) {
    %c0_i32 = arith.constant 0 : i32
    %c0_i32_0 = arith.constant 0 : i32
    %c0_i32_1 = arith.constant 0 : i32
    return %c0_i32, %c0_i32_0 : i32, i32
  }
  func.func @transform_6(%arg0: i32, %arg1: i32) -> (i32, i32, i32, i32) {
    %c0_i32 = arith.constant 0 : i32
    %c0_i32_0 = arith.constant 0 : i32
    %c0_i32_1 = arith.constant 0 : i32
    return %arg0, %arg1, %c0_i32, %c0_i32_0 : i32, i32, i32, i32
  }
  func.func @transform_7(%arg0: i32, %arg1: i32) -> (i32, i32, i32, i32) {
    %c0_i32 = arith.constant 0 : i32
    %c0_i32_0 = arith.constant 0 : i32
    %c0_i32_1 = arith.constant 0 : i32
    return %arg0, %arg1, %c0_i32, %c0_i32_0 : i32, i32, i32, i32
  }
}

module attributes {stable_mosaic.version = 11 : i64} {
  func.func @bn_relu_kernel(%arg0: i32, %arg1: i32, %arg2: memref<1x8x16x128xf32, #tpu.memory_space<vmem>>, %arg3: memref<1x128xf32, #tpu.memory_space<vmem>>, %arg4: memref<1x128xf32, #tpu.memory_space<vmem>>, %arg5: memref<1x8x16x128xf32, #tpu.memory_space<vmem>>) attributes {dimension_semantics = [#tpu.dimension_semantics<parallel>, #tpu.dimension_semantics<parallel>], iteration_bounds = array<i64: 2, 2>, scalar_prefetch = 0 : i64, scratch_operands = 0 : i64, tpu.core_type = #tpu.core_type<tc>, window_params = [{transform_indices = @transform_0, window_bounds = array<i64: 1, 8, 16, 128>}, {pipeline_mode = #tpu.pipeline_mode<synchronous>, transform_indices = @transform_1, window_bounds = array<i64: 1, 128>}, {pipeline_mode = #tpu.pipeline_mode<synchronous>, transform_indices = @transform_2, window_bounds = array<i64: 1, 128>}, {transform_indices = @transform_3, window_bounds = array<i64: 1, 8, 16, 128>}]} {
    %c0 = arith.constant 0 : index
    %c0_0 = arith.constant 0 : index
    %c0_1 = arith.constant 0 : index
    %c0_2 = arith.constant 0 : index
    %0 = vector.load %arg2[%c0, %c0_0, %c0_1, %c0_2] : memref<1x8x16x128xf32, #tpu.memory_space<vmem>>, vector<1x8x16x128xf32>
    %c0_3 = arith.constant 0 : index
    %c0_4 = arith.constant 0 : index
    %1 = vector.load %arg3[%c0_3, %c0_4] : memref<1x128xf32, #tpu.memory_space<vmem>>, vector<1x128xf32>
    %2 = vector.shape_cast %1 : vector<1x128xf32> to vector<1x1x1x128xf32>
    %3 = vector.broadcast %2 : vector<1x1x1x128xf32> to vector<1x8x16x128xf32>
    %4 = arith.mulf %0, %3 : vector<1x8x16x128xf32>
    %c0_5 = arith.constant 0 : index
    %c0_6 = arith.constant 0 : index
    %5 = vector.load %arg4[%c0_5, %c0_6] : memref<1x128xf32, #tpu.memory_space<vmem>>, vector<1x128xf32>
    %6 = vector.shape_cast %5 : vector<1x128xf32> to vector<1x1x1x128xf32>
    %7 = vector.broadcast %6 : vector<1x1x1x128xf32> to vector<1x8x16x128xf32>
    %8 = arith.addf %4, %7 : vector<1x8x16x128xf32>
    %cst = arith.constant 0.000000e+00 : f32
    %9 = vector.broadcast %cst : f32 to vector<1x8x16x128xf32>
    %10 = arith.maximumf %8, %9 : vector<1x8x16x128xf32>
    %c0_7 = arith.constant 0 : index
    %c0_8 = arith.constant 0 : index
    %c0_9 = arith.constant 0 : index
    %c0_10 = arith.constant 0 : index
    %11 = vector.load %arg5[%c0_7, %c0_8, %c0_9, %c0_10] : memref<1x8x16x128xf32, #tpu.memory_space<vmem>>, vector<1x8x16x128xf32>
    tpu.vector_store %arg5[%c0_7, %c0_8, %c0_9, %c0_10], %10 {strides = array<i32>} : memref<1x8x16x128xf32, #tpu.memory_space<vmem>>, vector<1x8x16x128xf32>,
    return
  }
  func.func @transform_0(%arg0: i32, %arg1: i32) -> (i32, i32, i32, i32) {
    %c0_i32 = arith.constant 0 : i32
    %c0_i32_0 = arith.constant 0 : i32
    %c0_i32_1 = arith.constant 0 : i32
    return %arg0, %arg1, %c0_i32, %c0_i32_0 : i32, i32, i32, i32
  }
  func.func @transform_1(%arg0: i32, %arg1: i32) -> (i32, i32) {
    %c0_i32 = arith.constant 0 : i32
    %c0_i32_0 = arith.constant 0 : i32
    %c0_i32_1 = arith.constant 0 : i32
    return %c0_i32, %c0_i32_0 : i32, i32
  }
  func.func @transform_2(%arg0: i32, %arg1: i32) -> (i32, i32) {
    %c0_i32 = arith.constant 0 : i32
    %c0_i32_0 = arith.constant 0 : i32
    %c0_i32_1 = arith.constant 0 : i32
    return %c0_i32, %c0_i32_0 : i32, i32
  }
  func.func @transform_3(%arg0: i32, %arg1: i32) -> (i32, i32, i32, i32) {
    %c0_i32 = arith.constant 0 : i32
    %c0_i32_0 = arith.constant 0 : i32
    %c0_i32_1 = arith.constant 0 : i32
    return %arg0, %arg1, %c0_i32, %c0_i32_0 : i32, i32, i32, i32
  }
}

</mosaic_0001>

<bundles_post_ra>
// kernel: double_conv.5
= control target key start
LH: loop header
LB: loop body
LE: loop exit
PB: predicated region body
PF: predicated region fallthrough
CT: control target
= control target key end

     0   :  { %s1154_s0 = inlined_call_operand.hbm [shape: f32[2,16,16,128], index: 0, kind: input, shape index: {}]   ;;  %s1155_s1 = inlined_call_operand.hbm [shape: f32[1,128], index: 1, kind: input, shape index: {}]   ;;  %s1156_s2 = inlined_call_operand.hbm [shape: f32[1,128], index: 2, kind: input, shape index: {}]   ;;  %s1157_s3 = inlined_call_operand.hbm [shape: f32[2,16,16,128], index: 3, kind: output, shape index: {}]  }
   0x1   :  { %1166 = sst [smem:[#allocation14_spill]] %s1155_s1 }
   0x2   :  { %1167 = sst [smem:[#allocation15_spill]] %s1156_s2 }
   0x3   :  { %8 = vsyncpa [#allocation3], 0 }
   0x4   :  { %10 = vsyncpa [#allocation3 + $0x1], 0 }
   0x5   :  { %11 = vsyncpa [#allocation6], 0 }
   0x6   :  { %12 = vsyncpa [#allocation4], 0 }
   0x7   :  { %14 = vsyncpa [#allocation4 + $0x1], 0  ;;  %s803_s12 = smov 0   ;;  %s805_s13 = smov 0  }
   0x8   :  { %s807_s14 = smov 0   ;;  %s809_s15 = smov 0  }
   0x9   :  { %s811_s16 = smov 0   ;;  %s813_s17 = smov 0  }
   0xa   :  { %s815_s18 = smov 0   ;;  %s817_s19 = smov 0  }
   0xb LB: > { %1168 = sst [smem:[#allocation12_spill]] %s765_s17  ;;  %s455_s20 = sadd.s32 4294967295, %s773_s19   ;;  %s773_s19 = sphi %s817_s19, %s20_s19   ;;  %s769_s18 = sphi %s815_s18, %s1193_s18   ;;  %s765_s17 = sphi %s813_s17, %s1188_s17   ;;  %s761_s16 = sphi %s811_s16, %s1192_s16   ;;  %s757_s15 = sphi %s809_s15, %s1187_s15   ;;  %s753_s14 = sphi %s807_s14, %s1191_s14   ;;  %s749_s13 = sphi %s805_s13, %s1190_s13   ;;  %s745_s12 = sphi %s803_s12, %s1189_s12  }
   0xc   : > { %s456_s21 = sadd.s32 4294967294, %s773_s19   ;;  %p48_p0 = scmp.ne.s32.totalorder %s753_s14, %s749_s13 }
   0xd   : > { %p49_p1 = scmp.eq.s32.totalorder %s773_s19, 0  ;;  %p54_p2 = scmp.ne.s32.totalorder %s749_s13, %s745_s12 }
   0xe   : > { %p851_p3 = scmp.eq.s32.totalorder %s455_s20, 0  ;;  %p122_p4 = scmp.eq.s32.totalorder %s455_s20, 3 }
   0xf   : > { %p855_p5 = por %p49_p1, %p48_p0  ;;  %p128_p6 = scmp.eq.s32.totalorder %s456_s21, 3 }
  0x10   : > { %s1169_s23 = scalar_select %p851_p3, 1, 0 }
  0x11   : > { %p861_p7 = por %p851_p3, %p54_p2  ;;  %p865_p8 = por %p122_p4, %p48_p0 }
  0x12   : > { %p869_p9 = por %p128_p6, %p54_p2  ;;  %p457_p10 = scmp.ge.s32.totalorder %s773_s19, 1 }
  0x13   : > { %s1171_s25 = scalar_select %p861_p7, 1, 0 }
  0x14   : > { %s1172_s26 = scalar_select %p865_p8, 1, 0 }
  0x15   : > { %s1173_s27 = scalar_select %p869_p9, 1, 0 }
  0x16   : > { %p135_p11 = scmp.lt.s32.totalorder %s773_s19, 5  ;;  %s775_s29 = smov [#allocation5]  }
  0x17   : > { %s148_s30 = sshll.u32 %s775_s29, 4  ;;  %p511_p13 = scmp.lt.s32.totalorder %s773_s19, 4  ;;  %s149_s30 = int_to_ptr.vmem [resolvable:$true] %s148_s30 }
  0x18   : > { %p875_p12 = pnand %p457_p10, %p135_p11  ;;  %s776_s5 = smov [#allocation7]  }
  0x19   : > { %p884_p1 = pnand %p511_p13, %p855_p5  ;;  %s159_s6 = sshll.u32 %s776_s5, 4  ;;  %s894_s6 = int_to_ptr.vmem [resolvable:$true] %s159_s6 }
  0x1a   : > { %s1174_s28 = scalar_select %p875_p12, 1, 0 }
  0x1b   : > { %p494_p0 = pneg %p875_p12  ;;  %s1177_s1 = sld [smem:[#allocation14_spill]] }
  0x1c   : > { %s1175_s4 = scalar_select %p884_p1, 1, 0 }
  0x1d   : > { %p890_p2 = pnand %p494_p0, %p851_p3 }
  0x1f   : > { %p587_p5 = pneg %p890_p2 }
  0x21   : > { %s585_s10 = scalar_lea.hbm %s1177_s1, 16 }
  0x22   : > { %p586_p4 = scmp.ne.s32.totalorder %s1177_s1, %s585_s10  ;;  %p592_p11 = scmp.lt.u32.totalorder %s585_s10, %s1177_s1 }
  0x24   : > { %p588_p6 = pnand %p587_p5, %p586_p4 }
  0x26   : > { %p589_p10 = pneg %p588_p6 }
  0x28   : > { %p594_p13 = pnand %p592_p11, %p589_p10 }
  0x2a   : > { %597 = shalt.err (!%p594_p13)
}
  0x2b   : > { %s598_s29 = scalar_lea.vmem %s149_s30, 16  ;;  %s605_s5 = scalar_lea.vmem %s149_s30, 32 }
  0x2c   : > { %p599_p0 = scmp.ne.s32.totalorder %s149_s30, %s598_s29  ;;  %p606_p3 = scmp.lt.s32.totalorder %s149_s30, %s149_s30 }
  0x2d   : > { %p607_p7 = scmp.lt.s32.totalorder %s605_s5, %s598_s29 }
  0x2e   : > { %p601_p9 = pnand %p599_p0, %p587_p5 }
  0x2f   : > { %p608_p12 = por %p607_p7, %p606_p3 }
  0x30   : > { %p602_p8 = pneg %p601_p9 }
  0x32   : > { %p609_p1 = pnand %p608_p12, %p602_p8 }
  0x34   : > { %612 = shalt.err (!%p609_p1)
}
  0x35   : > { %497 = dma.hbm_to_vmem [thread:$0]  (!%p890_p2), %s1177_s1, 16, %s149_s30, [#allocation6]  }
  0x36   : > { %s1178_s2 = sld [smem:[#allocation15_spill]] }
  0x3c   : > { %s613_s20 = scalar_lea.hbm %s1178_s2, 16 }
  0x3d   : > { %p614_p9 = scmp.ne.s32.totalorder %s1178_s2, %s613_s20  ;;  %p620_p8 = scmp.lt.u32.totalorder %s613_s20, %s1178_s2 }
  0x3f   : > { %p616_p3 = pnand %p614_p9, %p587_p5 }
  0x41   : > { %p617_p7 = pneg %p616_p3 }
  0x43   : > { %p622_p12 = pnand %p620_p8, %p617_p7 }
  0x45   : > { %625 = shalt.err (!%p622_p12)
}
  0x46   : > { %s626_s30 = scalar_lea.vmem %s894_s6, 16  ;;  %s633_s8 = scalar_lea.vmem %s894_s6, 32 }
  0x47   : > { %p627_p1 = scmp.ne.s32.totalorder %s894_s6, %s626_s30  ;;  %p634_p10 = scmp.lt.s32.totalorder %s894_s6, %s894_s6 }
  0x48   : > { %p635_p11 = scmp.lt.s32.totalorder %s633_s8, %s626_s30 }
  0x49   : > { %p629_p4 = pnand %p627_p1, %p587_p5 }
  0x4a   : > { %p636_p13 = por %p635_p11, %p634_p10 }
  0x4b   : > { %p630_p6 = pneg %p629_p4 }
  0x4d   : > { %p637_p0 = pnand %p636_p13, %p630_p6 }
  0x4f   : > { %640 = shalt.err (!%p637_p0)
}
  0x50   : > { %500 = dma.hbm_to_vmem [thread:$0]  (!%p890_p2), %s1178_s2, 16, %s894_s6, [#allocation6]  }
  0x51   : > { %s29_s11 = sadd.s32 1, %s765_s17  ;;  %s32_s20 = sadd.s32 1, %s769_s18 }
  0x52   : > { %p30_p5 = scmp.ge.s32.totalorder %s29_s11, 2  ;;  %s170_s21 = sand.u32 1, %s753_s14  }
  0x53   : > { %s461_s24 = sshll.u32 %s170_s21, 7  ;;  %s480_s29 = sshll.u32 %s765_s17, 4 }
  0x54   : > { %s1195_s11 = smov (%p30_p5, %s29_s11), 0  ;;  %s1197_s20 = smov (!%p30_p5, %s32_s20), %s769_s18 }
  0x55   : > { %1179 = sst [smem:[#allocation13_spill]] %s1195_s11  ;;  %s37_s7 = ssub.s32 %s765_s17, %s1195_s11 }
  0x56   : > { %p34_p9 = scmp.ge.s32.totalorder %s1197_s20, 2  ;;  %s464_s5 = sshll.u32 %s769_s18, 5 }
  0x57   : > { %s174_s30 = scalar_lea.vmem [#allocation2], %s461_s24  ;;  %s181_s8 = sadd.s32 %s480_s29, %s464_s5 }
  0x58   : > { %s184_s6 = sshll.u32 %s174_s30, 4  ;;  %s1199_s20 = smov (%p34_p9, %s1197_s20), 0  ;;  %s956_s6 = int_to_ptr.vmem [resolvable:$true] %s184_s6 }
  0x59   : > { %s36_s9 = ssub.s32 %s769_s18, %s1199_s20  ;;  %s465_s10 = sshll.u32 %s181_s8, 7 }
  0x5a   : > { %s38_s22 = sor.u32 %s37_s7, %s36_s9  ;;  %s963_s11 = scalar_lea.hbm %s1154_s0, %s465_s10 }
  0x5b   : > { %p39_p2 = scmp.eq.s32.totalorder %s38_s22, 0  ;;  %s1180_s24 = sadd.s32 1, %s753_s14 }
  0x5c   : > { %s970_s17 = scalar_lea.sflag [#allocation3], %s170_s21  ;;  %s641_s29 = scalar_lea.hbm %s963_s11, 2048 }
  0x5d   : > { %s968_s30 = scalar_select %p39_p2, %s753_s14, %s1180_s24  }
  0x5e   : > { %p642_p3 = scmp.ne.s32.totalorder %s963_s11, %s641_s29  ;;  %p1181_p7 = scmp.ne.s32.totalorder %s1175_s4, 0 }
  0x5f   : > { %s646_s7 = scalar_lea.hbm %s1154_s0, 8192  ;;  %p647_p4 = scmp.lt.u32.totalorder %s963_s11, %s1154_s0 }
  0x60   : > { %p643_p8 = pneg %p1181_p7  ;;  %p648_p6 = scmp.lt.u32.totalorder %s646_s7, %s641_s29 }
  0x61   : > { %p650_p11 = scmp.lt.u32.totalorder %s641_s29, %s963_s11 }
  0x62   : > { %p644_p12 = pnand %p643_p8, %p642_p3  ;;  %p649_p10 = por %p648_p6, %p647_p4 }
  0x64   : > { %p645_p1 = pneg %p644_p12  ;;  %p651_p13 = por %p650_p11, %p649_p10 }
  0x66   : > { %p652_p0 = pnand %p651_p13, %p645_p1 }
  0x68   : > { %655 = shalt.err (!%p652_p0)
}
  0x69   : > { %s656_s22 = scalar_lea.vmem %s956_s6, 2048  ;;  %s777_s21 = smov [#allocation2]  }
  0x6a   : > { %p657_p5 = scmp.ne.s32.totalorder %s956_s6, %s656_s22  ;;  %s661_s9 = sshll.u32 %s777_s21, 4  ;;  %s662_s9 = int_to_ptr.vmem [resolvable:$false] %s661_s9 }
  0x6b   : > { %s663_s10 = scalar_lea.vmem %s662_s9, 4096  ;;  %p664_p3 = scmp.lt.s32.totalorder %s956_s6, %s662_s9 }
  0x6c   : > { %p659_p9 = pnand %p657_p5, %p643_p8  ;;  %p665_p12 = scmp.lt.s32.totalorder %s663_s10, %s656_s22 }
  0x6e   : > { %p660_p2 = pneg %p659_p9  ;;  %p666_p4 = por %p665_p12, %p664_p3 }
  0x70   : > { %p667_p6 = pnand %p666_p4, %p660_p2 }
  0x72   : > { %670 = shalt.err (!%p667_p6)
}
  0x73   : > { %s778_s24 = smov 128   ;;  %s779_s29 = smov 8  }
  0x74   : > { %504 = dma.hbm_to_vmem [thread:$0]  (!%p1181_p7), %s963_s11, 2048, %s956_s6, %s970_s17, %s778_s24, %s778_s24, %s779_s29  }
  0x75   : > { %p1182_p8 = scmp.ne.s32.totalorder %s1174_s28, 0 }
  0x76   : > { %s1001_s1 = sand.u32 (!%p1182_p8), 1, %s749_s13   ;;  %p1183_p1 = scmp.ne.s32.totalorder (!%p1182_p8), %s1171_s25, 0 }
  0x77   : > { %196 = sbr.rel (%p1182_p8) target bundleno = 163 (0xa3), region = 32  ;;  %s467_s2 = sshll.u32 (!%p1182_p8), %s1001_s1, 7 }
  0x78   : > { %s199_s7 = scalar_lea.sflag (!%p1182_p8), [#allocation3], %s1001_s1  ;;  %s1007_s5 = scalar_lea.vmem (!%p1182_p8), [#allocation2], %s467_s2 }
  0x7e   : > { %732 = dma.done.wait (%p1183_p1), %s199_s7, 2048  }
  0x7f   : > { %734 = vsyncadd (%p1183_p1), %s199_s7, 4294965248  ;;  %p1184_p7 = scmp.ne.s32.totalorder %s1169_s23, 0 }
  0x81   : > { %736 = dma.done.wait (%p1184_p7), [#allocation6], 32  }
  0x82   : > { %738 = vsyncadd (%p1184_p7), [#allocation6], 4294967264  ;;  %v235_v0 = vld [vmem:[%s1007_s5] sm:$0xff]  ;;  %v236_v4 = vld [vmem:[%s1007_s5 + $0x8] sm:$0xff]  ;;  %s481_s17 = sshll.u32 %s757_s15, 4  ;;  %s476_s23 = sshll.u32 %s761_s16, 5 }
  0x83   : > { %v1018_v1 = vld [vmem:[#allocation5] ss:$0 sm:$0xff]  ;;  %v1020_v2 = vld [vmem:[#allocation7] ss:$0 sm:$0xff]  ;;  %v237_v5 = vld [vmem:[%s1007_s5 + $0x10] sm:$0xff]  ;;  %s1056_s15 = scalar_lea.vmem [#allocation8], %s467_s2  ;;  %s1061_s16 = sadd.s32 %s481_s17, %s476_s23 }
  0x84   : > { %v258_v3 = vmul.f32 %v1018_v1, %v235_v0  ;;  %v238_v6 = vld [vmem:[%s1007_s5 + $0x18] sm:$0xff]  ;;  %v259_v7 = vmul.f32 %v1018_v1, %v236_v4  ;;  %v260_v8 = vmul.f32 %v1018_v1, %v237_v5  ;;  %v239_v10 = vld [vmem:[%s1007_s5 + $0x20] sm:$0xff]  ;;  %v240_v11 = vld [vmem:[%s1007_s5 + $0x28] sm:$0xff]  ;;  %s477_s25 = sshll.u32 %s1061_s16, 7  ;;  %s346_s28 = sshll.u32 %s1056_s15, 4  ;;  %s1093_s28 = int_to_ptr.vmem [resolvable:$true] %s346_s28 }
  0x85   : > { %v261_v9 = vmul.f32 %v1018_v1, %v238_v6  ;;  %v241_v12 = vld [vmem:[%s1007_s5 + $0x30] sm:$0xff]  ;;  %v262_v14 = vmul.f32 %v1018_v1, %v239_v10  ;;  %v263_v15 = vmul.f32 %v1018_v1, %v240_v11  ;;  %v242_v17 = vld [vmem:[%s1007_s5 + $0x38] sm:$0xff]  ;;  %v243_v22 = vld [vmem:[%s1007_s5 + $0x40] sm:$0xff]  ;;  %s1091_s6 = scalar_lea.hbm %s1157_s3, %s477_s25  ;;  %s330_s8 = scalar_lea.sflag [#allocation4], %s1001_s1 }
  0x86   : > { %v281_v13 = vadd.f32 %v1020_v2, %v258_v3  ;;  %v264_v16 = vmul.f32 %v1018_v1, %v241_v12  ;;  %v282_v18 = vadd.f32 %v1020_v2, %v259_v7  ;;  %v283_v19 = vadd.f32 %v1020_v2, %v260_v8  ;;  %v244_v27 = vld [vmem:[%s1007_s5 + $0x48] sm:$0xff]  ;;  %v245_v28 = vld [vmem:[%s1007_s5 + $0x50] sm:$0xff]  ;;  %v246_v29 = vld [vmem:[%s1007_s5 + $0x58] sm:$0xff]  ;;  %s671_s22 = scalar_lea.vmem %s1093_s28, 2048  ;;  %p1185_p11 = scmp.ne.s32.totalorder %s1172_s26, 0 }
  0x87   : > { %v284_v20 = vadd.f32 %v1020_v2, %v261_v9  ;;  %v265_v21 = vmul.f32 %v1018_v1, %v242_v17  ;;  %v285_v24 = vadd.f32 %v1020_v2, %v262_v14  ;;  %v286_v25 = vadd.f32 %v1020_v2, %v263_v15  ;;  %v247_v34 = vld [vmem:[%s1007_s5 + $0x60] sm:$0xff]  ;;  %v248_v35 = vld [vmem:[%s1007_s5 + $0x68] sm:$0xff]  ;;  %v249_v36 = vld [vmem:[%s1007_s5 + $0x70] sm:$0xff]  ;;  %p672_p10 = scmp.ne.s32.totalorder %s1093_s28, %s671_s22  ;;  %s780_s21 = smov [#allocation8]  }
  0x88   : > { %v297_v23 = vmax.f32 %v281_v13, 0.0  ;;  %v287_v26 = vadd.f32 %v1020_v2, %v264_v16  ;;  %v298_v30 = vmax.f32 %v282_v18, 0.0  ;;  %v299_v31 = vmax.f32 %v283_v19, 0.0  ;;  %v250_v41 = vld [vmem:[%s1007_s5 + $0x78] sm:$0xff]  ;;  %s675_s9 = sshll.u32 %s780_s21, 4  ;;  %s676_s9 = int_to_ptr.vmem [resolvable:$false] %s675_s9 }
  0x89   : > { %v300_v32 = vmax.f32 %v284_v20, 0.0  ;;  %v288_v33 = vadd.f32 %v1020_v2, %v265_v21  ;;  %v301_v37 = vmax.f32 %v285_v24, 0.0  ;;  %v302_v38 = vmax.f32 %v286_v25, 0.0  ;;  %p673_p13 = pnand %p672_p10, %p1185_p11  ;;  %s677_s10 = scalar_lea.vmem %s676_s9, 4096 }
  0x8a   : > { %313 = vst [vmem:[%s1056_s15] sm:$0xff] %v297_v23  ;;  %v303_v39 = vmax.f32 %v287_v26, 0.0  ;;  %v266_v40 = vmul.f32 %v1018_v1, %v243_v22  ;;  %314 = vst [vmem:[%s1056_s15 + $0x8] sm:$0xff] %v298_v30  ;;  %v267_v43 = vmul.f32 %v1018_v1, %v244_v27  ;;  %v268_v44 = vmul.f32 %v1018_v1, %v245_v28  ;;  %p678_p5 = scmp.lt.s32.totalorder %s1093_s28, %s676_s9  ;;  %p679_p9 = scmp.lt.s32.totalorder %s677_s10, %s671_s22 }
  0x8b   : > { %315 = vst [vmem:[%s1056_s15 + $0x10] sm:$0xff] %v299_v31  ;;  %316 = vst [vmem:[%s1056_s15 + $0x18] sm:$0xff] %v300_v32  ;;  %v304_v42 = vmax.f32 %v288_v33, 0.0  ;;  %v269_v45 = vmul.f32 %v1018_v1, %v246_v29  ;;  %v270_v47 = vmul.f32 %v1018_v1, %v247_v34  ;;  %v271_v48 = vmul.f32 %v1018_v1, %v248_v35  ;;  %p674_p0 = pneg %p673_p13 }
  0x8c   : > { %317 = vst [vmem:[%s1056_s15 + $0x20] sm:$0xff] %v301_v37  ;;  %318 = vst [vmem:[%s1056_s15 + $0x28] sm:$0xff] %v302_v38  ;;  %v289_v46 = vadd.f32 %v1020_v2, %v266_v40  ;;  %v272_v49 = vmul.f32 %v1018_v1, %v249_v36  ;;  %v290_v50 = vadd.f32 %v1020_v2, %v267_v43  ;;  %p680_p2 = por %p679_p9, %p678_p5 }
  0x8d   : > { %319 = vst [vmem:[%s1056_s15 + $0x30] sm:$0xff] %v303_v39  ;;  %320 = vst [vmem:[%s1056_s15 + $0x38] sm:$0xff] %v304_v42  ;;  %v291_v51 = vadd.f32 %v1020_v2, %v268_v44  ;;  %v292_v52 = vadd.f32 %v1020_v2, %v269_v45  ;;  %v273_v53 = vmul.f32 %v1018_v1, %v250_v41 }
  0x8e   : > { %v305_v54 = vmax.f32 %v289_v46, 0.0  ;;  %v293_v55 = vadd.f32 %v1020_v2, %v270_v47  ;;  %v294_v56 = vadd.f32 %v1020_v2, %v271_v48  ;;  %v295_v57 = vadd.f32 %v1020_v2, %v272_v49  ;;  %p681_p3 = pnand %p680_p2, %p674_p0 }
  0x8f   : > { %v306_v58 = vmax.f32 %v290_v50, 0.0  ;;  %v307_v59 = vmax.f32 %v291_v51, 0.0  ;;  %v308_v60 = vmax.f32 %v292_v52, 0.0  ;;  %v296_v61 = vadd.f32 %v1020_v2, %v273_v53 }
  0x90   : > { %321 = vst [vmem:[%s1056_s15 + $0x40] sm:$0xff] %v305_v54  ;;  %v309_v62 = vmax.f32 %v293_v55, 0.0  ;;  %v310_v63 = vmax.f32 %v294_v56, 0.0  ;;  %v311_v0 = vmax.f32 %v295_v57, 0.0 }
  0x91   : > { %322 = vst [vmem:[%s1056_s15 + $0x48] sm:$0xff] %v306_v58  ;;  %323 = vst [vmem:[%s1056_s15 + $0x50] sm:$0xff] %v307_v59  ;;  %v312_v1 = vmax.f32 %v296_v61, 0.0 }
  0x92   : > { %324 = vst [vmem:[%s1056_s15 + $0x58] sm:$0xff] %v308_v60  ;;  %325 = vst [vmem:[%s1056_s15 + $0x60] sm:$0xff] %v309_v62 }
  0x93   : > { %326 = vst [vmem:[%s1056_s15 + $0x68] sm:$0xff] %v310_v63  ;;  %327 = vst [vmem:[%s1056_s15 + $0x70] sm:$0xff] %v311_v0 }
  0x94   : > { %328 = vst [vmem:[%s1056_s15 + $0x78] sm:$0xff] %v312_v1 }
  0x95   : > { %684 = shalt.err (!%p681_p3)
}
  0x96   : > { %s685_s24 = scalar_lea.hbm %s1091_s6, 2048  ;;  %s689_s7 = scalar_lea.hbm %s1157_s3, 8192 }
  0x97   : > { %p686_p12 = scmp.ne.s32.totalorder %s1091_s6, %s685_s24  ;;  %p690_p8 = scmp.lt.u32.totalorder %s1091_s6, %s1157_s3 }
  0x98   : > { %p691_p1 = scmp.lt.u32.totalorder %s689_s7, %s685_s24  ;;  %p693_p10 = scmp.lt.u32.totalorder %s685_s24, %s1091_s6 }
  0x99   : > { %p687_p4 = pnand %p686_p12, %p1185_p11 }
  0x9a   : > { %p692_p7 = por %p691_p1, %p690_p8 }
  0x9b   : > { %p688_p6 = pneg %p687_p4 }
  0x9c   : > { %p694_p13 = por %p693_p10, %p692_p7 }
  0x9e   : > { %p695_p0 = pnand %p694_p13, %p688_p6 }
  0xa0   : > { %698 = shalt.err (!%p695_p0)
}
  0xa1   : > { %s781_s23 = smov 128   ;;  %s782_s15 = smov 8  }
  0xa2   : > { %492 = dma.vmem_to_hbm [thread:$0]  (%p1185_p11), %s1093_s28, 2048, %s1091_s6, %s330_s8, %s781_s23, %s781_s23, %s782_s15  }
  0xa3 PF: > { %p514_p5 = scmp.ge.s32.totalorder %s773_s19, 2  ;;  %s361_s16 = sand.u32 1, %s745_s12  }
  0xa4   : > { %p1186_p9 = scmp.ne.s32.totalorder %s1173_s27, 0  ;;  %s362_s25 = scalar_lea.sflag [#allocation4], %s361_s16 }
  0xa6   : > { %p506_p2 = pnand %p514_p5, %p1186_p9 }
  0xa8   : > { %740 = dma.done.wait (!%p506_p2), %s362_s25, 2048  }
  0xa9   : > { %742 = vsyncadd (!%p506_p2), %s362_s25, 4294965248  ;;  %s20_s19 = sadd.s32 1, %s773_s19   ;;  %s1187_s15 = sld [smem:[#allocation12_spill]] }
  0xaa   : > { %p17_p3 = scmp.ge.s32.totalorder %s20_s19, 6   ;;  %s1188_s17 = sld [smem:[#allocation13_spill]] }
  0xab   : > { %s1189_s12 = smov %s749_s13  ;;  %s1190_s13 = smov %s753_s14 }
  0xac   : > { %s1191_s14 = smov %s968_s30  ;;  %s1192_s16 = smov %s769_s18 }
  0xad   : > { %s1193_s18 = smov %s1199_s20  ;;  %19 = sbr.rel (!%p17_p3) target bundleno = 11 (0xb), region = 85 }
  0xb4   :  { %367 = vsyncpa [#allocation3], 1 }
  0xb5   :  { %369 = vsyncpa [#allocation3 + $0x1], 1 }
  0xb6   :  { %370 = vsyncpa [#allocation6], 1 }
  0xb7   :  { %371 = vsyncpa [#allocation4], 1 }
  0xb8   :  { %373 = vsyncpa [#allocation4 + $0x1], 1 }

// kernel: double_conv.3
= control target key start
LH: loop header
LB: loop body
LE: loop exit
PB: predicated region body
PF: predicated region fallthrough
CT: control target
= control target key end

     0   :  { %s3567_s0 = inlined_call_operand.hbm [shape: f32[2,16,16,4], index: 0, kind: input, shape index: {}, may-alias: {0,1,2}]   ;;  %s3568_s1 = inlined_call_operand.hbm [shape: f32[2,16,16,4], index: 1, kind: input, shape index: {}, may-alias: {0,1,2}]   ;;  %s3569_s2 = inlined_call_operand.hbm [shape: f32[2,16,16,4], index: 2, kind: input, shape index: {}, may-alias: {0,1,2}]   ;;  %s3570_s3 = inlined_call_operand.hbm [shape: f32[36,128], index: 3, kind: input, shape index: {}]   ;;  %s3571_s4 = inlined_call_operand.hbm [shape: f32[2,16,16,128], index: 4, kind: output, shape index: {0}]   ;;  %s3572_s5 = inlined_call_operand.hbm [shape: f32[2,2,2,128], index: 5, kind: output, shape index: {1}]  }
   0x1   :  { %3601 = sst [smem:[#allocation36_spill]] %s3567_s0 }
   0x2   :  { %3602 = sst [smem:[#allocation37_spill]] %s3568_s1 }
   0x3   :  { %3603 = sst [smem:[#allocation38_spill]] %s3569_s2 }
   0x4   :  { %3604 = sst [smem:[#allocation39_spill]] %s3570_s3 }
   0x5   :  { %3605 = sst [smem:[#allocation40_spill]] %s3571_s4 }
   0x6   :  { %3606 = sst [smem:[#allocation41_spill]] %s3572_s5 }
   0x7   :  { %11 = vsyncpa [#allocation4], 0 }
   0x8   :  { %13 = vsyncpa [#allocation4 + $0x1], 0 }
   0x9   :  { %14 = vsyncpa [#allocation7], 0 }
   0xa   :  { %16 = vsyncpa [#allocation7 + $0x1], 0 }
   0xb   :  { %17 = vsyncpa [#allocation10], 0 }
   0xc   :  { %18 = vsyncpa [#allocation5], 0 }
   0xd   :  { %20 = vsyncpa [#allocation5 + $0x1], 0 }
   0xe   :  { %21 = vsyncpa [#allocation13], 0 }
   0xf   :  { %23 = vsyncpa [#allocation13 + $0x1], 0  ;;  %s2471_s18 = smov 0   ;;  %s2473_s19 = smov 0  }
  0x10   :  { %s2475_s20 = smov 0   ;;  %s2477_s21 = smov 0  }
  0x11   :  { %s2479_s22 = smov 0   ;;  %s2481_s23 = smov 0  }
  0x12   :  { %s2483_s24 = smov 0   ;;  %s2485_s25 = smov 0  }
  0x13   :  { %s2487_s26 = smov 0   ;;  %s2489_s27 = smov 0  }
  0x14   :  { %s2491_s28 = smov 0   ;;  %s2493_s29 = smov 0  }
  0x15   :  { %s2495_s30 = smov 0   ;;  %s2497_s6 = smov 0  }
  0x16 LB: > { %3607 = sst [smem:[#allocation20_spill]] %s2367_s18  ;;  %s38_s7 = sadd.s32 1, %s2411_s29  ;;  %s2419_s6 = sphi %s2497_s6, %s29_s6   ;;  %s2415_s30 = sphi %s2495_s30, %s3685_s30   ;;  %s2411_s29 = sphi %s2493_s29, %s3684_s29   ;;  %s2407_s28 = sphi %s2491_s28, %s3691_s28   ;;  %s2403_s27 = sphi %s2489_s27, %s3682_s27   ;;  %s2399_s26 = sphi %s2487_s26, %s3681_s26   ;;  %s2395_s25 = sphi %s2485_s25, %s3690_s25   ;;  %s2391_s24 = sphi %s2483_s24, %s3689_s24   ;;  %s2387_s23 = sphi %s2481_s23, %s3679_s23   ;;  %s2383_s22 = sphi %s2479_s22, %s3688_s22   ;;  %s2379_s21 = sphi %s2477_s21, %s3687_s21   ;;  %s2375_s20 = sphi %s2475_s20, %s3686_s20   ;;  %s2371_s19 = sphi %s2473_s19, %s3677_s19   ;;  %s2367_s18 = sphi %s2471_s18, %s3676_s18  }
  0x17   : > { %3608 = sst [smem:[#allocation21_spill]] %s2371_s19  ;;  %s41_s8 = sadd.s32 1, %s2415_s30 }
  0x18   : > { %3609 = sst [smem:[#allocation22_spill]] %s2375_s20  ;;  %p39_p0 = scmp.ge.s32.totalorder %s38_s7, 2 }
  0x19   : > { %3610 = sst [smem:[#allocation23_spill]] %s2387_s23  ;;  %p3586_p1 = scmp.eq.s32.totalorder %s2419_s6, 0 }
  0x1a   : > { %3611 = sst [smem:[#allocation24_spill]] %s2399_s26  ;;  %s1805_s9 = sshll.u32 %s2411_s29, 3 }
  0x1b   : > { %3612 = sst [smem:[#allocation25_spill]] %s2403_s27  ;;  %s86_s10 = sadd.s32 1, %s2387_s23 }
  0x1c   : > { %3613 = sst [smem:[#allocation26_spill]] %s2407_s28  ;;  %s3693_s7 = smov (%p39_p0, %s38_s7), 0 }
  0x1d   : > { %3614 = sst [smem:[#allocation27_spill]] %s2411_s29  ;;  %s3695_s8 = smov (!%p39_p0, %s41_s8), %s2415_s30 }
  0x1e   : > { %3615 = sst [smem:[#allocation28_spill]] %s2415_s30  ;;  %s46_s11 = ssub.s32 %s2411_s29, %s3693_s7 }
  0x1f   : > { %3616 = sst [smem:[#allocation29_spill]] %s3693_s7  ;;  %s1806_s12 = sadd.s32 4294967295, %s1805_s9 }
  0x20   : > { %p43_p2 = scmp.ge.s32.totalorder %s3695_s8, 2  ;;  %p75_p3 = scmp.gt.s32.totalorder %s1806_s12, 0 }
  0x21   : > { %s1807_s13 = sshll.u32 %s3693_s7, 3  ;;  %p93_p4 = scmp.ne.s32.totalorder %s2387_s23, %s2383_s22 }
  0x22   : > { %s3697_s8 = smov (%p43_p2, %s3695_s8), 0  ;;  %s3699_s12 = smov (!%p75_p3, %s1806_s12), 0 }
  0x23   : > { %3617 = sst [smem:[#allocation30_spill]] %s3697_s8  ;;  %s2558_s14 = ssub.s32 %s2415_s30, %s3697_s8 }
  0x24   : > { %3618 = sst [smem:[#allocation31_spill]] %s2558_s14  ;;  %s1808_s15 = sadd.s32 4294967295, %s1807_s13 }
  0x25   : > { %s2561_s16 = sor.u32 %s46_s11, %s2558_s14  ;;  %p79_p5 = scmp.gt.s32.totalorder %s1808_s15, 0 }
  0x26   : > { %p2566_p7 = por %p93_p4, %p3586_p1  ;;  %p99_p8 = scmp.ne.s32.totalorder %s2383_s22, %s2379_s21 }
  0x27   : > { %s3701_s15 = smov (!%p79_p5, %s1808_s15), 0  ;;  %s2572_s8 = sadd.s32 8, %s1805_s9 }
  0x28   : > { %3620 = sst [smem:[#allocation32_spill]] %s2572_s8  ;;  %s82_s7 = ssub.s32 %s3699_s12, %s3701_s15 }
  0x29   : > { %s83_s5 = sor.u32 %s82_s7, %s2558_s14  ;;  %s2576_s11 = sadd.s32 8, %s1807_s13 }
  0x2a   : > { %p84_p10 = scmp.eq.s32.totalorder %s83_s5, 0  ;;  %p3585_p12 = scmp.lt.s32.totalorder %s2419_s6, 4 }
  0x2b   : > { %s2584_s28 = sshll.u32 %s2415_s30, 5  ;;  %s273_s27 = sand.u32 1, %s2419_s6  }
  0x2c   : > { %s2580_s4 = scalar_select %p84_p10, %s2387_s23, %s86_s10  }
  0x2d   : > { %s275_s9 = sand.u32 1, %s2387_s23   ;;  %s1822_s18 = sshll.u32 %s3699_s12, 1 }
  0x2e   : > { %3621 = sst [smem:[#allocation33_spill]] %s2580_s4  ;;  %s1819_s2 = sshll.u32 %s275_s9, 4 }
  0x2f   : > { %s287_s15 = sadd.s32 %s1822_s18, %s2584_s28  ;;  %s277_s7 = scalar_lea.vmem [#allocation6], %s1819_s2 }
  0x30   : > { %s1824_s19 = sshll.u32 %s287_s15, 7  ;;  %s290_s13 = sshll.u32 %s277_s7, 4  ;;  %s2594_s13 = int_to_ptr.vmem [resolvable:$true] %s290_s13 }
  0x31   : > { %s3622_s1 = sld [smem:[#allocation37_spill]]  ;;  %p2600_p13 = pnand %p3585_p12, %p2566_p7 }
  0x32   : > { %s2604_s2 = scalar_lea.sflag [#allocation7], %s273_s27 }
  0x33   : > { %p2113_p2 = pneg %p2600_p13 }
  0x37   : > { %s2592_s20 = scalar_lea.hbm %s3622_s1, %s1824_s19  ;;  %s2116_s10 = scalar_lea.hbm %s3622_s1, 8192 }
  0x38   : > { %s2111_s18 = scalar_lea.hbm %s2592_s20, 256  ;;  %p2117_p5 = scmp.lt.u32.totalorder %s2592_s20, %s3622_s1 }
  0x39   : > { %p2112_p0 = scmp.ne.s32.totalorder %s2592_s20, %s2111_s18  ;;  %p2118_p7 = scmp.lt.u32.totalorder %s2116_s10, %s2111_s18 }
  0x3a   : > { %p2120_p11 = scmp.lt.u32.totalorder %s2111_s18, %s2592_s20 }
  0x3b   : > { %p2114_p3 = pnand %p2113_p2, %p2112_p0  ;;  %p2119_p10 = por %p2118_p7, %p2117_p5 }
  0x3d   : > { %p2115_p4 = pneg %p2114_p3  ;;  %p2121_p9 = por %p2120_p11, %p2119_p10 }
  0x3f   : > { %p2122_p12 = pnand %p2121_p9, %p2115_p4 }
  0x41   : > { %2125 = shalt.err (!%p2122_p12)
}
  0x42   : > { %s2126_s27 = scalar_lea.vmem %s2594_s13, 256  ;;  %s2421_s17 = smov [#allocation6]  }
  0x43   : > { %p2127_p0 = scmp.ne.s32.totalorder %s2594_s13, %s2126_s27  ;;  %s2131_s9 = sshll.u32 %s2421_s17, 4  ;;  %s2132_s9 = int_to_ptr.vmem [resolvable:$false] %s2131_s9 }
  0x44   : > { %s2133_s15 = scalar_lea.vmem %s2132_s9, 512  ;;  %p2134_p6 = scmp.lt.s32.totalorder %s2594_s13, %s2132_s9 }
  0x45   : > { %p2129_p3 = pnand %p2127_p0, %p2113_p2  ;;  %p2135_p5 = scmp.lt.s32.totalorder %s2133_s15, %s2126_s27 }
  0x47   : > { %p2130_p1 = pneg %p2129_p3  ;;  %p2136_p7 = por %p2135_p5, %p2134_p6 }
  0x49   : > { %p2137_p11 = pnand %p2136_p7, %p2130_p1 }
  0x4b   : > { %2140 = shalt.err (!%p2137_p11)
}
  0x4c   : > { %s3587_s7 = smov 128   ;;  %s3589_s18 = smov 8  }
  0x4d   : > { %1969 = dma.hbm_to_vmem [thread:$0]  (!%p2600_p13), %s2592_s20, 256, %s2594_s13, %s2604_s2, %s3587_s7, %s3587_s7, %s3589_s18  }
  0x4e   : > { %s2636_s19 = sadd.s32 4294967295, %s2419_s6   ;;  %p1811_p1 = scmp.ge.s32.totalorder %s2419_s6, 1 }
  0x4f   : > { %p3591_p6 = scmp.eq.s32.totalorder %s2636_s19, 0  ;;  %p223_p12 = scmp.lt.s32.totalorder %s2419_s6, 5 }
  0x50   : > { %s2424_s20 = smov [#allocation9]   ;;  %s1804_s21 = sadd.s32 4294967294, %s2419_s6  }
  0x51   : > { %p2647_p2 = por %p99_p8, %p3591_p6  ;;  %p2651_p4 = pnand %p1811_p1, %p223_p12 }
  0x52   : > { %s235_s13 = sshll.u32 %s2424_s20, 4  ;;  %s50_s12 = sadd.s32 1, %s2399_s26  ;;  %s236_s13 = int_to_ptr.vmem [resolvable:$true] %s235_s13 }
  0x53   : > { %s3624_s8 = scalar_select %p2647_p2, 1, 0 }
  0x54   : > { %s3625_s5 = scalar_select %p2651_p4, 1, 0 }
  0x55   : > { %p1959_p13 = pneg %p2651_p4  ;;  %s3627_s3 = sld [smem:[#allocation39_spill]] }
  0x57   : > { %p2659_p10 = pnand %p1959_p13, %p3591_p6 }
  0x59   : > { %p2143_p0 = pneg %p2659_p10 }
  0x5b   : > { %s2141_s17 = scalar_lea.hbm %s3627_s3, 640 }
  0x5c   : > { %p2142_p8 = scmp.ne.s32.totalorder %s3627_s3, %s2141_s17  ;;  %p2148_p7 = scmp.lt.u32.totalorder %s2141_s17, %s3627_s3 }
  0x5e   : > { %p2144_p3 = pnand %p2143_p0, %p2142_p8 }
  0x60   : > { %p2145_p5 = pneg %p2144_p3 }
  0x62   : > { %p2150_p11 = pnand %p2148_p7, %p2145_p5 }
  0x64   : > { %2153 = shalt.err (!%p2150_p11)
}
  0x65   : > { %s2154_s18 = scalar_lea.vmem %s236_s13, 640  ;;  %p2162_p9 = scmp.lt.s32.totalorder %s236_s13, %s236_s13 }
  0x66   : > { %p2155_p1 = scmp.ne.s32.totalorder %s236_s13, %s2154_s18  ;;  %p2163_p6 = scmp.lt.s32.totalorder %s2154_s18, %s2154_s18 }
  0x68   : > { %p2157_p12 = pnand %p2155_p1, %p2143_p0  ;;  %p2164_p2 = por %p2163_p6, %p2162_p9 }
  0x6a   : > { %p2158_p13 = pneg %p2157_p12 }
  0x6c   : > { %p2165_p4 = pnand %p2164_p2, %p2158_p13 }
  0x6e   : > { %2168 = shalt.err (!%p2165_p4)
}
  0x6f   : > { %s3628_s14 = smov 8   ;;  %s3629_s27 = smov 128  }
  0x70   : > { %1962 = dma.hbm_to_vmem [thread:$0]  (!%p2659_p10), %s3627_s3, 640, %s236_s13, [#allocation10], %s3629_s27, %s3629_s27, %s3628_s14  }
  0x71   : > { %p3630_p6 = scmp.eq.s32.totalorder %s2561_s16, 0  ;;  %p57_p9 = scmp.ne.s32.totalorder %s2399_s26, %s2395_s25 }
  0x72   : > { %p63_p2 = scmp.ne.s32.totalorder %s2395_s25, %s2391_s24  ;;  %p188_p4 = scmp.eq.s32.totalorder %s1804_s21, 3 }
  0x73   : > { %s2687_s7 = scalar_select %p3630_p6, %s2399_s26, %s50_s12  }
  0x74   : > { %s249_s18 = sand.u32 1, %s2399_s26   ;;  %p3632_p8 = scmp.eq.s32.totalorder %s2419_s6, 0 }
  0x75   : > { %3631 = sst [smem:[#allocation34_spill]] %s2687_s7  ;;  %p3633_p3 = scmp.eq.s32.totalorder %s2636_s19, 0 }
  0x76   : > { %p59_p0 = por %p3632_p8, %p57_p9  ;;  %p3635_p7 = scmp.eq.s32.totalorder %s2636_s19, 3 }
  0x77   : > { %p2698_p5 = por %p3633_p3, %p63_p2  ;;  %p2708_p10 = por %p188_p4, %p63_p2 }
  0x78   : > { %p2704_p11 = por %p3635_p7, %p57_p9  ;;  %s1814_s13 = sshll.u32 %s249_s18, 7 }
  0x79   : > { %s3637_s16 = scalar_select %p2708_p10, 1, 0 }
  0x7a   : > { %s3636_s17 = scalar_select %p2704_p11, 1, 0 }
  0x7b   : > { %3638 = sst [smem:[#allocation35_spill]] %s3637_s16  ;;  %s1872_s12 = sshll.u32 %s2411_s29, 4 }
  0x7c   : > { %s260_s21 = sadd.s32 %s1872_s12, %s2584_s28  ;;  %s253_s20 = scalar_lea.vmem [#allocation3], %s1814_s13 }
  0x7d   : > { %s263_s9 = sshll.u32 %s253_s20, 4  ;;  %s1818_s15 = sshll.u32 %s260_s21, 7  ;;  %s2714_s9 = int_to_ptr.vmem [resolvable:$true] %s263_s9 }
  0x7e   : > { %s3639_s0 = sld [smem:[#allocation36_spill]]  ;;  %p3640_p1 = scmp.lt.s32.totalorder %s2419_s6, 4 }
  0x7f   : > { %s2727_s13 = scalar_lea.sflag [#allocation4], %s249_s18 }
  0x80   : > { %p2723_p12 = pnand %p3640_p1, %p59_p0 }
  0x82   : > { %p2171_p6 = pneg %p2723_p12 }
  0x84   : > { %s2719_s30 = scalar_lea.hbm %s3639_s0, %s1818_s15  ;;  %s2174_s21 = scalar_lea.hbm %s3639_s0, 8192 }
  0x85   : > { %s2169_s12 = scalar_lea.hbm %s2719_s30, 2048  ;;  %p2175_p4 = scmp.lt.u32.totalorder %s2719_s30, %s3639_s0 }
  0x86   : > { %p2170_p13 = scmp.ne.s32.totalorder %s2719_s30, %s2169_s12  ;;  %p2176_p8 = scmp.lt.u32.totalorder %s2174_s21, %s2169_s12 }
  0x87   : > { %p2178_p3 = scmp.lt.u32.totalorder %s2169_s12, %s2719_s30 }
  0x88   : > { %p2172_p9 = pnand %p2171_p6, %p2170_p13  ;;  %p2177_p0 = por %p2176_p8, %p2175_p4 }
  0x8a   : > { %p2173_p2 = pneg %p2172_p9  ;;  %p2179_p7 = por %p2178_p3, %p2177_p0 }
  0x8c   : > { %p2180_p1 = pnand %p2179_p7, %p2173_p2 }
  0x8e   : > { %2183 = shalt.err (!%p2180_p1)
}
  0x8f   : > { %s2184_s18 = scalar_lea.vmem %s2714_s9, 2048  ;;  %s2425_s1 = smov [#allocation3]  }
  0x90   : > { %p2185_p13 = scmp.ne.s32.totalorder %s2714_s9, %s2184_s18  ;;  %s2189_s3 = sshll.u32 %s2425_s1, 4  ;;  %s2190_s3 = int_to_ptr.vmem [resolvable:$false] %s2189_s3 }
  0x91   : > { %s2191_s20 = scalar_lea.vmem %s2190_s3, 4096  ;;  %p2192_p11 = scmp.lt.s32.totalorder %s2714_s9, %s2190_s3 }
  0x92   : > { %p2187_p9 = pnand %p2185_p13, %p2171_p6  ;;  %p2193_p4 = scmp.lt.s32.totalorder %s2191_s20, %s2184_s18 }
  0x94   : > { %p2188_p10 = pneg %p2187_p9  ;;  %p2194_p8 = por %p2193_p4, %p2192_p11 }
  0x96   : > { %p2195_p0 = pnand %p2194_p8, %p2188_p10 }
  0x98   : > { %2198 = shalt.err (!%p2195_p0)
}
  0x99   : > { %s3642_s12 = sld [smem:[#allocation22_spill]]  ;;  %s3643_s21 = sld [smem:[#allocation32_spill]] }
  0x9a   : > { %s3644_s15 = sld [smem:[#allocation21_spill]]  ;;  %s3645_s1 = sld [smem:[#allocation20_spill]] }
  0x9b   : > { %s3646_s18 = sld [smem:[#allocation31_spill]]  ;;  %p3648_p10 = scmp.lt.s32.totalorder %s2576_s11, 15 }
  0x9c   : > { %1966 = dma.hbm_to_vmem [thread:$0]  (!%p2723_p12), %s2719_s30, 2048, %s2714_s9, %s2727_s13, %s3629_s27, %s3629_s27, %s3628_s14  }
  0x9d   : > { %s3705_s11 = smov (!%p3648_p10, %s2576_s11), 15  ;;  %p3649_p3 = scmp.eq.s32.totalorder %s2419_s6, 0 }
  0x9e   : > { %p3650_p13 = scmp.eq.s32.totalorder %s2636_s19, 0  ;;  %s3652_s23 = sld [smem:[#allocation38_spill]] }
  0x9f   : > { %s122_s7 = sadd.s32 1, %s3642_s12  ;;  %p3647_p11 = scmp.lt.s32.totalorder %s3643_s21, 15 }
  0xa0   : > { %p129_p6 = scmp.ne.s32.totalorder %s3642_s12, %s3644_s15  ;;  %p135_p2 = scmp.ne.s32.totalorder %s3644_s15, %s3645_s1 }
  0xa1   : > { %s3703_s21 = smov (!%p3647_p11, %s3643_s21), 15  ;;  %s302_s20 = sand.u32 1, %s3642_s12  }
  0xa2   : > { %s118_s3 = ssub.s32 %s3703_s21, %s3705_s11  ;;  %p131_p7 = por %p129_p6, %p3649_p3 }
  0xa3   : > { %s119_s0 = sor.u32 %s118_s3, %s3646_s18  ;;  %p2775_p9 = por %p135_p2, %p3650_p13 }
  0xa4   : > { %p120_p1 = scmp.eq.s32.totalorder %s119_s0, 0  ;;  %s1825_s30 = sshll.u32 %s302_s20, 4 }
  0xa5   : > { %s3651_s29 = scalar_select %p2775_p9, 1, 0 }
  0xa6   : > { %s1827_s9 = sshll.u32 %s3703_s21, 1  ;;  %s3707_s12 = smov (!%p120_p1, %s3642_s12), %s122_s7 }
  0xa7   : > { %s314_s13 = sadd.s32 %s1827_s9, %s2584_s28  ;;  %s304_s4 = scalar_lea.vmem [#allocation8], %s1825_s30 }
  0xa8   : > { %s1829_s26 = sshll.u32 %s314_s13, 7  ;;  %s317_s15 = sshll.u32 %s304_s4, 4  ;;  %s2788_s15 = int_to_ptr.vmem [resolvable:$true] %s317_s15 }
  0xa9   : > { %s3653_s16 = smov %s3652_s23  ;;  %s2786_s18 = scalar_lea.hbm %s3652_s23, %s1829_s26 }
  0xaa   : > { %p3654_p12 = scmp.lt.s32.totalorder %s2419_s6, 4  ;;  %s2199_s28 = scalar_lea.hbm %s2786_s18, 256 }
  0xab   : > { %p2200_p8 = scmp.ne.s32.totalorder %s2786_s18, %s2199_s28  ;;  %s2204_s26 = scalar_lea.hbm %s3653_s16, 8192 }
  0xac   : > { %p2792_p4 = pnand %p3654_p12, %p131_p7  ;;  %p2205_p6 = scmp.lt.u32.totalorder %s2786_s18, %s3653_s16 }
  0xad   : > { %p2206_p2 = scmp.lt.u32.totalorder %s2204_s26, %s2199_s28  ;;  %p2208_p7 = scmp.lt.u32.totalorder %s2199_s28, %s2786_s18 }
  0xae   : > { %p2201_p0 = pneg %p2792_p4 }
  0xaf   : > { %p2207_p3 = por %p2206_p2, %p2205_p6 }
  0xb0   : > { %p2202_p11 = pnand %p2201_p0, %p2200_p8 }
  0xb1   : > { %p2209_p1 = por %p2208_p7, %p2207_p3 }
  0xb2   : > { %p2203_p10 = pneg %p2202_p11 }
  0xb4   : > { %p2210_p13 = pnand %p2209_p1, %p2203_p10 }
  0xb6   : > { %2213 = shalt.err (!%p2210_p13)
}
  0xb7   : > { %s2214_s3 = scalar_lea.vmem %s2788_s15, 256  ;;  %s2426_s20 = smov [#allocation8]  }
  0xb8   : > { %p2215_p12 = scmp.ne.s32.totalorder %s2788_s15, %s2214_s3  ;;  %s2219_s30 = sshll.u32 %s2426_s20, 4  ;;  %s2220_s30 = int_to_ptr.vmem [resolvable:$false] %s2219_s30 }
  0xb9   : > { %s2221_s9 = scalar_lea.vmem %s2220_s30, 512  ;;  %p2222_p9 = scmp.lt.s32.totalorder %s2788_s15, %s2220_s30 }
  0xba   : > { %p2217_p8 = pnand %p2215_p12, %p2201_p0  ;;  %p2223_p6 = scmp.lt.s32.totalorder %s2221_s9, %s2214_s3 }
  0xbc   : > { %p2218_p11 = pneg %p2217_p8  ;;  %p2224_p2 = por %p2223_p6, %p2222_p9 }
  0xbe   : > { %p2225_p3 = pnand %p2224_p2, %p2218_p11 }
  0xc0   : > { %2228 = shalt.err (!%p2225_p3)
}
  0xc1   : > { %1972 = dma.hbm_to_vmem [thread:$0]  (!%p2792_p4), %s2786_s18, 256, %s2788_s15, %s2604_s2, %s3629_s27, %s3629_s27, %s3628_s14  }
  0xc2   : > { %p3656_p0 = scmp.ne.s32.totalorder %s3625_s5, 0 }
  0xc3   : > { %s2828_s13 = sand.u32 (!%p3656_p0), 1, %s2395_s25  }
  0xc4   : > { %329 = sbr.rel (%p3656_p0) target bundleno = 969 (0x3c9), region = 36  ;;  %s1831_s1 = sshll.u32 (!%p3656_p0), %s2828_s13, 7 }
  0xc5   : > { %s332_s11 = scalar_lea.sflag (!%p3656_p0), [#allocation4], %s2828_s13  ;;  %s2834_s0 = scalar_lea.vmem (!%p3656_p0), [#allocation3], %s1831_s1 }
  0xcb   : > { %2342 = dma.done.wait (%p2698_p5), %s332_s11, 2048  }
  0xcc   : > { %2344 = vsyncadd (%p2698_p5), %s332_s11, 4294965248  ;;  %s340_s2 = sand.u32 1, %s2636_s19   ;;  %s342_s5 = sand.u32 1, %s2383_s22  }
  0xcd   : > { %s2842_s14 = sshll.u32 %s342_s5, 4  ;;  %s341_s27 = scalar_lea.sflag [#allocation7], %s340_s2 }
  0xce   : > { %s344_s15 = scalar_lea.vmem [#allocation6], %s2842_s14  ;;  %p3657_p9 = scmp.ne.s32.totalorder %s3624_s8, 0 }
  0xd0   : > { %2346 = dma.done.wait (%p3657_p9), %s341_s27, 256  }
  0xd1   : > { %2348 = vsyncadd (%p3657_p9), %s341_s27, 4294967040  ;;  %s3658_s18 = sld [smem:[#allocation21_spill]]  ;;  %p3659_p5 = scmp.ne.s32.totalorder %s3651_s29, 0 }
  0xd7   : > { %s351_s28 = sand.u32 1, %s3658_s18  }
  0xd8   : > { %s2850_s10 = sshll.u32 %s351_s28, 4 }
  0xd9   : > { %s353_s4 = scalar_lea.vmem [#allocation8], %s2850_s10 }
  0xda   : > { %2350 = dma.done.wait (%p3659_p5), %s341_s27, 256  }
  0xdb   : > { %2352 = vsyncadd (%p3659_p5), %s341_s27, 4294967040  ;;  %p3660_p4 = scmp.eq.s32.totalorder %s2636_s19, 0 }
  0xdd   : > { %2354 = dma.done.wait (%p3660_p4), [#allocation10], 640   ;;  %p3661_p10 = pmov %p3660_p4 }
  0xde   : > { %s1836_s8 = sshll.u32 %s2828_s13, 1  ;;  %vm429_vm0 = vcmask 24576   ;;  %v2427_v0 = vmov 0.0   ;;  %vm451_vm1 = vcmask 31744   ;;  %v425_v1 = vld [vmem:[%s344_s15] sm:$0xff]  ;;  %v426_v2 = vld [vmem:[%s344_s15 + $0x8] sm:$0xff] }
  0xdf   : > { %2356 = vsyncadd (%p3661_p10), [#allocation10], 4294966656  ;;  %430 = vst.msk [vmem:[#allocation2 + $0x7] sm:$0x1] %vm429_vm0, %v2427_v0  ;;  %v427_v3 = vld [vmem:[%s353_s4] sm:$0xff]  ;;  %v428_v4 = vld [vmem:[%s353_s4 + $0x8] sm:$0xff] }
  0xe0   : > { %431 = vst.msk [vmem:[#allocation2 + $0x27] sm:$0x1] %vm429_vm0, %v2427_v0  ;;  %432 = vst.msk [vmem:[#allocation2 + $0x47] sm:$0x1] %vm429_vm0, %v2427_v0  ;;  %v409_v5 = vld [vmem:[%s2834_s0] sm:$0xff]  ;;  %v410_v6 = vld [vmem:[%s2834_s0 + $0x8] sm:$0xff] }
  0xe1   : > { %433 = vst.msk [vmem:[#allocation2 + $0x67] sm:$0x1] %vm429_vm0, %v2427_v0  ;;  %434 = vst.msk [vmem:[#allocation2 + $0x87] sm:$0x1] %vm429_vm0, %v2427_v0  ;;  %v411_v7 = vld [vmem:[%s2834_s0 + $0x10] sm:$0xff]  ;;  %v412_v8 = vld [vmem:[%s2834_s0 + $0x18] sm:$0xff] }
  0xe2   : > { %435 = vst.msk [vmem:[#allocation2 + $0xa7] sm:$0x1] %vm429_vm0, %v2427_v0  ;;  %436 = vst.msk [vmem:[#allocation2 + $0xc7] sm:$0x1] %vm429_vm0, %v2427_v0  ;;  %v413_v9 = vld [vmem:[%s2834_s0 + $0x20] sm:$0xff]  ;;  %v414_v10 = vld [vmem:[%s2834_s0 + $0x28] sm:$0xff] }
  0xe3   : > { %437 = vst.msk [vmem:[#allocation2 + $0xe7] sm:$0x1] %vm429_vm0, %v2427_v0  ;;  %438 = vst.msk [vmem:[#allocation2 + $0x107] sm:$0x1] %vm429_vm0, %v2427_v0  ;;  %v415_v11 = vld [vmem:[%s2834_s0 + $0x30] sm:$0xff]  ;;  %v416_v12 = vld [vmem:[%s2834_s0 + $0x38] sm:$0xff] }
  0xe4   : > { %439 = vst.msk [vmem:[#allocation2 + $0x127] sm:$0x1] %vm429_vm0, %v2427_v0  ;;  %440 = vst.msk [vmem:[#allocation2 + $0x18] sm:$0x1] %vm429_vm0, %v2427_v0  ;;  %v417_v13 = vld [vmem:[%s2834_s0 + $0x40] sm:$0xff]  ;;  %v418_v14 = vld [vmem:[%s2834_s0 + $0x48] sm:$0xff] }
  0xe5   : > { %441 = vst.msk [vmem:[#allocation2 + $0x38] sm:$0x1] %vm429_vm0, %v2427_v0  ;;  %442 = vst.msk [vmem:[#allocation2 + $0x58] sm:$0x1] %vm429_vm0, %v2427_v0  ;;  %v419_v15 = vld [vmem:[%s2834_s0 + $0x50] sm:$0xff]  ;;  %v420_v16 = vld [vmem:[%s2834_s0 + $0x58] sm:$0xff] }
  0xe6   : > { %443 = vst.msk [vmem:[#allocation2 + $0x78] sm:$0x1] %vm429_vm0, %v2427_v0  ;;  %444 = vst.msk [vmem:[#allocation2 + $0x98] sm:$0x1] %vm429_vm0, %v2427_v0  ;;  %v421_v17 = vld [vmem:[%s2834_s0 + $0x60] sm:$0xff]  ;;  %v422_v18 = vld [vmem:[%s2834_s0 + $0x68] sm:$0xff] }
  0xe7   : > { %445 = vst.msk [vmem:[#allocation2 + $0xb8] sm:$0x1] %vm429_vm0, %v2427_v0  ;;  %446 = vst.msk [vmem:[#allocation2 + $0xd8] sm:$0x1] %vm429_vm0, %v2427_v0  ;;  %v423_v19 = vld [vmem:[%s2834_s0 + $0x70] sm:$0xff]  ;;  %v424_v20 = vld [vmem:[%s2834_s0 + $0x78] sm:$0xff] }
  0xe8   : > { %447 = vst.msk [vmem:[#allocation2 + $0xf8] sm:$0x1] %vm429_vm0, %v2427_v0  ;;  %448 = vst.msk [vmem:[#allocation2 + $0x118] sm:$0x1] %vm429_vm0, %v2427_v0  ;;  %s2924_s29 = scalar_lea.vmem [#allocation11], %s1831_s1  ;;  %s2928_s19 = scalar_lea.vmem [#allocation12], %s1836_s8 }
  0xe9   : > { %449 = vst.msk [vmem:[#allocation2 + $0x138] sm:$0x1] %vm429_vm0, %v2427_v0  ;;  %s3662_s23 = sld [smem:[#allocation25_spill]] }
  0xea   : > { %452 = vst.msk [vmem:[#allocation2 + $0x28] sm:$0xff] %vm451_vm1, %v409_v5  ;;  %453 = vst.msk [vmem:[#allocation2 + $0x30] sm:$0xff] %vm451_vm1, %v410_v6 }
  0xeb   : > { %454 = vst.msk [vmem:[#allocation2 + $0x48] sm:$0xff] %vm451_vm1, %v411_v7  ;;  %455 = vst.msk [vmem:[#allocation2 + $0x50] sm:$0xff] %vm451_vm1, %v412_v8 }
  0xec   : > { %456 = vst.msk [vmem:[#allocation2 + $0x68] sm:$0xff] %vm451_vm1, %v413_v9  ;;  %457 = vst.msk [vmem:[#allocation2 + $0x70] sm:$0xff] %vm451_vm1, %v414_v10 }
  0xed   : > { %458 = vst.msk [vmem:[#allocation2 + $0x88] sm:$0xff] %vm451_vm1, %v415_v11  ;;  %459 = vst.msk [vmem:[#allocation2 + $0x90] sm:$0xff] %vm451_vm1, %v416_v12 }
  0xee   : > { %460 = vst.msk [vmem:[#allocation2 + $0xa8] sm:$0xff] %vm451_vm1, %v417_v13  ;;  %461 = vst.msk [vmem:[#allocation2 + $0xb0] sm:$0xff] %vm451_vm1, %v418_v14 }
  0xef   : > { %462 = vst.msk [vmem:[#allocation2 + $0xc8] sm:$0xff] %vm451_vm1, %v419_v15  ;;  %463 = vst.msk [vmem:[#allocation2 + $0xd0] sm:$0xff] %vm451_vm1, %v420_v16  ;;  %p1837_p7 = scmp.ne.s32.totalorder %s3662_s23, 0 }
  0xf0   : > { %464 = vst.msk [vmem:[#allocation2 + $0xe8] sm:$0xff] %vm451_vm1, %v421_v17  ;;  %465 = vst.msk [vmem:[#allocation2 + $0xf0] sm:$0xff] %vm451_vm1, %v422_v18  ;;  %v2428_v21 = vmov (!%p1837_p7), 0.0  }
  0xf1   : > { %466 = vst.msk [vmem:[#allocation2 + $0x108] sm:$0xff] %vm451_vm1, %v423_v19  ;;  %467 = vst.msk [vmem:[#allocation2 + $0x110] sm:$0xff] %vm451_vm1, %v424_v20  ;;  %471 = sbr.rel (%p1837_p7) target bundleno = 248 (0xf8), region = 56 }
  0xf2   : > { %472 = vst.msk [vmem:[#allocation2 + $0x8] sm:$0xff] (!%p1837_p7), %vm451_vm1, %v2428_v21  ;;  %473 = vst.msk [vmem:[#allocation2 + $0x10] sm:$0xff] (!%p1837_p7), %vm451_vm1, %v2428_v21 }
  0xf8 PF: > { %s3663_s26 = sld [smem:[#allocation25_spill]] }
  0xfe   : > { %p1838_p1 = scmp.le.s32.totalorder %s3663_s26, 0 }
  0xff   : > { %478 = vst.msk [vmem:[#allocation2 + $0x8] sm:$0xff] (!%p1838_p1), %vm451_vm1, %v425_v1  ;;  %479 = vst.msk [vmem:[#allocation2 + $0x10] sm:$0xff] (!%p1838_p1), %vm451_vm1, %v426_v2 }
 0x100   : > { %477 = sbr.rel (%p1838_p1) target bundleno = 263 (0x107), region = 60 }
 0x107 PF: > { %s3664_s21 = sld [smem:[#allocation25_spill]] }
 0x10d   : > { %p1839_p13 = scmp.ne.s32.totalorder %s3664_s21, 1 }
 0x10e   : > { %v2429_v22 = vmov (!%p1839_p13), 0.0  }
 0x10f   : > { %483 = sbr.rel (%p1839_p13) target bundleno = 278 (0x116), region = 64  ;;  %485 = vst.msk [vmem:[#allocation2 + $0x128] sm:$0xff] (!%p1839_p13), %vm451_vm1, %v2429_v22  ;;  %486 = vst.msk [vmem:[#allocation2 + $0x130] sm:$0xff] (!%p1839_p13), %vm451_vm1, %v2429_v22 }
 0x116 PF: > { %s3665_s7 = sld [smem:[#allocation25_spill]] }
 0x11c   : > { %p1840_p12 = scmp.ge.s32.totalorder %s3665_s7, 1 }
 0x11d   : > { %492 = vst.msk [vmem:[#allocation2 + $0x128] sm:$0xff] (!%p1840_p12), %vm451_vm1, %v427_v3  ;;  %493 = vst.msk [vmem:[#allocation2 + $0x130] sm:$0xff] (!%p1840_p12), %vm451_vm1, %v428_v4 }
 0x11e   : > { %490 = sbr.rel (%p1840_p12) target bundleno = 293 (0x125), region = 68 }
 0x125 PF: > { %v526_v23 = vld [vmem:[#allocation2 + $0x9] sm:$0xff]  ;;  %s2430_s3 = smov 8   ;;  %s2431_s20 = smov 4   ;;  %v527_v25 = vld [vmem:[#allocation2 + $0x11] sm:$0xff]  ;;  %v1286_v34 = vld [vmem:[#allocation9] sm:$0xff]  ;;  %vm1340_vm2 = vcmask 1043456  }
 0x126   : > { %v510_v24 = vld [vmem:[#allocation2 + $0x8] sm:$0xff]  ;;  %719 = vrot.lane.b32.xlu1 %v526_v23, %s2430_s3  ;;  %v511_v26 = vld [vmem:[#allocation2 + $0x10] sm:$0xff]  ;;  %s2432_s30 = smov 12   ;;  %s2433_s9 = smov 16   ;;  %v1289_v38 = vld [vmem:[#allocation9 + $0x18] sm:$0xff]  ;;  %vm1167_vm3 = vcmask 64512  }
 0x127   : > { %655 = vrot.lane.b32.xlu0 %v510_v24, %s2431_s20  ;;  %v2946_v27 = vld [vmem:[#allocation2 + $0x2f] sm:$0xff]  ;;  %v2948_v28 = vld [vmem:[#allocation2 + $0x27] sm:$0xff]  ;;  %s2434_s1 = smov 20   ;;  %s2435_s11 = smov 24   ;;  %v1290_v42 = vld [vmem:[#allocation9 + $0x20] sm:$0xf] }
 0x128   : > { %v512_v29 = vld [vmem:[#allocation2 + $0x28] sm:$0xff]  ;;  %v559_v31 = vld [vmem:[#allocation2 + $0x30] sm:$0xff]  ;;  %s2436_s0 = smov 28   ;;  %s2437_s2 = smov 32   ;;  %vm1184_vm4 = vcmask 97280   ;;  %vm1201_vm5 = vcmask 130048  }
 0x129   : > { %v574_v30 = vld [vmem:[#allocation2 + $0x29] sm:$0xff]  ;;  %v575_v33 = vld [vmem:[#allocation2 + $0x31] sm:$0xff]  ;;  %vm1218_vm6 = vcmask 162816   ;;  %vm1235_vm7 = vcmask 195584   ;;  %vm1252_vm8 = vcmask 228352   ;;  %vm1269_vm9 = vcmask 261120  }
 0x12a   : > { %721 = vrot.lane.b32.xlu1 %v527_v25, %s2430_s3  ;;  %v2960_v32 = vld [vmem:[#allocation2 + $0x47] sm:$0xff]  ;;  %v1288_v37 = vld [vmem:[#allocation9 + $0x10] sm:$0xff]  ;;  %vm1291_vm10 = vcmask 293888   ;;  %s3666_s5 = sld [smem:[#allocation25_spill]]  ;;  %s3667_s14 = sld [smem:[#allocation26_spill]] }
 0x12b   : > { %657 = vrot.lane.b32.xlu0 %v511_v26, %s2431_s20  ;;  %v1287_v35 = vld [vmem:[#allocation9 + $0x8] sm:$0xff]  ;;  %v1935_v41 = vpack.c.bf16 %v1289_v38, %v1288_v37  ;;  %v608_v44 = vld [vmem:[#allocation2 + $0x50] sm:$0xff]  ;;  %s1605_s28 = sshll.u32 %s2924_s29, 4  ;;  %s3668_s23 = sld [smem:[#allocation40_spill]]  ;;  %s3430_s28 = int_to_ptr.vmem [resolvable:$true] %s1605_s28 }
 0x12c   : > { %v1931_v36 = vpack.c.bf16 %v1287_v35, %v1286_v34  ;;  %v607_v39 = vld [vmem:[#allocation2 + $0x48] sm:$0xff]  ;;  %v624_v45 = vld [vmem:[#allocation2 + $0x51] sm:$0xff]  ;;  %s1584_s21 = scalar_lea.sflag [#allocation5], %s2828_s13  ;;  %p3670_p11 = scmp.ne.s32.totalorder %s3636_s17, 0 }
 0x12d   : > { %v2968_v40 = vld [vmem:[#allocation2 + $0x4f] sm:$0xff]  ;;  %v2984_v46 = vld [vmem:[#allocation2 + $0x67] sm:$0xff] }
 0x12e   : > { %785 = vrot.lane.b32.xlu1 %v2946_v27, %s2432_s30  ;;  %1932 = vmatprep.subr.bf16.mxu0 %v1931_v36  ;;  %v623_v43 = vld [vmem:[#allocation2 + $0x49] sm:$0xff]  ;;  %v626_v51 = vld [vmem:[#allocation2 + $0x71] sm:$0xff] }
 0x12f   : > { %783 = vrot.lane.b32.xlu0 %v2948_v28, %s2432_s30  ;;  %1939 = vmatprep.subr.bf16.mxu1 %v1931_v36  ;;  %v609_v47 = vld [vmem:[#allocation2 + $0x68] sm:$0xff]  ;;  %v610_v50 = vld [vmem:[#allocation2 + $0x70] sm:$0xff] }
 0x130   : > { %1934 = vmatpush3.bf16.msra.mxu0 %v1931_v36  ;;  %1942 = vmatpush3.bf16.msra.mxu1 %v1931_v36  ;;  %v2992_v48 = vld [vmem:[#allocation2 + $0x6f] sm:$0xff]  ;;  %v3008_v52 = vld [vmem:[#allocation2 + $0x87] sm:$0xff]  ;;  %s1875_s27 = sshll.u32 %s3666_s5, 4  ;;  %s1862_s15 = sshll.u32 %s3667_s14, 5 }
 0x131   : > { %1936 = vmatprep.subr.bf16.mxu0 %v1935_v41  ;;  %1940 = vmatprep.subr.bf16.mxu1 %v1935_v41  ;;  %v625_v49 = vld [vmem:[#allocation2 + $0x69] sm:$0xff]  ;;  %v628_v57 = vld [vmem:[#allocation2 + $0x91] sm:$0xff]  ;;  %s1602_s18 = sadd.s32 %s1875_s27, %s1862_s15  ;;  %s3669_s7 = smov %s3668_s23 }
 0x132   : > { %659 = vrot.lane.b32.xlu1 %v512_v29, %s2431_s20  ;;  %v611_v53 = vld [vmem:[#allocation2 + $0x88] sm:$0xff]  ;;  %v612_v56 = vld [vmem:[#allocation2 + $0x90] sm:$0xff]  ;;  %s1863_s10 = sshll.u32 %s1602_s18, 7 }
 0x133   : > { %847 = vrot.lane.b32.xlu0 %v512_v29, %s2433_s9  ;;  %v3016_v54 = vld [vmem:[#allocation2 + $0x8f] sm:$0xff]  ;;  %v3032_v60 = vld [vmem:[#allocation2 + $0xa7] sm:$0xff]  ;;  %s3435_s26 = scalar_lea.hbm %s3668_s23, %s1863_s10 }
 0x134   : > { %1938 = vmatpush3.bf16.msra.mxu0 %v1935_v41  ;;  %1943 = vmatpush3.bf16.msra.mxu1 %v1935_v41  ;;  %v627_v55 = vld [vmem:[#allocation2 + $0x89] sm:$0xff]  ;;  %v630_v13 = vld [vmem:[#allocation2 + $0xb1] sm:$0xff] }
 0x135   : > { %1905 = vmatprep.subr.msk.mxu0 %vm1340_vm2, %v1290_v42  ;;  %1941 = vmatprep.subr.msk.mxu1 %vm1340_vm2, %v1290_v42  ;;  %v613_v1 = vld [vmem:[#allocation2 + $0xa8] sm:$0xff]  ;;  %v614_v8 = vld [vmem:[#allocation2 + $0xb0] sm:$0xff] }
 0x136   : > { %911 = vrot.lane.b32.xlu1 %v574_v30, %s2434_s1  ;;  %v3044_v2 = vld [vmem:[#allocation2 + $0xaf] sm:$0xff]  ;;  %v494_v16 = vld [vmem:[#allocation2 + $0x7] sm:$0xff] }
 0x137   : > { %849 = vrot.lane.b32.xlu0 %v559_v31, %s2433_s9  ;;  %v629_v7 = vld [vmem:[#allocation2 + $0xa9] sm:$0xff] }
 0x138   : > { %1906 = vmatpush3.msk.msra.mxu0 %vm1340_vm2, %v1290_v42  ;;  %1944 = vmatpush3.msk.msra.mxu1 %vm1340_vm2, %v1290_v42  ;;  %v3072_v21 = vld [vmem:[#allocation2 + $0xc7] sm:$0xff]  ;;  %v495_v25 = vld [vmem:[#allocation2 + $0xf] sm:$0xff] }
 0x139   : > { %v615_v38 = vld [vmem:[#allocation2 + $0xc8] sm:$0xff] }
 0x13a   : > { %723 = vrot.lane.b32.xlu1 %v574_v30, %s2430_s3 }
 0x13b   : > { %661 = vrot.lane.b32.xlu0 %v559_v31, %s2431_s20 }
 0x13e   : > { %975 = vrot.lane.b32.xlu1 %v2960_v32, %s2435_s11 }
 0x13f   : > { %913 = vrot.lane.b32.xlu0 %v575_v33, %s2434_s1 }
 0x142   : > { %787 = vrot.lane.b32.xlu1 %v2960_v32, %s2432_s30 }
 0x143   : > { %725 = vrot.lane.b32.xlu0 %v575_v33, %s2430_s3 }
 0x146   : > { %1039 = vrot.lane.b32.xlu1 %v607_v39, %s2436_s0 }
 0x147   : > { %977 = vrot.lane.b32.xlu0 %v2968_v40, %s2435_s11 }
 0x14a   : > { %851 = vrot.lane.b32.xlu1 %v607_v39, %s2433_s9 }
 0x14b   : > { %789 = vrot.lane.b32.xlu0 %v2968_v40, %s2432_s30 }
 0x14e   : > { %1103 = vrot.lane.b32.xlu1 %v623_v43, %s2437_s2 }
 0x14f   : > { %1041 = vrot.lane.b32.xlu0 %v608_v44, %s2436_s0 }
 0x152   : > { %853 = vrot.lane.b32.xlu1 %v608_v44, %s2433_s9 }
 0x153   : > { %663 = vrot.lane.b32.xlu0 %v607_v39, %s2431_s20  ;;  %v3094_v39 = vld [vmem:[#allocation2 + $0xcf] sm:$0xff] }
 0x156   : > { %1105 = vrot.lane.b32.xlu1 %v624_v45, %s2437_s2 }
 0x157   : > { %915 = vrot.lane.b32.xlu0 %v623_v43, %s2434_s1 }
 0x15a   : > { %727 = vrot.lane.b32.xlu1 %v623_v43, %s2430_s3 }
 0x15b   : > { %665 = vrot.lane.b32.xlu0 %v608_v44, %s2431_s20 }
 0x15e   : > { %979 = vrot.lane.b32.xlu1 %v2984_v46, %s2435_s11 }
 0x15f   : > { %917 = vrot.lane.b32.xlu0 %v624_v45, %s2434_s1 }
 0x162   : > { %791 = vrot.lane.b32.xlu1 %v2984_v46, %s2432_s30 }
 0x163   : > { %729 = vrot.lane.b32.xlu0 %v624_v45, %s2430_s3 }
 0x166   : > { %1043 = vrot.lane.b32.xlu1 %v609_v47, %s2436_s0 }
 0x167   : > { %981 = vrot.lane.b32.xlu0 %v2992_v48, %s2435_s11 }
 0x16a   : > { %855 = vrot.lane.b32.xlu1 %v609_v47, %s2433_s9 }
 0x16b   : > { %793 = vrot.lane.b32.xlu0 %v2992_v48, %s2432_s30 }
 0x16e   : > { %1107 = vrot.lane.b32.xlu1 %v625_v49, %s2437_s2 }
 0x16f   : > { %1045 = vrot.lane.b32.xlu0 %v610_v50, %s2436_s0 }
 0x172   : > { %857 = vrot.lane.b32.xlu1 %v610_v50, %s2433_s9 }
 0x173   : > { %667 = vrot.lane.b32.xlu0 %v609_v47, %s2431_s20 }
 0x176   : > { %1109 = vrot.lane.b32.xlu1 %v626_v51, %s2437_s2 }
 0x177   : > { %919 = vrot.lane.b32.xlu0 %v625_v49, %s2434_s1 }
 0x17a   : > { %731 = vrot.lane.b32.xlu1 %v625_v49, %s2430_s3 }
 0x17b   : > { %669 = vrot.lane.b32.xlu0 %v610_v50, %s2431_s20 }
 0x17e   : > { %983 = vrot.lane.b32.xlu1 %v3008_v52, %s2435_s11 }
 0x17f   : > { %921 = vrot.lane.b32.xlu0 %v626_v51, %s2434_s1 }
 0x182   : > { %795 = vrot.lane.b32.xlu1 %v3008_v52, %s2432_s30 }
 0x183   : > { %733 = vrot.lane.b32.xlu0 %v626_v51, %s2430_s3 }
 0x186   : > { %1047 = vrot.lane.b32.xlu1 %v611_v53, %s2436_s0 }
 0x187   : > { %985 = vrot.lane.b32.xlu0 %v3016_v54, %s2435_s11 }
 0x18a   : > { %859 = vrot.lane.b32.xlu1 %v611_v53, %s2433_s9 }
 0x18b   : > { %797 = vrot.lane.b32.xlu0 %v3016_v54, %s2432_s30 }
 0x18e   : > { %1111 = vrot.lane.b32.xlu1 %v627_v55, %s2437_s2 }
 0x18f   : > { %1049 = vrot.lane.b32.xlu0 %v612_v56, %s2436_s0 }
 0x192   : > { %861 = vrot.lane.b32.xlu1 %v612_v56, %s2433_s9 }
 0x193   : > { %671 = vrot.lane.b32.xlu0 %v611_v53, %s2431_s20 }
 0x196   : > { %1113 = vrot.lane.b32.xlu1 %v628_v57, %s2437_s2 }
 0x197   : > { %923 = vrot.lane.b32.xlu0 %v627_v55, %s2434_s1 }
 0x198   : > { %v720_v58 = vpop.permute.xlu1 %719 }
 0x199   : > { %v656_v59 = vpop.permute.xlu0 %655 }
 0x19a   : > { %735 = vrot.lane.b32.xlu1 %v627_v55, %s2430_s3  ;;  %v1151_v17 = vsel %vm451_vm1, %v494_v16, %v656_v59  ;;  %v631_v55 = vld [vmem:[#allocation2 + $0xc9] sm:$0xff] }
 0x19b   : > { %673 = vrot.lane.b32.xlu0 %v612_v56, %s2431_s20  ;;  %v1168_v20 = vsel %vm1167_vm3, %v1151_v17, %v720_v58  ;;  %v616_v56 = vld [vmem:[#allocation2 + $0xd0] sm:$0xff] }
 0x19c   : > { %v3034_v61 = vpop.permute.xlu1 %721 }
 0x19d   : > { %v658_v62 = vpop.permute.xlu0 %657 }
 0x19e   : > { %987 = vrot.lane.b32.xlu1 %v3032_v60, %s2435_s11  ;;  %v1152_v31 = vsel %vm451_vm1, %v495_v25, %v658_v62  ;;  %v632_v62 = vld [vmem:[#allocation2 + $0xd1] sm:$0xff] }
 0x19f   : > { %925 = vrot.lane.b32.xlu0 %v628_v57, %s2434_s1  ;;  %v1169_v37 = vsel %vm1167_vm3, %v1152_v31, %v3034_v61 }
 0x1a0   : > { %v3039_v63 = vpop.permute.xlu1 %785 }
 0x1a1   : > { %v784_v0 = vpop.permute.xlu0 %783  ;;  %v1186_v41 = vsel %vm1184_vm4, %v1169_v37, %v3039_v63 }
 0x1a2   : > { %799 = vrot.lane.b32.xlu1 %v3032_v60, %s2432_s30  ;;  %v1185_v22 = vsel %vm1184_vm4, %v1168_v20, %v784_v0  ;;  %v617_v20 = vld [vmem:[#allocation2 + $0xe8] sm:$0xff] }
 0x1a3   : > { %737 = vrot.lane.b32.xlu0 %v628_v57, %s2430_s3 }
 0x1a4   : > { %v3046_v3 = vpop.permute.xlu1 %659 }
 0x1a5   : > { %v848_v4 = vpop.permute.xlu0 %847 }
 0x1a6   : > { %1051 = vrot.lane.b32.xlu1 %v613_v1, %s2436_s0  ;;  %v1202_v26 = vsel %vm1201_vm5, %v1185_v22, %v848_v4  ;;  %v3157_v22 = vld [vmem:[#allocation2 + $0xef] sm:$0xff] }
 0x1a7   : > { %989 = vrot.lane.b32.xlu0 %v3044_v2, %s2435_s11 }
 0x1a8   : > { %v912_v5 = vpop.permute.xlu1 %911 }
 0x1a9   : > { %v850_v6 = vpop.permute.xlu0 %849  ;;  %v1219_v29 = vsel %vm1218_vm6, %v1202_v26, %v912_v5  ;;  %v1153_v5 = vsel %vm451_vm1, %v2948_v28, %v3046_v3 }
 0x1aa   : > { %863 = vrot.lane.b32.xlu1 %v613_v1, %s2433_s9  ;;  %v1203_v44 = vsel %vm1201_vm5, %v1186_v41, %v850_v6  ;;  %v634_v41 = vld [vmem:[#allocation2 + $0xf1] sm:$0xff] }
 0x1ab   : > { %801 = vrot.lane.b32.xlu0 %v3044_v2, %s2432_s30 }
 0x1ac   : > { %v3054_v9 = vpop.permute.xlu1 %723 }
 0x1ad   : > { %v3056_v10 = vpop.permute.xlu0 %661  ;;  %v1170_v6 = vsel %vm1167_vm3, %v1153_v5, %v3054_v9  ;;  %v619_v5 = vld [vmem:[#allocation2 + $0x108] sm:$0xff] }
 0x1ae   : > { %1115 = vrot.lane.b32.xlu1 %v629_v7, %s2437_s2 }
 0x1af   : > { %1053 = vrot.lane.b32.xlu0 %v614_v8, %s2436_s0 }
 0x1b0   : > { %v976_v11 = vpop.permute.xlu1 %975 }
 0x1b1   : > { %v914_v12 = vpop.permute.xlu0 %913  ;;  %v1236_v30 = vsel %vm1235_vm7, %v1219_v29, %v976_v11 }
 0x1b2   : > { %865 = vrot.lane.b32.xlu1 %v614_v8, %s2433_s9  ;;  %v1220_v45 = vsel %vm1218_vm6, %v1203_v44, %v914_v12 }
 0x1b3   : > { %675 = vrot.lane.b32.xlu0 %v613_v1, %s2431_s20 }
 0x1b4   : > { %v3062_v14 = vpop.permute.xlu1 %787 }
 0x1b5   : > { %v3064_v15 = vpop.permute.xlu0 %725 }
 0x1b6   : > { %1117 = vrot.lane.b32.xlu1 %v630_v13, %s2437_s2 }
 0x1b7   : > { %927 = vrot.lane.b32.xlu0 %v629_v7, %s2434_s1 }
 0x1b8   : > { %v1040_v18 = vpop.permute.xlu1 %1039 }
 0x1b9   : > { %v978_v19 = vpop.permute.xlu0 %977  ;;  %v1253_v33 = vsel %vm1252_vm8, %v1236_v30, %v1040_v18  ;;  %v1154_v18 = vsel %vm451_vm1, %v2946_v27, %v3056_v10 }
 0x1ba   : > { %739 = vrot.lane.b32.xlu1 %v629_v7, %s2430_s3  ;;  %v1237_v47 = vsel %vm1235_vm7, %v1220_v45, %v978_v19  ;;  %v3133_v7 = vld [vmem:[#allocation2 + $0xe7] sm:$0xff]  ;;  %v1171_v19 = vsel %vm1167_vm3, %v1154_v18, %v3064_v15 }
 0x1bb   : > { %677 = vrot.lane.b32.xlu0 %v614_v8, %s2431_s20  ;;  %v1187_v8 = vsel %vm1184_vm4, %v1170_v6, %v3062_v14  ;;  %v604_v6 = vld [vmem:[#allocation2 + $0x10f] sm:$0xff] }
 0x1bc   : > { %v3075_v23 = vpop.permute.xlu1 %851 }
 0x1bd   : > { %v3077_v24 = vpop.permute.xlu0 %789 }
 0x1be   : > { %991 = vrot.lane.b32.xlu1 %v3072_v21, %s2435_s11 }
 0x1bf   : > { %929 = vrot.lane.b32.xlu0 %v630_v13, %s2434_s1 }
 0x1c0   : > { %v1104_v34 = vpop.permute.xlu1 %1103 }
 0x1c1   : > { %v1042_v35 = vpop.permute.xlu0 %1041  ;;  %v1270_v36 = vsel %vm1269_vm9, %v1253_v33, %v1104_v34  ;;  %v633_v33 = vld [vmem:[#allocation2 + $0xe9] sm:$0xff] }
 0x1c2   : > { %803 = vrot.lane.b32.xlu1 %v3072_v21, %s2432_s30  ;;  %1907 = vmatprep.mubr.msk.f32.mxu0 %vm1291_vm10, %v1270_v36  ;;  %v1254_v49 = vsel %vm1252_vm8, %v1237_v47, %v1042_v35  ;;  %v618_v34 = vld [vmem:[#allocation2 + $0xf0] sm:$0xff] }
 0x1c3   : > { %741 = vrot.lane.b32.xlu0 %v630_v13, %s2430_s3  ;;  %v1204_v13 = vsel %vm1201_vm5, %v1187_v8, %v3075_v23  ;;  %v1188_v23 = vsel %vm1184_vm4, %v1171_v19, %v3077_v24 }
 0x1c4   : > { %v854_v42 = vpop.permute.xlu1 %853 }
 0x1c5   : > { %v3098_v43 = vpop.permute.xlu0 %663  ;;  %v1205_v27 = vsel %vm1201_vm5, %v1188_v23, %v854_v42  ;;  %v589_v23 = vld [vmem:[#allocation2 + $0x111] sm:$0xff] }
 0x1c6   : > { %1055 = vrot.lane.b32.xlu1 %v615_v38, %s2436_s0 }
 0x1c7   : > { %993 = vrot.lane.b32.xlu0 %v3094_v39, %s2435_s11 }
 0x1c8   : > { %v1106_v50 = vpop.permute.xlu1 %1105 }
 0x1c9   : > { %v916_v51 = vpop.permute.xlu0 %915  ;;  %v1271_v53 = vsel %vm1269_vm9, %v1254_v49, %v1106_v50  ;;  %v1155_v49 = vsel %vm451_vm1, %v2960_v32, %v3098_v43 }
 0x1ca   : > { %867 = vrot.lane.b32.xlu1 %v615_v38, %s2433_s9  ;;  %1908 = vmatmul.mubr.msk.f32.vlgmr.msra.gmra.mrb[0].mxu0 %vm1291_vm10, %v1271_v53  ;;  %v1221_v28 = vsel %vm1218_vm6, %v1204_v13, %v916_v51  ;;  %v603_v51 = vld [vmem:[#allocation2 + $0x107] sm:$0xff] }
 0x1cb   : > { %805 = vrot.lane.b32.xlu0 %v3094_v39, %s2432_s30 }
 0x1cc   : > { %v3112_v57 = vpop.permute.xlu1 %727 }
 0x1cd   : > { %v3114_v58 = vpop.permute.xlu0 %665  ;;  %v1172_v50 = vsel %vm1167_vm3, %v1155_v49, %v3112_v57  ;;  %v637_v49 = vld [vmem:[#allocation2 + $0x129] sm:$0xff] }
 0x1ce   : > { %1119 = vrot.lane.b32.xlu1 %v631_v55, %s2437_s2 }
 0x1cf   : > { %1057 = vrot.lane.b32.xlu0 %v616_v56, %s2436_s0 }
 0x1d0   : > { %v980_v59 = vpop.permute.xlu1 %979 }
 0x1d1   : > { %v918_v61 = vpop.permute.xlu0 %917  ;;  %v1238_v3 = vsel %vm1235_vm7, %v1221_v28, %v980_v59 }
 0x1d2   : > { %869 = vrot.lane.b32.xlu1 %v616_v56, %s2433_s9  ;;  %v1222_v10 = vsel %vm1218_vm6, %v1205_v27, %v918_v61 }
 0x1d3   : > { %679 = vrot.lane.b32.xlu0 %v615_v38, %s2431_s20 }
 0x1d4   : > { %v3120_v63 = vpop.permute.xlu1 %791 }
 0x1d5   : > { %v3122_v0 = vpop.permute.xlu0 %729  ;;  %v1189_v53 = vsel %vm1184_vm4, %v1172_v50, %v3120_v63  ;;  %v1156_v63 = vsel %vm451_vm1, %v2968_v40, %v3114_v58 }
 0x1d6   : > { %1121 = vrot.lane.b32.xlu1 %v632_v62, %s2437_s2 }
 0x1d7   : > { %931 = vrot.lane.b32.xlu0 %v631_v55, %s2434_s1 }
 0x1d8   : > { %v1044_v1 = vpop.permute.xlu1 %1043 }
 0x1d9   : > { %v982_v4 = vpop.permute.xlu0 %981  ;;  %v1255_v9 = vsel %vm1252_vm8, %v1238_v3, %v1044_v1 }
 0x1da   : > { %743 = vrot.lane.b32.xlu1 %v631_v55, %s2430_s3  ;;  %v1239_v15 = vsel %vm1235_vm7, %v1222_v10, %v982_v4  ;;  %v1173_v4 = vsel %vm1167_vm3, %v1156_v63, %v3122_v0  ;;  %v606_v10 = vld [vmem:[#allocation2 + $0x12f] sm:$0xff] }
 0x1db   : > { %681 = vrot.lane.b32.xlu0 %v616_v56, %s2431_s20 }
 0x1dc   : > { %v856_v11 = vpop.permute.xlu1 %855 }
 0x1dd   : > { %v3137_v12 = vpop.permute.xlu0 %793  ;;  %v1206_v59 = vsel %vm1201_vm5, %v1189_v53, %v856_v11 }
 0x1de   : > { %995 = vrot.lane.b32.xlu1 %v3133_v7, %s2435_s11  ;;  %v1190_v8 = vsel %vm1184_vm4, %v1173_v4, %v3137_v12  ;;  %v635_v12 = vld [vmem:[#allocation2 + $0x109] sm:$0xff] }
 0x1df   : > { %933 = vrot.lane.b32.xlu0 %v632_v62, %s2434_s1 }
 0x1e0   : > { %v1108_v16 = vpop.permute.xlu1 %1107 }
 0x1e1   : > { %v1046_v17 = vpop.permute.xlu0 %1045  ;;  %v1272_v14 = vsel %vm1269_vm9, %v1255_v9, %v1108_v16 }
 0x1e2   : > { %807 = vrot.lane.b32.xlu1 %v3133_v7, %s2432_s30  ;;  %1910 = vmatprep.mubr.msk.f32.mxu0 %vm1291_vm10, %v1272_v14  ;;  %v1256_v29 = vsel %vm1252_vm8, %v1239_v15, %v1046_v17  ;;  %v620_v17 = vld [vmem:[#allocation2 + $0x110] sm:$0xff]  ;;  %v605_v15 = vld [vmem:[#allocation2 + $0x127] sm:$0xff] }
 0x1e3   : > { %745 = vrot.lane.b32.xlu0 %v632_v62, %s2430_s3 }
 0x1e4   : > { %v858_v25 = vpop.permute.xlu1 %857 }
 0x1e5   : > { %v3161_v26 = vpop.permute.xlu0 %667  ;;  %v1207_v28 = vsel %vm1201_vm5, %v1190_v8, %v858_v25 }
 0x1e6   : > { %1059 = vrot.lane.b32.xlu1 %v617_v20, %s2436_s0 }
 0x1e7   : > { %997 = vrot.lane.b32.xlu0 %v3157_v22, %s2435_s11 }
 0x1e8   : > { %v1110_v30 = vpop.permute.xlu1 %1109 }
 0x1e9   : > { %v920_v31 = vpop.permute.xlu0 %919  ;;  %v1273_v24 = vsel %vm1269_vm9, %v1256_v29, %v1110_v30 }
 0x1ea   : > { %871 = vrot.lane.b32.xlu1 %v617_v20, %s2433_s9  ;;  %1911 = vmatmul.mubr.msk.f32.gmra.mrb[2].mxu0 %vm1291_vm10, %v1273_v24  ;;  %v1223_v61 = vsel %vm1218_vm6, %v1206_v59, %v920_v31  ;;  %v1157_v31 = vsel %vm451_vm1, %v2984_v46, %v3161_v26  ;;  %v638_v26 = vld [vmem:[#allocation2 + $0x131] sm:$0xff] }
 0x1eb   : > { %809 = vrot.lane.b32.xlu0 %v3157_v22, %s2432_s30 }
 0x1ec   : > { %v3175_v35 = vpop.permute.xlu1 %731 }
 0x1ed   : > { %v3177_v36 = vpop.permute.xlu0 %669  ;;  %v1174_v24 = vsel %vm1167_vm3, %v1157_v31, %v3175_v35 }
 0x1ee   : > { %1123 = vrot.lane.b32.xlu1 %v633_v33, %s2437_s2  ;;  %v1158_v53 = vsel %vm451_vm1, %v2992_v48, %v3177_v36 }
 0x1ef   : > { %1061 = vrot.lane.b32.xlu0 %v618_v34, %s2436_s0 }
 0x1f0   : > { %v984_v37 = vpop.permute.xlu1 %983 }
 0x1f1   : > { %v922_v38 = vpop.permute.xlu0 %921  ;;  %v1240_v32 = vsel %vm1235_vm7, %v1223_v61, %v984_v37 }
 0x1f2   : > { %873 = vrot.lane.b32.xlu1 %v618_v34, %s2433_s9  ;;  %v1224_v40 = vsel %vm1218_vm6, %v1207_v28, %v922_v38 }
 0x1f3   : > { %683 = vrot.lane.b32.xlu0 %v617_v20, %s2431_s20 }
 0x1f4   : > { %v3183_v42 = vpop.permute.xlu1 %795 }
 0x1f5   : > { %v3185_v44 = vpop.permute.xlu0 %733  ;;  %v1191_v37 = vsel %vm1184_vm4, %v1174_v24, %v3183_v42 }
 0x1f6   : > { %1125 = vrot.lane.b32.xlu1 %v634_v41, %s2437_s2 }
 0x1f7   : > { %935 = vrot.lane.b32.xlu0 %v633_v33, %s2434_s1 }
 0x1f8   : > { %v1048_v45 = vpop.permute.xlu1 %1047 }
 0x1f9   : > { %v986_v47 = vpop.permute.xlu0 %985  ;;  %v1257_v43 = vsel %vm1252_vm8, %v1240_v32, %v1048_v45 }
 0x1fa   : > { %747 = vrot.lane.b32.xlu1 %v633_v33, %s2430_s3  ;;  %v1241_v58 = vsel %vm1235_vm7, %v1224_v40, %v986_v47  ;;  %v622_v33 = vld [vmem:[#allocation2 + $0x130] sm:$0xff] }
 0x1fb   : > { %685 = vrot.lane.b32.xlu0 %v618_v34, %s2431_s20  ;;  %v621_v34 = vld [vmem:[#allocation2 + $0x128] sm:$0xff]  ;;  %s2229_s20 = scalar_lea.vmem %s3430_s28, 2048 }
 0x1fc   : > { %v860_v55 = vpop.permute.xlu1 %859  ;;  %p2230_p8 = scmp.ne.s32.totalorder %s3430_s28, %s2229_s20 }
 0x1fd   : > { %v3198_v56 = vpop.permute.xlu0 %797  ;;  %v1208_v45 = vsel %vm1201_vm5, %v1191_v37, %v860_v55  ;;  %v1175_v55 = vsel %vm1167_vm3, %v1158_v53, %v3185_v44 }
 0x1fe   : > { %999 = vrot.lane.b32.xlu1 %v603_v51, %s2435_s11  ;;  %v1192_v59 = vsel %vm1184_vm4, %v1175_v55, %v3198_v56  ;;  %p2231_p6 = pnand %p2230_p8, %p3670_p11 }
 0x1ff   : > { %937 = vrot.lane.b32.xlu0 %v634_v41, %s2434_s1 }
 0x200   : > { %v1112_v57 = vpop.permute.xlu1 %1111  ;;  %p2232_p2 = pneg %p2231_p6 }
 0x201   : > { %v1050_v62 = vpop.permute.xlu0 %1049  ;;  %v1274_v1 = vsel %vm1269_vm9, %v1257_v43, %v1112_v57 }
 0x202   : > { %811 = vrot.lane.b32.xlu1 %v603_v51, %s2432_s30  ;;  %1913 = vmatprep.mubr.msk.f32.mxu0 %vm1291_vm10, %v1274_v1  ;;  %v1258_v0 = vsel %vm1252_vm8, %v1241_v58, %v1050_v62 }
 0x203   : > { %749 = vrot.lane.b32.xlu0 %v634_v41, %s2430_s3 }
 0x204   : > { %v862_v11 = vpop.permute.xlu1 %861 }
 0x205   : > { %v3217_v13 = vpop.permute.xlu0 %671  ;;  %v1209_v43 = vsel %vm1201_vm5, %v1192_v59, %v862_v11 }
 0x206   : > { %1063 = vrot.lane.b32.xlu1 %v619_v5, %s2436_s0  ;;  %v1159_v40 = vsel %vm451_vm1, %v3008_v52, %v3217_v13 }
 0x207   : > { %1001 = vrot.lane.b32.xlu0 %v604_v6, %s2435_s11 }
 0x208   : > { %v1114_v3 = vpop.permute.xlu1 %1113 }
 0x209   : > { %v924_v9 = vpop.permute.xlu0 %923  ;;  %v1275_v16 = vsel %vm1269_vm9, %v1258_v0, %v1114_v3 }
 0x20a   : > { %875 = vrot.lane.b32.xlu1 %v619_v5, %s2433_s9  ;;  %1914 = vmatmul.mubr.msk.f32.gmra.mrb[4].mxu0 %vm1291_vm10, %v1275_v16  ;;  %v1225_v47 = vsel %vm1218_vm6, %v1208_v45, %v924_v9 }
 0x20b   : > { %813 = vrot.lane.b32.xlu0 %v604_v6, %s2432_s30  ;;  %s2438_s30 = smov [#allocation11]  }
 0x20c   : > { %v3229_v14 = vpop.permute.xlu1 %735 }
 0x20d   : > { %v3231_v18 = vpop.permute.xlu0 %673  ;;  %v1176_v58 = vsel %vm1167_vm3, %v1159_v40, %v3229_v14 }
 0x20e   : > { %1127 = vrot.lane.b32.xlu1 %v635_v12, %s2437_s2  ;;  %v1160_v52 = vsel %vm451_vm1, %v3016_v54, %v3231_v18 }
 0x20f   : > { %1065 = vrot.lane.b32.xlu0 %v620_v17, %s2436_s0 }
 0x210   : > { %v988_v19 = vpop.permute.xlu1 %987 }
 0x211   : > { %v926_v20 = vpop.permute.xlu0 %925  ;;  %v1242_v46 = vsel %vm1235_vm7, %v1225_v47, %v988_v19 }
 0x212   : > { %939 = vrot.lane.b32.xlu1 %v635_v12, %s2434_s1  ;;  %v1226_v57 = vsel %vm1218_vm6, %v1209_v43, %v926_v20 }
 0x213   : > { %877 = vrot.lane.b32.xlu0 %v620_v17, %s2433_s9  ;;  %s2233_s9 = sshll.u32 %s2438_s30, 4  ;;  %s2234_s9 = int_to_ptr.vmem [resolvable:$false] %s2233_s9 }
 0x214   : > { %v800_v25 = vpop.permute.xlu1 %799  ;;  %p2236_p3 = scmp.lt.s32.totalorder %s3430_s28, %s2234_s9 }
 0x215   : > { %v3237_v27 = vpop.permute.xlu0 %737  ;;  %v1193_v0 = vsel %vm1184_vm4, %v1176_v58, %v800_v25 }
 0x216   : > { %941 = vrot.lane.b32.xlu1 %v589_v23, %s2434_s1  ;;  %v1177_v13 = vsel %vm1167_vm3, %v1160_v52, %v3237_v27  ;;  %s2235_s1 = scalar_lea.vmem %s2234_s9, 4096 }
 0x217   : > { %1129 = vrot.lane.b32.xlu0 %v589_v23, %s2437_s2  ;;  %p2237_p0 = scmp.lt.s32.totalorder %s2235_s1, %s2229_s20 }
 0x218   : > { %v1052_v29 = vpop.permute.xlu1 %1051 }
 0x219   : > { %v990_v30 = vpop.permute.xlu0 %989  ;;  %v1259_v35 = vsel %vm1252_vm8, %v1242_v46, %v1052_v29  ;;  %p2238_p9 = por %p2237_p0, %p2236_p3 }
 0x21a   : > { %1005 = vrot.lane.b32.xlu1 %v606_v10, %s2435_s11  ;;  %v1243_v48 = vsel %vm1235_vm7, %v1226_v57, %v990_v30 }
 0x21b   : > { %1003 = vrot.lane.b32.xlu0 %v605_v15, %s2435_s11  ;;  %p2239_p5 = pnand %p2238_p9, %p2232_p2 }
 0x21c   : > { %v864_v38 = vpop.permute.xlu1 %863 }
 0x21d   : > { %v802_v41 = vpop.permute.xlu0 %801  ;;  %v1210_v16 = vsel %vm1201_vm5, %v1193_v0, %v864_v38 }
 0x21e   : > { %1069 = vrot.lane.b32.xlu1 %v622_v33, %s2436_s0  ;;  %v1194_v14 = vsel %vm1184_vm4, %v1177_v13, %v802_v41 }
 0x21f   : > { %1067 = vrot.lane.b32.xlu0 %v621_v34, %s2436_s0 }
 0x220   : > { %v1116_v50 = vpop.permute.xlu1 %1115 }
 0x221   : > { %v1054_v51 = vpop.permute.xlu0 %1053  ;;  %v1276_v42 = vsel %vm1269_vm9, %v1259_v35, %v1116_v50 }
 0x222   : > { %1133 = vrot.lane.b32.xlu1 %v638_v26, %s2437_s2  ;;  %1916 = vmatprep.mubr.msk.f32.mxu0 %vm1291_vm10, %v1276_v42  ;;  %v1260_v36 = vsel %vm1252_vm8, %v1243_v48, %v1054_v51 }
 0x223   : > { %1131 = vrot.lane.b32.xlu0 %v637_v49, %s2437_s2 }
 0x224   : > { %v866_v61 = vpop.permute.xlu1 %865 }
 0x225   : > { %v676_v32 = vpop.permute.xlu0 %675  ;;  %v1211_v29 = vsel %vm1201_vm5, %v1194_v14, %v866_v61 }
 0x226   : > { %v1161_v26 = vsel %vm451_vm1, %v3032_v60, %v676_v32 }
 0x228   : > { %v1118_v62 = vpop.permute.xlu1 %1117 }
 0x229   : > { %v928_v1 = vpop.permute.xlu0 %927  ;;  %v1277_v63 = vsel %vm1269_vm9, %v1260_v36, %v1118_v62 }
 0x22a   : > { %1917 = vmatmul.mubr.msk.f32.gmra.mrb[6].mxu0 %vm1291_vm10, %v1277_v63  ;;  %v1227_v12 = vsel %vm1218_vm6, %v1210_v16, %v928_v1 }
 0x22c   : > { %v740_v44 = vpop.permute.xlu1 %739 }
 0x22d   : > { %v678_v4 = vpop.permute.xlu0 %677  ;;  %v1178_v49 = vsel %vm1167_vm3, %v1161_v26, %v740_v44 }
 0x22e   : > { %v1162_v60 = vsel %vm451_vm1, %v3044_v2, %v678_v4 }
 0x230   : > { %v992_v5 = vpop.permute.xlu1 %991 }
 0x231   : > { %v930_v56 = vpop.permute.xlu0 %929  ;;  %v1244_v17 = vsel %vm1235_vm7, %v1227_v12, %v992_v5 }
 0x232   : > { %v1228_v30 = vsel %vm1218_vm6, %v1211_v29, %v930_v56 }
 0x234   : > { %v804_v6 = vpop.permute.xlu1 %803 }
 0x235   : > { %v742_v8 = vpop.permute.xlu0 %741  ;;  %v1195_v35 = vsel %vm1184_vm4, %v1178_v49, %v804_v6 }
 0x236   : > { %v1179_v32 = vsel %vm1167_vm3, %v1162_v60, %v742_v8 }
 0x238   : > { %v1056_v28 = vpop.permute.xlu1 %1055 }
 0x239   : > { %v994_v11 = vpop.permute.xlu0 %993  ;;  %v1261_v19 = vsel %vm1252_vm8, %v1244_v17, %v1056_v28 }
 0x23a   : > { %v1245_v31 = vsel %vm1235_vm7, %v1228_v30, %v994_v11 }
 0x23c   : > { %v868_v3 = vpop.permute.xlu1 %867 }
 0x23d   : > { %v806_v9 = vpop.permute.xlu0 %805  ;;  %v1212_v42 = vsel %vm1201_vm5, %v1195_v35, %v868_v3 }
 0x23e   : > { %v1196_v48 = vsel %vm1184_vm4, %v1179_v32, %v806_v9 }
 0x240   : > { %v1120_v20 = vpop.permute.xlu1 %1119 }
 0x241   : > { %v1058_v23 = vpop.permute.xlu0 %1057  ;;  %v1278_v10 = vsel %vm1269_vm9, %v1261_v19, %v1120_v20 }
 0x242   : > { %1919 = vmatprep.mubr.msk.f32.mxu1 %vm1291_vm10, %v1278_v10  ;;  %v1262_v24 = vsel %vm1252_vm8, %v1245_v31, %v1058_v23 }
 0x244   : > { %v870_v25 = vpop.permute.xlu1 %869 }
 0x245   : > { %v680_v15 = vpop.permute.xlu0 %679  ;;  %v1213_v1 = vsel %vm1201_vm5, %v1196_v48, %v870_v25 }
 0x246   : > { %v1163_v9 = vsel %vm451_vm1, %v3072_v21, %v680_v15 }
 0x248   : > { %v1122_v33 = vpop.permute.xlu1 %1121 }
 0x249   : > { %v932_v34 = vpop.permute.xlu0 %931  ;;  %v1279_v54 = vsel %vm1269_vm9, %v1262_v24, %v1122_v33 }
 0x24a   : > { %1920 = vmatmul.mubr.msk.f32.vlgmr.msra.gmra.mrb[0].mxu1 %vm1291_vm10, %v1279_v54  ;;  %v1229_v53 = vsel %vm1218_vm6, %v1212_v42, %v932_v34 }
 0x24c   : > { %v744_v18 = vpop.permute.xlu1 %743 }
 0x24d   : > { %v682_v27 = vpop.permute.xlu0 %681  ;;  %v1180_v16 = vsel %vm1167_vm3, %v1163_v9, %v744_v18 }
 0x24e   : > { %v1164_v21 = vsel %vm451_vm1, %v3094_v39, %v682_v27 }
 0x250   : > { %v996_v37 = vpop.permute.xlu1 %995 }
 0x251   : > { %v934_v38 = vpop.permute.xlu0 %933  ;;  %v1246_v55 = vsel %vm1235_vm7, %v1229_v53, %v996_v37 }
 0x252   : > { %v1230_v63 = vsel %vm1218_vm6, %v1213_v1, %v934_v38 }
 0x254   : > { %v808_v41 = vpop.permute.xlu1 %807 }
 0x255   : > { %v746_v45 = vpop.permute.xlu0 %745  ;;  %v1197_v12 = vsel %vm1184_vm4, %v1180_v16, %v808_v41 }
 0x256   : > { %v1181_v15 = vsel %vm1167_vm3, %v1164_v21, %v746_v45 }
 0x258   : > { %v1060_v47 = vpop.permute.xlu1 %1059 }
 0x259   : > { %v998_v46 = vpop.permute.xlu0 %997  ;;  %v1263_v59 = vsel %vm1252_vm8, %v1246_v55, %v1060_v47 }
 0x25a   : > { %v1247_v44 = vsel %vm1235_vm7, %v1230_v63, %v998_v46 }
 0x25c   : > { %v872_v50 = vpop.permute.xlu1 %871 }
 0x25d   : > { %v810_v51 = vpop.permute.xlu0 %809  ;;  %v1214_v20 = vsel %vm1201_vm5, %v1197_v12, %v872_v50 }
 0x25e   : > { %v1198_v29 = vsel %vm1184_vm4, %v1181_v15, %v810_v51 }
 0x260   : > { %v1124_v61 = vpop.permute.xlu1 %1123 }
 0x261   : > { %v1062_v43 = vpop.permute.xlu0 %1061  ;;  %v1280_v57 = vsel %vm1269_vm9, %v1263_v59, %v1124_v61 }
 0x262   : > { %1922 = vmatprep.mubr.msk.f32.mxu1 %vm1291_vm10, %v1280_v57  ;;  %v1264_v5 = vsel %vm1252_vm8, %v1247_v44, %v1062_v43 }
 0x264   : > { %v874_v36 = vpop.permute.xlu1 %873 }
 0x265   : > { %v684_v62 = vpop.permute.xlu0 %683  ;;  %v1215_v24 = vsel %vm1201_vm5, %v1198_v29, %v874_v36 }
 0x266   : > { %v1165_v41 = vsel %vm451_vm1, %v3133_v7, %v684_v62 }
 0x268   : > { %v1126_v56 = vpop.permute.xlu1 %1125 }
 0x269   : > { %v936_v6 = vpop.permute.xlu0 %935  ;;  %v1281_v2 = vsel %vm1269_vm9, %v1264_v5, %v1126_v56 }
 0x26a   : > { %1923 = vmatmul.mubr.msk.f32.gmra.mrb[2].mxu1 %vm1291_vm10, %v1281_v2  ;;  %v1231_v23 = vsel %vm1218_vm6, %v1214_v20, %v936_v6 }
 0x26c   : > { %v748_v4 = vpop.permute.xlu1 %747 }
 0x26d   : > { %v686_v8 = vpop.permute.xlu0 %685  ;;  %v1182_v47 = vsel %vm1167_vm3, %v1165_v41, %v748_v4 }
 0x26e   : > { %v1166_v45 = vsel %vm451_vm1, %v3157_v22, %v686_v8 }
 0x270   : > { %v1000_v28 = vpop.permute.xlu1 %999 }
 0x271   : > { %v938_v11 = vpop.permute.xlu0 %937  ;;  %v1248_v10 = vsel %vm1235_vm7, %v1231_v23, %v1000_v28 }
 0x272   : > { %v1232_v33 = vsel %vm1218_vm6, %v1215_v24, %v938_v11 }
 0x274   : > { %v812_v40 = vpop.permute.xlu1 %811 }
 0x275   : > { %v750_v58 = vpop.permute.xlu0 %749  ;;  %v1199_v26 = vsel %vm1184_vm4, %v1182_v47, %v812_v40 }
 0x276   : > { %v1183_v46 = vsel %vm1167_vm3, %v1166_v45, %v750_v58 }
 0x278   : > { %v1064_v0 = vpop.permute.xlu1 %1063 }
 0x279   : > { %v1002_v3 = vpop.permute.xlu0 %1001  ;;  %v1265_v52 = vsel %vm1252_vm8, %v1248_v10, %v1064_v0 }
 0x27a   : > { %v1249_v34 = vsel %vm1235_vm7, %v1232_v33, %v1002_v3 }
 0x27c   : > { %v876_v17 = vpop.permute.xlu1 %875 }
 0x27d   : > { %v814_v19 = vpop.permute.xlu0 %813  ;;  %v1216_v51 = vsel %vm1201_vm5, %v1199_v26, %v876_v17 }
 0x27e   : > { %v1200_v49 = vsel %vm1184_vm4, %v1183_v46, %v814_v19 }
 0x280   : > { %v1128_v13 = vpop.permute.xlu1 %1127 }
 0x281   : > { %v1066_v14 = vpop.permute.xlu0 %1065  ;;  %v1282_v25 = vsel %vm1269_vm9, %v1265_v52, %v1128_v13 }
 0x282   : > { %1925 = vmatprep.mubr.msk.f32.mxu1 %vm1291_vm10, %v1282_v25  ;;  %v1266_v54 = vsel %vm1252_vm8, %v1249_v34, %v1066_v14 }
 0x284   : > { %v940_v30 = vpop.permute.xlu1 %939 }
 0x285   : > { %v878_v31 = vpop.permute.xlu0 %877  ;;  %v1233_v7 = vsel %vm1218_vm6, %v1216_v51, %v940_v30 }
 0x286   : > { %v1217_v42 = vsel %vm1201_vm5, %v1200_v49, %v878_v31 }
 0x288   : > { %v942_v18 = vpop.permute.xlu1 %941 }
 0x289   : > { %v1130_v37 = vpop.permute.xlu0 %1129  ;;  %v1234_v22 = vsel %vm1218_vm6, %v1217_v42, %v942_v18 }
 0x28a   : > { %v1283_v39 = vsel %vm1269_vm9, %v1266_v54, %v1130_v37 }
 0x28b   : > { %1926 = vmatmul.mubr.msk.f32.gmra.mrb[4].mxu1 %vm1291_vm10, %v1283_v39 }
 0x28c   : > { %v1006_v27 = vpop.permute.xlu1 %1005 }
 0x28d   : > { %v1004_v38 = vpop.permute.xlu0 %1003  ;;  %v1251_v53 = vsel %vm1235_vm7, %v1234_v22, %v1006_v27 }
 0x28e   : > { %v1250_v55 = vsel %vm1235_vm7, %v1233_v7, %v1004_v38 }
 0x290   : > { %v1070_v35 = vpop.permute.xlu1 %1069 }
 0x291   : > { %v1068_v50 = vpop.permute.xlu0 %1067  ;;  %v1268_v59 = vsel %vm1252_vm8, %v1251_v53, %v1070_v35 }
 0x292   : > { %v1267_v61 = vsel %vm1252_vm8, %v1250_v55, %v1068_v50 }
 0x294   : > { %v1134_v43 = vpop.permute.xlu1 %1133 }
 0x295   : > { %v1132_v57 = vpop.permute.xlu0 %1131  ;;  %v1285_v60 = vsel %vm1269_vm9, %v1268_v59, %v1134_v43 }
 0x296   : > { %v1284_v32 = vsel %vm1269_vm9, %v1267_v61, %v1132_v57 }
 0x297   : > { %1928 = vmatprep.mubr.msk.f32.mxu1 %vm1291_vm10, %v1284_v32 }
 0x298   : > { %1929 = vmatmul.mubr.msk.f32.gmra.mrb[6].mxu1 %vm1291_vm10, %v1285_v60 }
 0x29d   : > { %v3357_v48 = vpop.f32.mrb[0].mxu0 }
 0x29e   : > { %1490 = vst [vmem:[%s2924_s29 + $0x8] sm:$0xff] %v3357_v48  ;;  %v3361_v36 = vpop.f32.mrb[1].mxu0 }
 0x29f   : > { %1489 = vst [vmem:[%s2924_s29] sm:$0xff] %v3361_v36  ;;  %v1505_v62 = vadd.f32 %v3357_v48, %v3361_v36 }
 0x2bd   : > { %v3367_v1 = vpop.f32.mrb[2].mxu0 }
 0x2be   : > { %1492 = vst [vmem:[%s2924_s29 + $0x18] sm:$0xff] %v3367_v1  ;;  %v3371_v63 = vpop.f32.mrb[3].mxu0 }
 0x2bf   : > { %1491 = vst [vmem:[%s2924_s29 + $0x10] sm:$0xff] %v3371_v63  ;;  %v1506_v44 = vadd.f32 %v1505_v62, %v3371_v63 }
 0x2c1   : > { %v1507_v5 = vadd.f32 %v3367_v1, %v1506_v44 }
 0x2dd   : > { %v3377_v56 = vpop.f32.mrb[4].mxu0 }
 0x2de   : > { %1494 = vst [vmem:[%s2924_s29 + $0x28] sm:$0xff] %v3377_v56  ;;  %v3381_v6 = vpop.f32.mrb[5].mxu0 }
 0x2df   : > { %1493 = vst [vmem:[%s2924_s29 + $0x20] sm:$0xff] %v3381_v6  ;;  %v1508_v2 = vadd.f32 %v1507_v5, %v3381_v6 }
 0x2e1   : > { %v1509_v4 = vadd.f32 %v3377_v56, %v1508_v2 }
 0x2fd   : > { %v3387_v8 = vpop.f32.mrb[6].mxu0 }
 0x2fe   : > { %1496 = vst [vmem:[%s2924_s29 + $0x38] sm:$0xff] %v3387_v8  ;;  %v3391_v28 = vpop.f32.mrb[7].mxu0 }
 0x2ff   : > { %1495 = vst [vmem:[%s2924_s29 + $0x30] sm:$0xff] %v3391_v28  ;;  %v1510_v11 = vadd.f32 %v1509_v4, %v3391_v28 }
 0x301   : > { %v1511_v40 = vadd.f32 %v3387_v8, %v1510_v11 }
 0x31d   : > { %v3397_v58 = vpop.f32.mrb[0].mxu1 }
 0x31e   : > { %1498 = vst [vmem:[%s2924_s29 + $0x48] sm:$0xff] %v3397_v58  ;;  %v3401_v0 = vpop.f32.mrb[1].mxu1 }
 0x31f   : > { %1497 = vst [vmem:[%s2924_s29 + $0x40] sm:$0xff] %v3401_v0  ;;  %v1512_v3 = vadd.f32 %v1511_v40, %v3401_v0 }
 0x321   : > { %v1513_v9 = vadd.f32 %v3397_v58, %v1512_v3 }
 0x33d   : > { %v3407_v16 = vpop.f32.mrb[2].mxu1 }
 0x33e   : > { %1500 = vst [vmem:[%s2924_s29 + $0x58] sm:$0xff] %v3407_v16  ;;  %v3411_v12 = vpop.f32.mrb[3].mxu1 }
 0x33f   : > { %1499 = vst [vmem:[%s2924_s29 + $0x50] sm:$0xff] %v3411_v12  ;;  %v1514_v17 = vadd.f32 %v1513_v9, %v3411_v12 }
 0x341   : > { %v1515_v19 = vadd.f32 %v3407_v16, %v1514_v17 }
 0x35e   : > { %v3417_v20 = vpop.f32.mrb[4].mxu1 }
 0x35f   : > { %1502 = vst [vmem:[%s2924_s29 + $0x68] sm:$0xff] %v3417_v20  ;;  %v3421_v23 = vpop.f32.mrb[5].mxu1 }
 0x360   : > { %1501 = vst [vmem:[%s2924_s29 + $0x60] sm:$0xff] %v3421_v23  ;;  %v1516_v10 = vadd.f32 %v1515_v19, %v3421_v23 }
 0x362   : > { %v1517_v52 = vadd.f32 %v3417_v20, %v1516_v10 }
 0x36b   : > { %v1930_v13 = vpop.f32.mrb[6].mxu1 }
 0x36c   : > { %1504 = vst [vmem:[%s2924_s29 + $0x78] sm:$0xff] %v1930_v13  ;;  %v1480_v14 = vpop.f32.mrb[7].mxu1 }
 0x36d   : > { %1503 = vst [vmem:[%s2924_s29 + $0x70] sm:$0xff] %v1480_v14  ;;  %v1518_v25 = vadd.f32 %v1517_v52, %v1480_v14 }
 0x36e   : > { %2242 = shalt.err (!%p2239_p5)
}
 0x36f   : > { %s2243_s29 = scalar_lea.hbm %s3435_s26, 2048  ;;  %s2247_s2 = scalar_lea.hbm %s3669_s7, 8192 }
 0x370   : > { %p2244_p4 = scmp.ne.s32.totalorder %s3435_s26, %s2243_s29  ;;  %p2248_p1 = scmp.lt.u32.totalorder %s3435_s26, %s3669_s7 }
 0x371   : > { %p2249_p13 = scmp.lt.u32.totalorder %s2247_s2, %s2243_s29  ;;  %p2251_p8 = scmp.lt.u32.totalorder %s2243_s29, %s3435_s26 }
 0x372   : > { %p2245_p10 = pnand %p2244_p4, %p3670_p11 }
 0x373   : > { %p2250_p12 = por %p2249_p13, %p2248_p1 }
 0x374   : > { %p2246_p7 = pneg %p2245_p10 }
 0x375   : > { %p2252_p6 = por %p2251_p8, %p2250_p12 }
 0x377   : > { %p2253_p2 = pnand %p2252_p6, %p2246_p7 }
 0x379   : > { %2256 = shalt.err (!%p2253_p2)
}
 0x37a   : > { %s2439_s18 = smov 128   ;;  %v1519_v21 = vadd.f32 %v1930_v13, %v1518_v25  ;;  %s1623_s4 = sshll.u32 %s2928_s19, 4  ;;  %vm1580_vm11 = vcmask 1040384   ;;  %s3489_s4 = int_to_ptr.vmem [resolvable:$true] %s1623_s4 }
 0x37b   : > { %1955 = dma.vmem_to_hbm [thread:$0]  (%p3670_p11), %s3430_s28, 2048, %s3435_s26, %s1584_s21, %s2439_s18, %s2439_s18, %s2430_s3  }
 0x37c   : > { %v1520_v15 = vrot.slane %v1519_v21, 4  ;;  %s1864_s3 = sshll.u32 %s3667_s14, 1  ;;  %s3671_s26 = sld [smem:[#allocation41_spill]] }
 0x37d   : > { %s1619_s28 = sadd.s32 %s3666_s5, %s1864_s3  ;;  %s1589_s5 = scalar_lea.sflag [#allocation13], %s2828_s13 }
 0x37e   : > { %v1521_v29 = vadd.f32 %v1520_v15, %v1519_v21  ;;  %s1865_s10 = sshll.u32 %s1619_s28, 5  ;;  %s2257_s14 = scalar_lea.vmem %s3489_s4, 32 }
 0x37f   : > { %p2258_p3 = scmp.ne.s32.totalorder %s3489_s4, %s2257_s14  ;;  %s2440_s20 = smov [#allocation12]  }
 0x380   : > { %v1522_v30 = vrot.slane %v1521_v29, 2  ;;  %s2261_s30 = sshll.u32 %s2440_s20, 4  ;;  %s2262_s30 = int_to_ptr.vmem [resolvable:$false] %s2261_s30 }
 0x381   : > { %p2259_p0 = pnand %p2258_p3, %p3670_p11  ;;  %s2263_s1 = scalar_lea.vmem %s2262_s30, 64 }
 0x382   : > { %v1523_v31 = vadd.f32 %v1522_v30, %v1521_v29  ;;  %s3672_s9 = smov %s3671_s26  ;;  %s3487_s21 = scalar_lea.hbm %s3671_s26, %s1865_s10 }
 0x383   : > { %p2260_p9 = pneg %p2259_p0  ;;  %p2264_p5 = scmp.lt.s32.totalorder %s3489_s4, %s2262_s30 }
 0x384   : > { %v1524_v24 = vrot.slane %v1523_v31, 1  ;;  %p2265_p4 = scmp.lt.s32.totalorder %s2263_s1, %s2257_s14 }
 0x386   : > { %v3464_v33 = vadd.f32 %v1524_v24, %v1523_v31  ;;  %p2266_p10 = por %p2265_p4, %p2264_p5 }
 0x388   : > { %v1526_v34 = vmul.f32 0.0078125, %v3464_v33  ;;  %p2267_p7 = pnand %p2266_p10, %p2260_p9 }
 0x38a   : > { %v1527_v54 = vsub.f32 %v3361_v36, %v1526_v34  ;;  %v1528_v18 = vsub.f32 %v3357_v48, %v1526_v34  ;;  %v1529_v37 = vsub.f32 %v3371_v63, %v1526_v34  ;;  %v1530_v39 = vsub.f32 %v3367_v1, %v1526_v34 }
 0x38b   : > { %v1531_v27 = vsub.f32 %v3381_v6, %v1526_v34  ;;  %v1532_v38 = vsub.f32 %v3377_v56, %v1526_v34  ;;  %v1533_v41 = vsub.f32 %v3391_v28, %v1526_v34  ;;  %v1534_v45 = vsub.f32 %v3387_v8, %v1526_v34 }
 0x38c   : > { %v1535_v47 = vsub.f32 %v3401_v0, %v1526_v34  ;;  %v1536_v46 = vsub.f32 %v3397_v58, %v1526_v34  ;;  %v1537_v26 = vsub.f32 %v3411_v12, %v1526_v34  ;;  %v1538_v49 = vsub.f32 %v3407_v16, %v1526_v34 }
 0x38d   : > { %v1539_v35 = vsub.f32 %v3421_v23, %v1526_v34  ;;  %v1540_v50 = vsub.f32 %v3417_v20, %v1526_v34  ;;  %v1541_v51 = vsub.f32 %v1480_v14, %v1526_v34  ;;  %v1542_v42 = vsub.f32 %v1930_v13, %v1526_v34 }
 0x38e   : > { %v1543_v7 = vmul.f32 %v1527_v54, %v1527_v54  ;;  %v1544_v22 = vmul.f32 %v1528_v18, %v1528_v18  ;;  %v1545_v53 = vmul.f32 %v1529_v37, %v1529_v37  ;;  %v1546_v59 = vmul.f32 %v1530_v39, %v1530_v39 }
 0x38f   : > { %v1547_v43 = vmul.f32 %v1531_v27, %v1531_v27  ;;  %v1548_v60 = vmul.f32 %v1532_v38, %v1532_v38  ;;  %v1549_v48 = vmul.f32 %v1533_v41, %v1533_v41  ;;  %v1550_v62 = vmul.f32 %v1534_v45, %v1534_v45 }
 0x390   : > { %v1559_v55 = vadd.f32 %v1544_v22, %v1543_v7  ;;  %v1551_v63 = vmul.f32 %v1535_v47, %v1535_v47  ;;  %v1552_v5 = vmul.f32 %v1536_v46, %v1536_v46  ;;  %v1553_v6 = vmul.f32 %v1537_v26, %v1537_v26 }
 0x391   : > { %v1554_v4 = vmul.f32 %v1538_v49, %v1538_v49  ;;  %v1555_v28 = vmul.f32 %v1539_v35, %v1539_v35  ;;  %v1556_v40 = vmul.f32 %v1540_v50, %v1540_v50  ;;  %v1557_v0 = vmul.f32 %v1541_v51, %v1541_v51 }
 0x392   : > { %v1560_v61 = vadd.f32 %v1559_v55, %v1545_v53  ;;  %v1558_v9 = vmul.f32 %v1542_v42, %v1542_v42 }
 0x394   : > { %v1561_v57 = vadd.f32 %v1560_v61, %v1546_v59 }
 0x396   : > { %v1562_v32 = vadd.f32 %v1561_v57, %v1547_v43 }
 0x398   : > { %v1563_v36 = vadd.f32 %v1562_v32, %v1548_v60 }
 0x39a   : > { %v1564_v1 = vadd.f32 %v1563_v36, %v1549_v48 }
 0x39c   : > { %v1565_v44 = vadd.f32 %v1564_v1, %v1550_v62 }
 0x39e   : > { %v1566_v56 = vadd.f32 %v1565_v44, %v1551_v63 }
 0x3a0   : > { %v1567_v2 = vadd.f32 %v1566_v56, %v1552_v5 }
 0x3a2   : > { %v1568_v8 = vadd.f32 %v1567_v2, %v1553_v6 }
 0x3a4   : > { %v1569_v11 = vadd.f32 %v1568_v8, %v1554_v4 }
 0x3a6   : > { %v1570_v58 = vadd.f32 %v1569_v11, %v1555_v28 }
 0x3a8   : > { %v1571_v3 = vadd.f32 %v1570_v58, %v1556_v40 }
 0x3aa   : > { %v1572_v16 = vadd.f32 %v1571_v3, %v1557_v0 }
 0x3ac   : > { %v1573_v12 = vadd.f32 %v1572_v16, %v1558_v9 }
 0x3ae   : > { %v1574_v17 = vrot.slane %v1573_v12, 4 }
 0x3b0   : > { %v1575_v19 = vadd.f32 %v1574_v17, %v1573_v12 }
 0x3b2   : > { %v1576_v20 = vrot.slane %v1575_v19, 2 }
 0x3b4   : > { %v1577_v23 = vadd.f32 %v1576_v20, %v1575_v19 }
 0x3b6   : > { %v1578_v10 = vrot.slane %v1577_v23, 1 }
 0x3b8   : > { %v1579_v52 = vadd.f32 %v1578_v10, %v1577_v23 }
 0x3ba   : > { %v1581_v13 = vsel %vm1580_vm11, %v3464_v33, %v1579_v52 }
 0x3bb   : > { %1582 = vst [vmem:[%s2928_s19] sm:$0x3] %v1581_v13 }
 0x3bc   : > { %2270 = shalt.err (!%p2267_p7)
}
 0x3bd   : > { %s2271_s13 = scalar_lea.hbm %s3487_s21, 32  ;;  %s2275_s11 = scalar_lea.hbm %s3672_s9, 128 }
 0x3be   : > { %p2272_p1 = scmp.ne.s32.totalorder %s3487_s21, %s2271_s13  ;;  %p2276_p8 = scmp.lt.u32.totalorder %s3487_s21, %s3672_s9 }
 0x3bf   : > { %p2277_p6 = scmp.lt.u32.totalorder %s2275_s11, %s2271_s13  ;;  %p2279_p3 = scmp.lt.u32.totalorder %s2271_s13, %s3487_s21 }
 0x3c0   : > { %p2273_p13 = pnand %p2272_p1, %p3670_p11 }
 0x3c1   : > { %p2278_p2 = por %p2277_p6, %p2276_p8 }
 0x3c2   : > { %p2274_p12 = pneg %p2273_p13 }
 0x3c3   : > { %p2280_p0 = por %p2279_p3, %p2278_p2 }
 0x3c5   : > { %p2281_p9 = pnand %p2280_p0, %p2274_p12 }
 0x3c7   : > { %2284 = shalt.err (!%p2281_p9)
}
 0x3c8   : > { %1956 = dma.vmem_to_hbm [thread:$0]  (%p3670_p11), %s3489_s4, 32, %s3487_s21, %s1589_s5  }
 0x3c9 PF: > { %s3673_s27 = sld [smem:[#allocation35_spill]]  ;;  %p1983_p5 = scmp.ge.s32.totalorder %s2419_s6, 2 }
 0x3ca   : > { %s1635_s15 = sand.u32 1, %s2391_s24  }
 0x3cb   : > { %s1636_s18 = scalar_lea.sflag [#allocation5], %s1635_s15 }
 0x3cf   : > { %p3674_p4 = scmp.ne.s32.totalorder %s3673_s27, 0 }
 0x3d1   : > { %p1974_p10 = pnand %p1983_p5, %p3674_p4 }
 0x3d3   : > { %2358 = dma.done.wait (!%p1974_p10), %s1636_s18, 2048  }
 0x3d4   : > { %2360 = vsyncadd (!%p1974_p10), %s1636_s18, 4294965248  ;;  %s1645_s3 = scalar_lea.sflag [#allocation13], %s1635_s15 }
 0x3d5   : > { %2362 = dma.done.wait (!%p1974_p10), %s1645_s3, 32  }
 0x3d6   : > { %2364 = vsyncadd (!%p1974_p10), %s1645_s3, 4294967264  ;;  %s29_s6 = sadd.s32 1, %s2419_s6   ;;  %s3676_s18 = sld [smem:[#allocation21_spill]] }
 0x3d7   : > { %p3520_p7 = scmp.ge.s32.totalorder %s29_s6, 6   ;;  %s3677_s19 = sld [smem:[#allocation22_spill]] }
 0x3d8   : > { %s3678_s28 = sld [smem:[#allocation23_spill]]  ;;  %s3679_s23 = sld [smem:[#allocation33_spill]] }
 0x3d9   : > { %s3680_s10 = sld [smem:[#allocation24_spill]]  ;;  %s3681_s26 = sld [smem:[#allocation34_spill]] }
 0x3da   : > { %s3682_s27 = sld [smem:[#allocation27_spill]]  ;;  %s3683_s4 = sld [smem:[#allocation28_spill]] }
 0x3db   : > { %s3684_s29 = sld [smem:[#allocation29_spill]]  ;;  %s3685_s30 = sld [smem:[#allocation30_spill]] }
 0x3dc   : > { %s3686_s20 = smov %s3707_s12  ;;  %s3687_s21 = smov %s2383_s22 }
 0x3dd   : > { %s3689_s24 = smov %s2395_s25  ;;  %28 = sbr.rel (!%p3520_p7) target bundleno = 22 (0x16), region = 146 }
 0x3de   : > { %s3688_s22 = smov %s3678_s28 }
 0x3df   : > { %s3690_s25 = smov %s3680_s10 }
 0x3e0   : > { %s3691_s28 = smov %s3683_s4 }
 0x3e4   :  { %1650 = vsyncpa [#allocation4], 1 }
 0x3e5   :  { %1652 = vsyncpa [#allocation4 + $0x1], 1 }
 0x3e6   :  { %1653 = vsyncpa [#allocation7], 1 }
 0x3e7   :  { %1655 = vsyncpa [#allocation7 + $0x1], 1 }
 0x3e8   :  { %1656 = vsyncpa [#allocation10], 1 }
 0x3e9   :  { %1657 = vsyncpa [#allocation5], 1 }
 0x3ea   :  { %1659 = vsyncpa [#allocation5 + $0x1], 1 }
 0x3eb   :  { %1660 = vsyncpa [#allocation13], 1 }
 0x3ec   :  { %1662 = vsyncpa [#allocation13 + $0x1], 1 }

// kernel: double_conv.4
= control target key start
LH: loop header
LB: loop body
LE: loop exit
PB: predicated region body
PF: predicated region fallthrough
CT: control target
= control target key end

     0   :  { %s5565_s0 = inlined_call_operand.hbm [shape: f32[2,16,16,128], index: 0, kind: input, shape index: {}, may-alias: {0,1,2}]   ;;  %s5566_s1 = inlined_call_operand.hbm [shape: f32[2,16,16,128], index: 1, kind: input, shape index: {}, may-alias: {0,1,2}]   ;;  %s5567_s2 = inlined_call_operand.hbm [shape: f32[2,16,16,128], index: 2, kind: input, shape index: {}, may-alias: {0,1,2}]   ;;  %s5568_s3 = inlined_call_operand.hbm [shape: f32[1,128], index: 3, kind: input, shape index: {}]   ;;  %s5569_s4 = inlined_call_operand.hbm [shape: f32[1,128], index: 4, kind: input, shape index: {}]   ;;  %s5570_s5 = inlined_call_operand.hbm [shape: f32[1152,128], index: 5, kind: input, shape index: {}]   ;;  %s5571_s6 = inlined_call_operand.hbm [shape: f32[2,16,16,128], index: 6, kind: output, shape index: {0}]   ;;  %s5572_s7 = inlined_call_operand.hbm [shape: f32[2,2,2,128], index: 7, kind: output, shape index: {1}]  }
   0x1   :  { %5606 = sst [smem:[#allocation39_spill]] %s5565_s0 }
   0x2   :  { %5607 = sst [smem:[#allocation40_spill]] %s5566_s1 }
   0x3   :  { %5608 = sst [smem:[#allocation41_spill]] %s5567_s2 }
   0x4   :  { %5609 = sst [smem:[#allocation42_spill]] %s5568_s3 }
   0x5   :  { %5610 = sst [smem:[#allocation43_spill]] %s5569_s4 }
   0x6   :  { %5611 = sst [smem:[#allocation44_spill]] %s5570_s5 }
   0x7   :  { %5612 = sst [smem:[#allocation45_spill]] %s5571_s6 }
   0x8   :  { %5613 = sst [smem:[#allocation46_spill]] %s5572_s7 }
   0x9   :  { %13 = vsyncpa [#allocation4], 0 }
   0xa   :  { %15 = vsyncpa [#allocation4 + $0x1], 0 }
   0xb   :  { %16 = vsyncpa [#allocation7], 0 }
   0xc   :  { %18 = vsyncpa [#allocation7 + $0x1], 0 }
   0xd   :  { %19 = vsyncpa [#allocation10], 0 }
   0xe   :  { %20 = vsyncpa [#allocation13], 0 }
   0xf   :  { %21 = vsyncpa [#allocation5], 0 }
  0x10   :  { %23 = vsyncpa [#allocation5 + $0x1], 0 }
  0x11   :  { %24 = vsyncpa [#allocation16], 0 }
  0x12   :  { %26 = vsyncpa [#allocation16 + $0x1], 0  ;;  %s4574_s24 = smov 0   ;;  %s4576_s25 = smov 0  }
  0x13   :  { %s4578_s26 = smov 0   ;;  %s4580_s27 = smov 0  }
  0x14   :  { %s4582_s28 = smov 0   ;;  %s4584_s29 = smov 0  }
  0x15   :  { %s4586_s30 = smov 0   ;;  %s4588_s8 = smov 0  }
  0x16   :  { %s4590_s9 = smov 0   ;;  %s4592_s10 = smov 0  }
  0x17   :  { %s4594_s11 = smov 0   ;;  %s4596_s12 = smov 0  }
  0x18   :  { %s4598_s13 = smov 0   ;;  %s4600_s14 = smov 0  }
  0x19 LB: > { %5614 = sst [smem:[#allocation24_spill]] %s4465_s24  ;;  %s4645_s15 = sadd.s32 4294967295, %s4517_s14   ;;  %s4517_s14 = sphi %s4600_s14, %s32_s14   ;;  %s4513_s13 = sphi %s4598_s13, %s5697_s13   ;;  %s4509_s12 = sphi %s4596_s12, %s5696_s12   ;;  %s4505_s11 = sphi %s4594_s11, %s5695_s11   ;;  %s4501_s10 = sphi %s4592_s10, %s5704_s10   ;;  %s4497_s9 = sphi %s4590_s9, %s5703_s9   ;;  %s4493_s8 = sphi %s4588_s8, %s5702_s8   ;;  %s4489_s30 = sphi %s4586_s30, %s5701_s30   ;;  %s4485_s29 = sphi %s4584_s29, %s5700_s29   ;;  %s4481_s28 = sphi %s4582_s28, %s5699_s28   ;;  %s4477_s27 = sphi %s4580_s27, %s5691_s27   ;;  %s4473_s26 = sphi %s4578_s26, %s5720_s26   ;;  %s4469_s25 = sphi %s4576_s25, %s5698_s25   ;;  %s4465_s24 = sphi %s4574_s24, %s5689_s24  }
  0x1a   : > { %5615 = sst [smem:[#allocation25_spill]] %s4469_s25  ;;  %p2692_p0 = scmp.ge.s32.totalorder %s4517_s14, 1 }
  0x1b   : > { %5616 = sst [smem:[#allocation26_spill]] %s4473_s26  ;;  %p5576_p1 = scmp.eq.s32.totalorder %s4645_s15, 0 }
  0x1c   : > { %5617 = sst [smem:[#allocation27_spill]] %s4481_s28  ;;  %p268_p3 = scmp.lt.s32.totalorder %s4517_s14, 5 }
  0x1d   : > { %5618 = sst [smem:[#allocation28_spill]] %s4501_s10  ;;  %s4519_s17 = smov [#allocation9]  }
  0x1e   : > { %5619 = sst [smem:[#allocation29_spill]] %s4505_s11  ;;  %p4651_p4 = pnand %p2692_p0, %p268_p3 }
  0x1f   : > { %5620 = sst [smem:[#allocation30_spill]] %s4509_s12  ;;  %s281_s18 = sshll.u32 %s4519_s17, 4  ;;  %s282_s18 = int_to_ptr.vmem [resolvable:$true] %s281_s18 }
  0x20   : > { %5621 = sst [smem:[#allocation31_spill]] %s4513_s13  ;;  %p3992_p5 = pneg %p4651_p4 }
  0x21   : > { %s5622_s16 = scalar_select %p4651_p4, 1, 0 }
  0x22   : > { %p4659_p6 = pnand %p3992_p5, %p5576_p1  ;;  %s5625_s3 = sld [smem:[#allocation42_spill]] }
  0x23   : > { %5623 = sst [smem:[#allocation32_spill]] %s5622_s16 }
  0x24   : > { %s5624_s19 = scalar_select %p4659_p6, 1, 0 }
  0x25   : > { %p4671_p8 = pneg %p4659_p6 }
  0x28   : > { %s4149_s22 = scalar_lea.hbm %s5625_s3, 16 }
  0x29   : > { %p4150_p7 = scmp.ne.s32.totalorder %s5625_s3, %s4149_s22  ;;  %p4156_p11 = scmp.lt.u32.totalorder %s4149_s22, %s5625_s3 }
  0x2b   : > { %p4152_p9 = pnand %p4671_p8, %p4150_p7 }
  0x2d   : > { %p4153_p10 = pneg %p4152_p9 }
  0x2f   : > { %p4158_p12 = pnand %p4156_p11, %p4153_p10 }
  0x31   : > { %4161 = shalt.err (!%p4158_p12)
}
  0x32   : > { %s4162_s20 = scalar_lea.vmem %s282_s18, 16  ;;  %s4169_s7 = scalar_lea.vmem %s282_s18, 32 }
  0x33   : > { %p4163_p13 = scmp.ne.s32.totalorder %s282_s18, %s4162_s20  ;;  %p4170_p5 = scmp.lt.s32.totalorder %s282_s18, %s282_s18 }
  0x34   : > { %p4171_p2 = scmp.lt.s32.totalorder %s4169_s7, %s4162_s20 }
  0x35   : > { %p4165_p0 = pnand %p4163_p13, %p4671_p8 }
  0x36   : > { %p4172_p1 = por %p4171_p2, %p4170_p5 }
  0x37   : > { %p4166_p3 = pneg %p4165_p0 }
  0x39   : > { %p4173_p4 = pnand %p4172_p1, %p4166_p3 }
  0x3b   : > { %4176 = shalt.err (!%p4173_p4)
}
  0x3c   : > { %3995 = dma.hbm_to_vmem [thread:$0]  (!%p4659_p6), %s5625_s3, 16, %s282_s18, [#allocation10]  }
  0x3d   : > { %s41_s6 = sadd.s32 1, %s4509_s12  ;;  %s44_s11 = sadd.s32 1, %s4513_s13 }
  0x3e   : > { %p42_p1 = scmp.ge.s32.totalorder %s41_s6, 2  ;;  %p5593_p2 = scmp.eq.s32.totalorder %s4517_s14, 0 }
  0x3f   : > { %s2686_s22 = sshll.u32 %s4509_s12, 3  ;;  %s89_s20 = sadd.s32 1, %s4485_s29 }
  0x40   : > { %s5706_s6 = smov (%p42_p1, %s41_s6), 0  ;;  %s5708_s11 = smov (!%p42_p1, %s44_s11), %s4513_s13 }
  0x41   : > { %5627 = sst [smem:[#allocation33_spill]] %s5706_s6  ;;  %s49_s7 = ssub.s32 %s4509_s12, %s5706_s6 }
  0x42   : > { %s2687_s21 = sadd.s32 4294967295, %s2686_s22  ;;  %p46_p4 = scmp.ge.s32.totalorder %s5708_s11, 2 }
  0x43   : > { %p78_p7 = scmp.gt.s32.totalorder %s2687_s21, 0  ;;  %s2688_s18 = sshll.u32 %s5706_s6, 3 }
  0x44   : > { %p96_p9 = scmp.ne.s32.totalorder %s4485_s29, %s4481_s28  ;;  %s5710_s11 = smov (%p46_p4, %s5708_s11), 0 }
  0x45   : > { %5628 = sst [smem:[#allocation34_spill]] %s5710_s11  ;;  %s5712_s21 = smov (!%p78_p7, %s2687_s21), 0 }
  0x46   : > { %s4704_s23 = ssub.s32 %s4513_s13, %s5710_s11  ;;  %s2689_s3 = sadd.s32 4294967295, %s2688_s18 }
  0x47   : > { %5629 = sst [smem:[#allocation35_spill]] %s4704_s23  ;;  %s4707_s10 = sor.u32 %s49_s7, %s4704_s23 }
  0x48   : > { %p82_p10 = scmp.gt.s32.totalorder %s2689_s3, 0  ;;  %p4712_p12 = por %p96_p9, %p5593_p2 }
  0x49   : > { %p102_p13 = scmp.ne.s32.totalorder %s4481_s28, %s4477_s27  ;;  %s4718_s11 = sadd.s32 8, %s2686_s22 }
  0x4a   : > { %s5714_s3 = smov (!%p82_p10, %s2689_s3), 0  ;;  %5631 = sst [smem:[#allocation36_spill]] %s4718_s11 }
  0x4b   : > { %s85_s16 = ssub.s32 %s5712_s21, %s5714_s3  ;;  %p5632_p3 = scmp.eq.s32.totalorder %s4645_s15, 0 }
  0x4c   : > { %s86_s7 = sor.u32 %s85_s16, %s4704_s23  ;;  %s4728_s24 = sadd.s32 8, %s2688_s18 }
  0x4d   : > { %p4724_p5 = por %p102_p13, %p5632_p3  ;;  %p87_p1 = scmp.eq.s32.totalorder %s86_s7, 0 }
  0x4e   : > { %p5592_p7 = scmp.lt.s32.totalorder %s4517_s14, 4  ;;  %s4736_s27 = sshll.u32 %s4513_s13, 5 }
  0x4f   : > { %s5633_s2 = scalar_select %p4724_p5, 1, 0 }
  0x50   : > { %s4732_s25 = scalar_select %p87_p1, %s4485_s29, %s89_s20  }
  0x51   : > { %5634 = sst [smem:[#allocation37_spill]] %s5633_s2  ;;  %s340_s3 = sand.u32 1, %s4517_s14  }
  0x52   : > { %s342_s16 = sand.u32 1, %s4485_s29   ;;  %s2705_s28 = sshll.u32 %s5712_s21, 1 }
  0x53   : > { %s2702_s22 = sshll.u32 %s342_s16, 4  ;;  %s354_s23 = sadd.s32 %s2705_s28, %s4736_s27 }
  0x54   : > { %s2707_s11 = sshll.u32 %s354_s23, 7  ;;  %s344_s2 = scalar_lea.vmem [#allocation6], %s2702_s22 }
  0x55   : > { %s357_s7 = sshll.u32 %s344_s2, 4  ;;  %s5635_s1 = sld [smem:[#allocation40_spill]]  ;;  %s4746_s7 = int_to_ptr.vmem [resolvable:$true] %s357_s7 }
  0x56   : > { %p4752_p9 = pnand %p5592_p7, %p4712_p12  ;;  %s4520_s2 = smov [#allocation11]  }
  0x57   : > { %s292_s28 = sshll.u32 %s4520_s2, 4  ;;  %s4758_s0 = scalar_lea.sflag [#allocation7], %s340_s3  ;;  %s4756_s28 = int_to_ptr.vmem [resolvable:$true] %s292_s28 }
  0x58   : > { %p4179_p13 = pneg %p4752_p9 }
  0x5b   : > { %s4744_s18 = scalar_lea.hbm %s5635_s1, %s2707_s11  ;;  %s4182_s21 = scalar_lea.hbm %s5635_s1, 8192 }
  0x5c   : > { %s4177_s26 = scalar_lea.hbm %s4744_s18, 256  ;;  %p4183_p12 = scmp.lt.u32.totalorder %s4744_s18, %s5635_s1 }
  0x5d   : > { %p4178_p10 = scmp.ne.s32.totalorder %s4744_s18, %s4177_s26  ;;  %p4184_p4 = scmp.lt.u32.totalorder %s4182_s21, %s4177_s26 }
  0x5e   : > { %p4186_p7 = scmp.lt.u32.totalorder %s4177_s26, %s4744_s18 }
  0x5f   : > { %p4180_p3 = pnand %p4179_p13, %p4178_p10  ;;  %p4185_p0 = por %p4184_p4, %p4183_p12 }
  0x61   : > { %p4181_p1 = pneg %p4180_p3  ;;  %p4187_p2 = por %p4186_p7, %p4185_p0 }
  0x63   : > { %p4188_p11 = pnand %p4187_p2, %p4181_p1 }
  0x65   : > { %4191 = shalt.err (!%p4188_p11)
}
  0x66   : > { %s4192_s3 = scalar_lea.vmem %s4746_s7, 256  ;;  %s4521_s22 = smov [#allocation6]  }
  0x67   : > { %p4193_p10 = scmp.ne.s32.totalorder %s4746_s7, %s4192_s3  ;;  %s4197_s2 = sshll.u32 %s4521_s22, 4  ;;  %s4198_s2 = int_to_ptr.vmem [resolvable:$false] %s4197_s2 }
  0x68   : > { %s4199_s6 = scalar_lea.vmem %s4198_s2, 512  ;;  %p4200_p6 = scmp.lt.s32.totalorder %s4746_s7, %s4198_s2 }
  0x69   : > { %p4195_p3 = pnand %p4193_p10, %p4179_p13  ;;  %p4201_p4 = scmp.lt.s32.totalorder %s4199_s6, %s4192_s3 }
  0x6b   : > { %p4196_p5 = pneg %p4195_p3  ;;  %p4202_p12 = por %p4201_p4, %p4200_p6 }
  0x6d   : > { %p4203_p0 = pnand %p4202_p12, %p4196_p5 }
  0x6f   : > { %4206 = shalt.err (!%p4203_p0)
}
  0x70   : > { %s5597_s26 = smov 128   ;;  %s5599_s11 = smov 8  }
  0x71   : > { %4008 = dma.hbm_to_vmem [thread:$0]  (!%p4752_p9), %s4744_s18, 256, %s4746_s7, %s4758_s0, %s5597_s26, %s5597_s26, %s5599_s11  }
  0x72   : > { %s5637_s4 = sld [smem:[#allocation43_spill]] }
  0x78   : > { %s4207_s16 = scalar_lea.hbm %s5637_s4, 16 }
  0x79   : > { %p4208_p6 = scmp.ne.s32.totalorder %s5637_s4, %s4207_s16  ;;  %p4214_p5 = scmp.lt.u32.totalorder %s4207_s16, %s5637_s4 }
  0x7b   : > { %p4210_p2 = pnand %p4208_p6, %p4671_p8 }
  0x7d   : > { %p4211_p11 = pneg %p4210_p2 }
  0x7f   : > { %p4216_p7 = pnand %p4214_p5, %p4211_p11 }
  0x81   : > { %4219 = shalt.err (!%p4216_p7)
}
  0x82   : > { %s4220_s7 = scalar_lea.vmem %s4756_s28, 16  ;;  %s4227_s18 = scalar_lea.vmem %s4756_s28, 32 }
  0x83   : > { %p4221_p9 = scmp.ne.s32.totalorder %s4756_s28, %s4220_s7  ;;  %p4228_p10 = scmp.lt.s32.totalorder %s4756_s28, %s4756_s28 }
  0x84   : > { %p4229_p3 = scmp.lt.s32.totalorder %s4227_s18, %s4220_s7 }
  0x85   : > { %p4223_p13 = pnand %p4221_p9, %p4671_p8 }
  0x86   : > { %p4230_p4 = por %p4229_p3, %p4228_p10 }
  0x87   : > { %p4224_p1 = pneg %p4223_p13 }
  0x89   : > { %p4231_p12 = pnand %p4230_p4, %p4224_p1 }
  0x8b   : > { %4234 = shalt.err (!%p4231_p12)
}
  0x8c   : > { %p5638_p0 = scmp.ne.s32.totalorder %s5624_s19, 0  ;;  %s4524_s23 = smov [#allocation12]  }
  0x8d   : > { %s302_s16 = sshll.u32 %s4524_s23, 4  ;;  %s5639_s5 = sld [smem:[#allocation44_spill]]  ;;  %s303_s16 = int_to_ptr.vmem [resolvable:$true] %s302_s16 }
  0x8e   : > { %3998 = dma.hbm_to_vmem [thread:$0]  (!%p5638_p0), %s5637_s4, 16, %s4756_s28, [#allocation10]  }
  0x93   : > { %s4235_s2 = scalar_lea.hbm %s5639_s5, 18432 }
  0x94   : > { %p4236_p6 = scmp.ne.s32.totalorder %s5639_s5, %s4235_s2  ;;  %p4242_p5 = scmp.lt.u32.totalorder %s4235_s2, %s5639_s5 }
  0x96   : > { %p4238_p2 = pnand %p4236_p6, %p4671_p8 }
  0x98   : > { %p4239_p11 = pneg %p4238_p2 }
  0x9a   : > { %p4244_p7 = pnand %p4242_p5, %p4239_p11 }
  0x9c   : > { %4247 = shalt.err (!%p4244_p7)
}
  0x9d   : > { %s4248_s28 = scalar_lea.vmem %s303_s16, 18432  ;;  %p4256_p10 = scmp.lt.s32.totalorder %s303_s16, %s303_s16 }
  0x9e   : > { %p4249_p9 = scmp.ne.s32.totalorder %s303_s16, %s4248_s28  ;;  %p4257_p3 = scmp.lt.s32.totalorder %s4248_s28, %s4248_s28 }
  0xa0   : > { %p4251_p13 = pnand %p4249_p9, %p4671_p8  ;;  %p4258_p4 = por %p4257_p3, %p4256_p10 }
  0xa2   : > { %p4252_p1 = pneg %p4251_p13 }
  0xa4   : > { %p4259_p12 = pnand %p4258_p4, %p4252_p1 }
  0xa6   : > { %4262 = shalt.err (!%p4259_p12)
}
  0xa7   : > { %s5640_s20 = smov 128   ;;  %s2685_s19 = sadd.s32 4294967294, %s4517_s14  }
  0xa8   : > { %4001 = dma.hbm_to_vmem [thread:$0]  (!%p5638_p0), %s5639_s5, 18432, %s303_s16, [#allocation13], %s5640_s20, %s5640_s20, %s5599_s11  }
  0xa9   : > { %s53_s17 = sadd.s32 1, %s4497_s9  ;;  %p5641_p8 = scmp.eq.s32.totalorder %s4707_s10, 0 }
  0xaa   : > { %p60_p6 = scmp.ne.s32.totalorder %s4497_s9, %s4493_s8  ;;  %p66_p2 = scmp.ne.s32.totalorder %s4493_s8, %s4489_s30 }
  0xab   : > { %s4839_s23 = scalar_select %p5641_p8, %s4497_s9, %s53_s17  }
  0xac   : > { %p233_p11 = scmp.eq.s32.totalorder %s2685_s19, 3  ;;  %s316_s3 = sand.u32 1, %s4497_s9  }
  0xad   : > { %5642 = sst [smem:[#allocation38_spill]] %s4839_s23  ;;  %p5643_p5 = scmp.eq.s32.totalorder %s4517_s14, 0 }
  0xae   : > { %p5644_p9 = scmp.eq.s32.totalorder %s4645_s15, 0  ;;  %p5646_p1 = scmp.eq.s32.totalorder %s4645_s15, 3 }
  0xaf   : > { %p62_p7 = por %p5643_p5, %p60_p6  ;;  %p4860_p0 = por %p233_p11, %p66_p2 }
  0xb0   : > { %p4850_p13 = por %p5644_p9, %p66_p2  ;;  %p4856_p10 = por %p5646_p1, %p60_p6 }
  0xb1   : > { %s5648_s10 = scalar_select %p4860_p0, 1, 0 }
  0xb2   : > { %s5647_s16 = scalar_select %p4856_p10, 1, 0 }
  0xb3   : > { %s2697_s2 = sshll.u32 %s316_s3, 7  ;;  %s2742_s6 = sshll.u32 %s4509_s12, 4 }
  0xb4   : > { %s327_s7 = sadd.s32 %s2742_s6, %s4736_s27  ;;  %s320_s18 = scalar_lea.vmem [#allocation3], %s2697_s2 }
  0xb5   : > { %s330_s28 = sshll.u32 %s320_s18, 4  ;;  %s2701_s26 = sshll.u32 %s327_s7, 7  ;;  %s4866_s28 = int_to_ptr.vmem [resolvable:$true] %s330_s28 }
  0xb6   : > { %s5649_s17 = sld [smem:[#allocation39_spill]]  ;;  %p5650_p3 = scmp.lt.s32.totalorder %s4517_s14, 4 }
  0xb7   : > { %s4879_s2 = scalar_lea.sflag [#allocation4], %s316_s3 }
  0xb8   : > { %p4875_p4 = pnand %p5650_p3, %p62_p7 }
  0xba   : > { %p4265_p8 = pneg %p4875_p4 }
  0xbc   : > { %s4871_s11 = scalar_lea.hbm %s5649_s17, %s2701_s26  ;;  %s4268_s26 = scalar_lea.hbm %s5649_s17, 8192 }
  0xbd   : > { %s4263_s6 = scalar_lea.hbm %s4871_s11, 2048  ;;  %p4269_p11 = scmp.lt.u32.totalorder %s4871_s11, %s5649_s17 }
  0xbe   : > { %p4264_p12 = scmp.ne.s32.totalorder %s4871_s11, %s4263_s6  ;;  %p4270_p5 = scmp.lt.u32.totalorder %s4268_s26, %s4263_s6 }
  0xbf   : > { %p4272_p9 = scmp.lt.u32.totalorder %s4263_s6, %s4871_s11 }
  0xc0   : > { %p4266_p6 = pnand %p4265_p8, %p4264_p12  ;;  %p4271_p7 = por %p4270_p5, %p4269_p11 }
  0xc2   : > { %p4267_p2 = pneg %p4266_p6  ;;  %p4273_p1 = por %p4272_p9, %p4271_p7 }
  0xc4   : > { %p4274_p3 = pnand %p4273_p1, %p4267_p2 }
  0xc6   : > { %4277 = shalt.err (!%p4274_p3)
}
  0xc7   : > { %s4278_s3 = scalar_lea.vmem %s4866_s28, 2048  ;;  %s4525_s7 = smov [#allocation3]  }
  0xc8   : > { %p4279_p12 = scmp.ne.s32.totalorder %s4866_s28, %s4278_s3  ;;  %s4283_s18 = sshll.u32 %s4525_s7, 4  ;;  %s4284_s18 = int_to_ptr.vmem [resolvable:$false] %s4283_s18 }
  0xc9   : > { %s4285_s21 = scalar_lea.vmem %s4284_s18, 4096  ;;  %p4286_p10 = scmp.lt.s32.totalorder %s4866_s28, %s4284_s18 }
  0xca   : > { %p4281_p6 = pnand %p4279_p12, %p4265_p8  ;;  %p4287_p11 = scmp.lt.s32.totalorder %s4285_s21, %s4278_s3 }
  0xcc   : > { %p4282_p0 = pneg %p4281_p6  ;;  %p4288_p5 = por %p4287_p11, %p4286_p10 }
  0xce   : > { %p4289_p7 = pnand %p4288_p5, %p4282_p0 }
  0xd0   : > { %4292 = shalt.err (!%p4289_p7)
}
  0xd1   : > { %s5652_s6 = smov 8   ;;  %s5653_s26 = sld [smem:[#allocation26_spill]] }
  0xd2   : > { %s5654_s19 = sld [smem:[#allocation36_spill]]  ;;  %s5655_s7 = sld [smem:[#allocation25_spill]] }
  0xd3   : > { %s5656_s18 = sld [smem:[#allocation24_spill]]  ;;  %s5657_s3 = sld [smem:[#allocation35_spill]] }
  0xd4   : > { %4005 = dma.hbm_to_vmem [thread:$0]  (!%p4875_p4), %s4871_s11, 2048, %s4866_s28, %s4879_s2, %s5640_s20, %s5640_s20, %s5652_s6  }
  0xd5   : > { %p5659_p0 = scmp.lt.s32.totalorder %s4728_s24, 15  ;;  %p5660_p9 = scmp.eq.s32.totalorder %s4517_s14, 0 }
  0xd6   : > { %p5661_p12 = scmp.eq.s32.totalorder %s4645_s15, 0  ;;  %s5663_s23 = sld [smem:[#allocation41_spill]] }
  0xd7   : > { %s125_s1 = sadd.s32 1, %s5653_s26  ;;  %s5718_s24 = smov (!%p5659_p0, %s4728_s24), 15 }
  0xd8   : > { %p5658_p10 = scmp.lt.s32.totalorder %s5654_s19, 15  ;;  %p132_p8 = scmp.ne.s32.totalorder %s5653_s26, %s5655_s7 }
  0xd9   : > { %p138_p2 = scmp.ne.s32.totalorder %s5655_s7, %s5656_s18  ;;  %s369_s4 = sand.u32 1, %s5653_s26  }
  0xda   : > { %s5716_s19 = smov (!%p5658_p10, %s5654_s19), 15  ;;  %p134_p1 = por %p132_p8, %p5660_p9 }
  0xdb   : > { %s121_s21 = ssub.s32 %s5716_s19, %s5718_s24  ;;  %p4927_p6 = por %p138_p2, %p5661_p12 }
  0xdc   : > { %s122_s5 = sor.u32 %s121_s21, %s5657_s3  ;;  %s2708_s11 = sshll.u32 %s369_s4, 4 }
  0xdd   : > { %p123_p3 = scmp.eq.s32.totalorder %s122_s5, 0  ;;  %s2710_s28 = sshll.u32 %s5716_s19, 1 }
  0xde   : > { %s5662_s17 = scalar_select %p4927_p6, 1, 0 }
  0xdf   : > { %s5720_s26 = smov (!%p123_p3, %s5653_s26), %s125_s1  ;;  %s381_s2 = sadd.s32 %s2710_s28, %s4736_s27 }
  0xe0   : > { %s2712_s13 = sshll.u32 %s381_s2, 7  ;;  %s371_s12 = scalar_lea.vmem [#allocation8], %s2708_s11 }
  0xe1   : > { %s384_s7 = sshll.u32 %s371_s12, 4  ;;  %s4938_s3 = scalar_lea.hbm %s5663_s23, %s2712_s13  ;;  %s4940_s7 = int_to_ptr.vmem [resolvable:$true] %s384_s7 }
  0xe2   : > { %p5664_p4 = scmp.lt.s32.totalorder %s4517_s14, 4  ;;  %s4293_s5 = scalar_lea.hbm %s4938_s3, 256 }
  0xe3   : > { %p4294_p5 = scmp.ne.s32.totalorder %s4938_s3, %s4293_s5  ;;  %s4298_s27 = scalar_lea.hbm %s5663_s23, 8192 }
  0xe4   : > { %p4944_p11 = pnand %p5664_p4, %p134_p1  ;;  %p4299_p8 = scmp.lt.u32.totalorder %s4938_s3, %s5663_s23 }
  0xe5   : > { %p4300_p2 = scmp.lt.u32.totalorder %s4298_s27, %s4293_s5  ;;  %p4302_p1 = scmp.lt.u32.totalorder %s4293_s5, %s4938_s3 }
  0xe6   : > { %p4295_p7 = pneg %p4944_p11 }
  0xe7   : > { %p4301_p9 = por %p4300_p2, %p4299_p8 }
  0xe8   : > { %p4296_p10 = pnand %p4295_p7, %p4294_p5 }
  0xe9   : > { %p4303_p3 = por %p4302_p1, %p4301_p9 }
  0xea   : > { %p4297_p0 = pneg %p4296_p10 }
  0xec   : > { %p4304_p12 = pnand %p4303_p3, %p4297_p0 }
  0xee   : > { %4307 = shalt.err (!%p4304_p12)
}
  0xef   : > { %s4308_s21 = scalar_lea.vmem %s4940_s7, 256  ;;  %s4526_s11 = smov [#allocation8]  }
  0xf0   : > { %p4309_p4 = scmp.ne.s32.totalorder %s4940_s7, %s4308_s21  ;;  %s4313_s28 = sshll.u32 %s4526_s11, 4  ;;  %s4314_s28 = int_to_ptr.vmem [resolvable:$false] %s4313_s28 }
  0xf1   : > { %s4315_s2 = scalar_lea.vmem %s4314_s28, 512  ;;  %p4316_p6 = scmp.lt.s32.totalorder %s4940_s7, %s4314_s28 }
  0xf2   : > { %p4311_p5 = pnand %p4309_p4, %p4295_p7  ;;  %p4317_p8 = scmp.lt.s32.totalorder %s4315_s2, %s4308_s21 }
  0xf4   : > { %p4312_p10 = pneg %p4311_p5  ;;  %p4318_p2 = por %p4317_p8, %p4316_p6 }
  0xf6   : > { %p4319_p9 = pnand %p4318_p2, %p4312_p10 }
  0xf8   : > { %4322 = shalt.err (!%p4319_p9)
}
  0xf9   : > { %4011 = dma.hbm_to_vmem [thread:$0]  (!%p4944_p11), %s4938_s3, 256, %s4940_s7, %s4758_s0, %s5640_s20, %s5640_s20, %s5652_s6  }
  0xfa   : > { %s5666_s18 = sld [smem:[#allocation32_spill]] }
 0x100   : > { %p5667_p7 = scmp.ne.s32.totalorder %s5666_s18, 0 }
 0x101   : > { %s4980_s24 = sand.u32 (!%p5667_p7), 1, %s4493_s8  }
 0x102   : > { %396 = sbr.rel (%p5667_p7) target bundleno = 865 (0x361), region = 44  ;;  %s2714_s5 = sshll.u32 (!%p5667_p7), %s4980_s24, 7 }
 0x103   : > { %s399_s12 = scalar_lea.sflag (!%p5667_p7), [#allocation4], %s4980_s24  ;;  %s4986_s4 = scalar_lea.vmem (!%p5667_p7), [#allocation3], %s2714_s5 }
 0x109   : > { %4436 = dma.done.wait (%p4850_p13), %s399_s12, 2048  }
 0x10a   : > { %4438 = vsyncadd (%p4850_p13), %s399_s12, 4294965248  ;;  %s5668_s0 = sld [smem:[#allocation27_spill]]  ;;  %s5669_s20 = sld [smem:[#allocation37_spill]] }
 0x10b   : > { %s407_s6 = sand.u32 1, %s4645_s15  }
 0x10c   : > { %s408_s13 = scalar_lea.sflag [#allocation7], %s407_s6 }
 0x110   : > { %s409_s7 = sand.u32 1, %s5668_s0   ;;  %p5670_p6 = scmp.ne.s32.totalorder %s5669_s20, 0 }
 0x111   : > { %s4994_s3 = sshll.u32 %s409_s7, 4 }
 0x112   : > { %s411_s27 = scalar_lea.vmem [#allocation6], %s4994_s3 }
 0x113   : > { %4440 = dma.done.wait (%p5670_p6), %s408_s13, 256  }
 0x114   : > { %4442 = vsyncadd (%p5670_p6), %s408_s13, 4294967040  ;;  %s5671_s19 = sld [smem:[#allocation25_spill]]  ;;  %p5672_p13 = scmp.ne.s32.totalorder %s5662_s17, 0 }
 0x11a   : > { %s418_s1 = sand.u32 1, %s5671_s19  }
 0x11b   : > { %s5002_s22 = sshll.u32 %s418_s1, 4 }
 0x11c   : > { %s420_s21 = scalar_lea.vmem [#allocation8], %s5002_s22 }
 0x11d   : > { %4444 = dma.done.wait (%p5672_p13), %s408_s13, 256  }
 0x11e   : > { %4446 = vsyncadd (%p5672_p13), %s408_s13, 4294967040  ;;  %p5673_p11 = scmp.eq.s32.totalorder %s4645_s15, 0 }
 0x120   : > { %4448 = dma.done.wait (%p5673_p11), [#allocation10], 32   ;;  %p5674_p0 = pmov %p5673_p11 }
 0x122   : > { %4450 = vsyncadd (%p5674_p0), [#allocation10], 4294967264  ;;  %p5675_p1 = pmov %p5674_p0 }
 0x123   : > { %p5676_p3 = pmov %p5674_p0 }
 0x124   : > { %4452 = dma.done.wait (%p5675_p1), [#allocation13], 18432  }
 0x125   : > { %4454 = vsyncadd (%p5676_p3), [#allocation13], 4294948864  ;;  %s2721_s11 = sshll.u32 %s4980_s24, 1  ;;  %v4527_v0 = vmov 0.0   ;;  %v5018_v1 = vld [vmem:[#allocation9] ss:$0 sm:$0xff] }
 0x126   : > { %582 = vst [vmem:[#allocation2 + $0x7] sm:$0x1] %v4527_v0  ;;  %583 = vst [vmem:[#allocation2 + $0x27] sm:$0x1] %v4527_v0  ;;  %v5020_v2 = vld [vmem:[#allocation11] ss:$0 sm:$0xff] }
 0x127   : > { %584 = vst [vmem:[#allocation2 + $0x47] sm:$0x1] %v4527_v0  ;;  %585 = vst [vmem:[#allocation2 + $0x67] sm:$0x1] %v4527_v0  ;;  %v490_v3 = vld [vmem:[%s4986_s4] sm:$0xff]  ;;  %v567_v6 = vld [vmem:[%s411_s27 + $0x8] sm:$0xff] }
 0x128   : > { %586 = vst [vmem:[#allocation2 + $0x87] sm:$0x1] %v4527_v0  ;;  %587 = vst [vmem:[#allocation2 + $0xa7] sm:$0x1] %v4527_v0  ;;  %v512_v4 = vmul.f32 %v5018_v1, %v490_v3  ;;  %v566_v5 = vld [vmem:[%s411_s27] sm:$0xff]  ;;  %v569_v9 = vmul.f32 %v5018_v1, %v567_v6  ;;  %v575_v10 = vld [vmem:[%s420_s21 + $0x8] sm:$0xff] }
 0x129   : > { %588 = vst [vmem:[#allocation2 + $0xc7] sm:$0x1] %v4527_v0  ;;  %589 = vst [vmem:[#allocation2 + $0xe7] sm:$0x1] %v4527_v0  ;;  %v574_v7 = vld [vmem:[%s420_s21] sm:$0xff]  ;;  %v568_v8 = vmul.f32 %v5018_v1, %v566_v5  ;;  %v491_v12 = vld [vmem:[%s4986_s4 + $0x8] sm:$0xff]  ;;  %v577_v15 = vmul.f32 %v5018_v1, %v575_v10 }
 0x12a   : > { %590 = vst [vmem:[#allocation2 + $0x107] sm:$0x1] %v4527_v0  ;;  %591 = vst [vmem:[#allocation2 + $0x127] sm:$0x1] %v4527_v0  ;;  %v576_v11 = vmul.f32 %v5018_v1, %v574_v7  ;;  %v492_v13 = vld [vmem:[%s4986_s4 + $0x10] sm:$0xff]  ;;  %v534_v14 = vadd.f32 %v5020_v2, %v512_v4  ;;  %v513_v16 = vmul.f32 %v5018_v1, %v491_v12  ;;  %v493_v18 = vld [vmem:[%s4986_s4 + $0x18] sm:$0xff] }
 0x12b   : > { %592 = vst [vmem:[#allocation2 + $0x18] sm:$0x1] %v4527_v0  ;;  %593 = vst [vmem:[#allocation2 + $0x38] sm:$0x1] %v4527_v0  ;;  %v514_v17 = vmul.f32 %v5018_v1, %v492_v13  ;;  %v5043_v19 = vadd.f32 %v5020_v2, %v568_v8  ;;  %v5046_v20 = vadd.f32 %v5020_v2, %v569_v9  ;;  %v494_v23 = vld [vmem:[%s4986_s4 + $0x20] sm:$0xff]  ;;  %v495_v28 = vld [vmem:[%s4986_s4 + $0x28] sm:$0xff] }
 0x12c   : > { %594 = vst [vmem:[#allocation2 + $0x58] sm:$0x1] %v4527_v0  ;;  %595 = vst [vmem:[#allocation2 + $0x78] sm:$0x1] %v4527_v0  ;;  %v5049_v21 = vadd.f32 %v5020_v2, %v576_v11  ;;  %v515_v22 = vmul.f32 %v5018_v1, %v493_v18  ;;  %v550_v24 = vmax.f32 %v534_v14, 0.0  ;;  %v5054_v25 = vadd.f32 %v5020_v2, %v577_v15  ;;  %v496_v29 = vld [vmem:[%s4986_s4 + $0x30] sm:$0xff] }
 0x12d   : > { %596 = vst [vmem:[#allocation2 + $0x98] sm:$0x1] %v4527_v0  ;;  %597 = vst [vmem:[#allocation2 + $0xb8] sm:$0x1] %v4527_v0  ;;  %v535_v26 = vadd.f32 %v5020_v2, %v513_v16  ;;  %v536_v27 = vadd.f32 %v5020_v2, %v514_v17  ;;  %v497_v30 = vld [vmem:[%s4986_s4 + $0x38] sm:$0xff]  ;;  %v572_v31 = vmax.f32 %v5043_v19, 0.0  ;;  %v516_v41 = vmul.f32 %v5018_v1, %v494_v23 }
 0x12e   : > { %598 = vst [vmem:[#allocation2 + $0xd8] sm:$0x1] %v4527_v0  ;;  %599 = vst [vmem:[#allocation2 + $0xf8] sm:$0x1] %v4527_v0  ;;  %v573_v32 = vmax.f32 %v5046_v20, 0.0  ;;  %v580_v33 = vmax.f32 %v5049_v21, 0.0  ;;  %v537_v34 = vadd.f32 %v5020_v2, %v515_v22  ;;  %v517_v44 = vmul.f32 %v5018_v1, %v495_v28 }
 0x12f   : > { %600 = vst [vmem:[#allocation2 + $0x118] sm:$0x1] %v4527_v0  ;;  %601 = vst [vmem:[#allocation2 + $0x138] sm:$0x1] %v4527_v0  ;;  %v498_v35 = vld [vmem:[%s4986_s4 + $0x40] sm:$0xff]  ;;  %v499_v36 = vld [vmem:[%s4986_s4 + $0x48] sm:$0xff]  ;;  %v518_v45 = vmul.f32 %v5018_v1, %v496_v29  ;;  %v519_v46 = vmul.f32 %v5018_v1, %v497_v30  ;;  %v538_v47 = vadd.f32 %v5020_v2, %v516_v41 }
 0x130   : > { %v500_v37 = vld [vmem:[%s4986_s4 + $0x50] sm:$0xff]  ;;  %v581_v38 = vmax.f32 %v5054_v25, 0.0  ;;  %603 = vst [vmem:[#allocation2 + $0x28] sm:$0xff] %v550_v24  ;;  %v551_v39 = vmax.f32 %v535_v26, 0.0  ;;  %v552_v40 = vmax.f32 %v536_v27, 0.0  ;;  %v501_v42 = vld [vmem:[%s4986_s4 + $0x58] sm:$0xff]  ;;  %v520_v48 = vmul.f32 %v5018_v1, %v498_v35 }
 0x131   : > { %v553_v43 = vmax.f32 %v537_v34, 0.0  ;;  %v521_v49 = vmul.f32 %v5018_v1, %v499_v36  ;;  %v522_v50 = vmul.f32 %v5018_v1, %v500_v37  ;;  %v539_v51 = vadd.f32 %v5020_v2, %v517_v44  ;;  %v502_v55 = vld [vmem:[%s4986_s4 + $0x60] sm:$0xff]  ;;  %v503_v60 = vld [vmem:[%s4986_s4 + $0x68] sm:$0xff]  ;;  %v504_v61 = vld [vmem:[%s4986_s4 + $0x70] sm:$0xff]  ;;  %s5100_s15 = scalar_lea.vmem [#allocation14], %s2714_s5  ;;  %s5104_s17 = scalar_lea.vmem [#allocation15], %s2721_s11 }
 0x132   : > { %604 = vst [vmem:[#allocation2 + $0x30] sm:$0xff] %v551_v39  ;;  %605 = vst [vmem:[#allocation2 + $0x48] sm:$0xff] %v552_v40  ;;  %v540_v52 = vadd.f32 %v5020_v2, %v518_v45  ;;  %v541_v53 = vadd.f32 %v5020_v2, %v519_v46  ;;  %v523_v54 = vmul.f32 %v5018_v1, %v501_v42  ;;  %v554_v56 = vmax.f32 %v538_v47, 0.0  ;;  %v505_v62 = vld [vmem:[%s4986_s4 + $0x78] sm:$0xff]  ;;  %s5677_s28 = sld [smem:[#allocation28_spill]] }
 0x133   : > { %606 = vst [vmem:[#allocation2 + $0x50] sm:$0xff] %v553_v43  ;;  %v542_v57 = vadd.f32 %v5020_v2, %v520_v48  ;;  %v543_v58 = vadd.f32 %v5020_v2, %v521_v49  ;;  %v544_v59 = vadd.f32 %v5020_v2, %v522_v50  ;;  %v555_v63 = vmax.f32 %v539_v51, 0.0 }
 0x134   : > { %v556_v0 = vmax.f32 %v540_v52, 0.0  ;;  %v557_v3 = vmax.f32 %v541_v53, 0.0  ;;  %v545_v4 = vadd.f32 %v5020_v2, %v523_v54  ;;  %607 = vst [vmem:[#allocation2 + $0x68] sm:$0xff] %v554_v56  ;;  %v524_v8 = vmul.f32 %v5018_v1, %v502_v55 }
 0x135   : > { %v558_v5 = vmax.f32 %v542_v57, 0.0  ;;  %v559_v6 = vmax.f32 %v543_v58, 0.0  ;;  %v560_v7 = vmax.f32 %v544_v59, 0.0  ;;  %608 = vst [vmem:[#allocation2 + $0x70] sm:$0xff] %v555_v63  ;;  %v525_v10 = vmul.f32 %v5018_v1, %v503_v60 }
 0x136   : > { %609 = vst [vmem:[#allocation2 + $0x88] sm:$0xff] %v556_v0  ;;  %610 = vst [vmem:[#allocation2 + $0x90] sm:$0xff] %v557_v3  ;;  %v561_v9 = vmax.f32 %v545_v4, 0.0  ;;  %v526_v11 = vmul.f32 %v5018_v1, %v504_v61  ;;  %v527_v12 = vmul.f32 %v5018_v1, %v505_v62  ;;  %v546_v13 = vadd.f32 %v5020_v2, %v524_v8 }
 0x137   : > { %611 = vst [vmem:[#allocation2 + $0xa8] sm:$0xff] %v558_v5  ;;  %612 = vst [vmem:[#allocation2 + $0xb0] sm:$0xff] %v559_v6  ;;  %v547_v14 = vadd.f32 %v5020_v2, %v525_v10 }
 0x138   : > { %613 = vst [vmem:[#allocation2 + $0xc8] sm:$0xff] %v560_v7  ;;  %614 = vst [vmem:[#allocation2 + $0xd0] sm:$0xff] %v561_v9  ;;  %v548_v15 = vadd.f32 %v5020_v2, %v526_v11  ;;  %v549_v16 = vadd.f32 %v5020_v2, %v527_v12  ;;  %v562_v17 = vmax.f32 %v546_v13, 0.0  ;;  %p2724_p12 = scmp.ne.s32.totalorder %s5677_s28, 0 }
 0x139   : > { %v563_v18 = vmax.f32 %v547_v14, 0.0  ;;  %v4528_v1 = vmov (!%p2724_p12), 0.0  }
 0x13a   : > { %v564_v22 = vmax.f32 %v548_v15, 0.0  ;;  %v565_v23 = vmax.f32 %v549_v16, 0.0  ;;  %615 = vst [vmem:[#allocation2 + $0xe8] sm:$0xff] %v562_v17  ;;  %622 = sbr.rel (%p2724_p12) target bundleno = 321 (0x141), region = 72  ;;  %623 = vst [vmem:[#allocation2 + $0x8] sm:$0xff] (!%p2724_p12), %v4528_v1 }
 0x13b   : > { %616 = vst [vmem:[#allocation2 + $0xf0] sm:$0xff] %v563_v18  ;;  %624 = vst [vmem:[#allocation2 + $0x10] sm:$0xff] (!%p2724_p12), %v4528_v1 }
 0x13c   : > { %617 = vst [vmem:[#allocation2 + $0x108] sm:$0xff] %v564_v22  ;;  %618 = vst [vmem:[#allocation2 + $0x110] sm:$0xff] %v565_v23 }
 0x141 PF: > { %s5678_s2 = sld [smem:[#allocation28_spill]] }
 0x147   : > { %p2725_p4 = scmp.le.s32.totalorder %s5678_s2, 0 }
 0x148   : > { %629 = vst [vmem:[#allocation2 + $0x8] sm:$0xff] (!%p2725_p4), %v572_v31  ;;  %630 = vst [vmem:[#allocation2 + $0x10] sm:$0xff] (!%p2725_p4), %v573_v32 }
 0x149   : > { %628 = sbr.rel (%p2725_p4) target bundleno = 336 (0x150), region = 76 }
 0x150 PF: > { %s5679_s18 = sld [smem:[#allocation28_spill]] }
 0x156   : > { %p2726_p5 = scmp.ne.s32.totalorder %s5679_s18, 1 }
 0x157   : > { %v4529_v2 = vmov (!%p2726_p5), 0.0  }
 0x158   : > { %634 = sbr.rel (%p2726_p5) target bundleno = 351 (0x15f), region = 80  ;;  %636 = vst [vmem:[#allocation2 + $0x128] sm:$0xff] (!%p2726_p5), %v4529_v2  ;;  %637 = vst [vmem:[#allocation2 + $0x130] sm:$0xff] (!%p2726_p5), %v4529_v2 }
 0x15f PF: > { %s5680_s5 = sld [smem:[#allocation28_spill]] }
 0x165   : > { %p2727_p10 = scmp.ge.s32.totalorder %s5680_s5, 1 }
 0x166   : > { %643 = vst [vmem:[#allocation2 + $0x128] sm:$0xff] (!%p2727_p10), %v580_v33  ;;  %644 = vst [vmem:[#allocation2 + $0x130] sm:$0xff] (!%p2727_p10), %v581_v38 }
 0x167   : > { %641 = sbr.rel (%p2727_p10) target bundleno = 366 (0x16e), region = 84 }
 0x16e PF: > { %v693_v19 = vld [vmem:[#allocation12 + $0x80] sm:$0xff]  ;;  %v694_v20 = vld [vmem:[#allocation12 + $0x88] sm:$0xff]  ;;  %v695_v28 = vld [vmem:[#allocation12 + $0x90] sm:$0xff]  ;;  %s5681_s12 = sld [smem:[#allocation28_spill]]  ;;  %s5682_s4 = sld [smem:[#allocation29_spill]] }
 0x16f   : > { %v1401_v24 = vld [vmem:[#allocation12 + $0x200] sm:$0xff]  ;;  %v3538_v26 = vpack.c.bf16 %v694_v20, %v693_v19  ;;  %v1402_v27 = vld [vmem:[#allocation12 + $0x208] sm:$0xff]  ;;  %v696_v29 = vld [vmem:[#allocation12 + $0x98] sm:$0xff]  ;;  %s2467_s7 = sshll.u32 %s5100_s15, 4  ;;  %s5683_s19 = sld [smem:[#allocation45_spill]]  ;;  %s5412_s7 = int_to_ptr.vmem [resolvable:$true] %s2467_s7 }
 0x170   : > { %v3666_v30 = vpack.c.bf16 %v1402_v27, %v1401_v24  ;;  %v3542_v31 = vpack.c.bf16 %v696_v29, %v695_v28  ;;  %v1403_v32 = vld [vmem:[#allocation12 + $0x210] sm:$0xff]  ;;  %v1404_v34 = vld [vmem:[#allocation12 + $0x218] sm:$0xff]  ;;  %v697_v35 = vld [vmem:[#allocation12 + $0xa0] sm:$0xff]  ;;  %s2446_s22 = scalar_lea.sflag [#allocation5], %s4980_s24  ;;  %s4323_s21 = scalar_lea.vmem %s5412_s7, 2048 }
 0x171   : > { %3539 = vmatprep.subr.bf16.mxu1 %v3538_v26  ;;  %v3670_v36 = vpack.c.bf16 %v1404_v34, %v1403_v32  ;;  %v698_v21 = vld [vmem:[#allocation12 + $0xa8] sm:$0xff]  ;;  %v1405_v33 = vld [vmem:[#allocation12 + $0x220] sm:$0xff]  ;;  %v699_v39 = vld [vmem:[#allocation12 + $0xb0] sm:$0xff]  ;;  %p4324_p8 = scmp.ne.s32.totalorder %s5412_s7, %s4323_s21  ;;  %p5684_p2 = scmp.ne.s32.totalorder %s5647_s16, 0 }
 0x172   : > { %v1406_v37 = vld [vmem:[#allocation12 + $0x228] sm:$0xff]  ;;  %3667 = vmatprep.subr.bf16.mxu0 %v3666_v30  ;;  %3541 = vmatpush3.bf16.msra.mxu1 %v3538_v26  ;;  %v3546_v25 = vpack.c.bf16 %v698_v21, %v697_v35  ;;  %v700_v40 = vld [vmem:[#allocation12 + $0xb8] sm:$0xff]  ;;  %v1407_v41 = vld [vmem:[#allocation12 + $0x230] sm:$0xff]  ;;  %s4530_s11 = smov [#allocation14]  }
 0x173   : > { %3669 = vmatpush3.bf16.msra.mxu0 %v3666_v30  ;;  %3543 = vmatprep.subr.bf16.mxu1 %v3542_v31  ;;  %v3674_v38 = vpack.c.bf16 %v1406_v37, %v1405_v33  ;;  %v1408_v42 = vld [vmem:[#allocation12 + $0x238] sm:$0xff]  ;;  %v3550_v43 = vpack.c.bf16 %v700_v40, %v699_v39  ;;  %v701_v45 = vld [vmem:[#allocation12 + $0xc0] sm:$0xff]  ;;  %v702_v46 = vld [vmem:[#allocation12 + $0xc8] sm:$0xff]  ;;  %p4325_p9 = pnand %p4324_p8, %p5684_p2  ;;  %s4327_s28 = sshll.u32 %s4530_s11, 4  ;;  %s4328_s28 = int_to_ptr.vmem [resolvable:$false] %s4327_s28 }
 0x174   : > { %3671 = vmatprep.subr.bf16.mxu0 %v3670_v36  ;;  %v3678_v44 = vpack.c.bf16 %v1408_v42, %v1407_v41  ;;  %v677_v47 = vld [vmem:[#allocation2 + $0x8] sm:$0xff]  ;;  %v3554_v51 = vpack.c.bf16 %v702_v46, %v701_v45  ;;  %v703_v53 = vld [vmem:[#allocation12 + $0xd0] sm:$0xff]  ;;  %v704_v54 = vld [vmem:[#allocation12 + $0xd8] sm:$0xff]  ;;  %s2745_s0 = sshll.u32 %s5681_s12, 4  ;;  %s2732_s20 = sshll.u32 %s5682_s4, 5 }
 0x175   : > { %v1409_v48 = vld [vmem:[#allocation12 + $0x240] sm:$0xff]  ;;  %v1410_v49 = vld [vmem:[#allocation12 + $0x248] sm:$0xff]  ;;  %3066 = vmatprep.mubr.f32.mxu1 %v677_v47  ;;  %v1411_v55 = vld [vmem:[#allocation12 + $0x250] sm:$0xff]  ;;  %v3558_v57 = vpack.c.bf16 %v704_v54, %v703_v53  ;;  %s2464_s6 = sadd.s32 %s2745_s0, %s2732_s20  ;;  %p4326_p7 = pneg %p4325_p9 }
 0x176   : > { %3545 = vmatpush3.bf16.msra.mxu1 %v3542_v31  ;;  %v5118_v50 = vld [vmem:[#allocation2 + $0x28] sm:$0xff]  ;;  %v3682_v52 = vpack.c.bf16 %v1410_v49, %v1409_v48  ;;  %v1412_v56 = vld [vmem:[#allocation12 + $0x258] sm:$0xff]  ;;  %v707_v3 = vld [vmem:[#allocation12 + $0xf0] sm:$0xff]  ;;  %s2733_s3 = sshll.u32 %s2464_s6, 7  ;;  %s4329_s2 = scalar_lea.vmem %s4328_s28, 4096 }
 0x177   : > { %3673 = vmatpush3.bf16.msra.mxu0 %v3670_v36  ;;  %3547 = vmatprep.subr.bf16.mxu1 %v3546_v25  ;;  %v3686_v58 = vpack.c.bf16 %v1412_v56, %v1411_v55  ;;  %v705_v59 = vld [vmem:[#allocation12 + $0xe0] sm:$0xff]  ;;  %v706_v60 = vld [vmem:[#allocation12 + $0xe8] sm:$0xff]  ;;  %v708_v4 = vld [vmem:[#allocation12 + $0xf8] sm:$0xff]  ;;  %s5421_s1 = scalar_lea.hbm %s5683_s19, %s2733_s3  ;;  %p4330_p6 = scmp.lt.s32.totalorder %s5412_s7, %s4328_s28 }
 0x178   : > { %3675 = vmatprep.subr.bf16.mxu0 %v3674_v38  ;;  %3290 = vmatprep.mubr.f32.mxu0 %v5118_v50  ;;  %v1413_v61 = vld [vmem:[#allocation12 + $0x260] sm:$0xff]  ;;  %v1414_v62 = vld [vmem:[#allocation12 + $0x268] sm:$0xff]  ;;  %v3562_v63 = vpack.c.bf16 %v706_v60, %v705_v59  ;;  %v1415_v5 = vld [vmem:[#allocation12 + $0x270] sm:$0xff]  ;;  %v3566_v7 = vpack.c.bf16 %v708_v4, %v707_v3  ;;  %p4331_p13 = scmp.lt.s32.totalorder %s4329_s2, %s4323_s21 }
 0x179   : > { %v3690_v0 = vpack.c.bf16 %v1414_v62, %v1413_v61  ;;  %v1416_v6 = vld [vmem:[#allocation12 + $0x278] sm:$0xff]  ;;  %v661_v9 = vld [vmem:[#allocation12] sm:$0xff]  ;;  %v662_v10 = vld [vmem:[#allocation12 + $0x8] sm:$0xff] }
 0x17a   : > { %3549 = vmatpush3.bf16.msra.mxu1 %v3546_v25  ;;  %v3694_v8 = vpack.c.bf16 %v1416_v6, %v1415_v5  ;;  %v1594_v11 = vld [vmem:[#allocation12 + $0x280] sm:$0xff]  ;;  %v1595_v12 = vld [vmem:[#allocation12 + $0x288] sm:$0xff]  ;;  %v3570_v13 = vpack.c.bf16 %v662_v10, %v661_v9  ;;  %v663_v15 = vld [vmem:[#allocation12 + $0x10] sm:$0xff]  ;;  %p4332_p11 = por %p4331_p13, %p4330_p6 }
 0x17b   : > { %3677 = vmatpush3.bf16.msra.mxu0 %v3674_v38  ;;  %3551 = vmatprep.subr.bf16.mxu1 %v3550_v43  ;;  %v3698_v14 = vpack.c.bf16 %v1595_v12, %v1594_v11  ;;  %v664_v16 = vld [vmem:[#allocation12 + $0x18] sm:$0xff]  ;;  %v678_v17 = vld [vmem:[#allocation2 + $0x10] sm:$0xff]  ;;  %v5121_v2 = vld [vmem:[#allocation2 + $0x48] sm:$0xff] }
 0x17c   : > { %3679 = vmatprep.subr.bf16.mxu0 %v3678_v44  ;;  %v1596_v18 = vld [vmem:[#allocation12 + $0x290] sm:$0xff]  ;;  %v1597_v22 = vld [vmem:[#allocation12 + $0x298] sm:$0xff]  ;;  %v3574_v1 = vpack.c.bf16 %v664_v16, %v663_v15  ;;  %v665_v20 = vld [vmem:[#allocation12 + $0x20] sm:$0xff]  ;;  %p4333_p0 = pnand %p4332_p11, %p4326_p7 }
 0x17d   : > { %v1386_v23 = vld [vmem:[#allocation2 + $0x30] sm:$0xff]  ;;  %v3702_v19 = vpack.c.bf16 %v1597_v22, %v1596_v18  ;;  %v1598_v26 = vld [vmem:[#allocation12 + $0x2a0] sm:$0xff]  ;;  %v668_v34 = vld [vmem:[#allocation12 + $0x38] sm:$0xff] }
 0x17e   : > { %3553 = vmatpush3.bf16.msra.mxu1 %v3550_v43  ;;  %v666_v24 = vld [vmem:[#allocation12 + $0x28] sm:$0xff]  ;;  %v667_v32 = vld [vmem:[#allocation12 + $0x30] sm:$0xff]  ;;  %v1601_v36 = vld [vmem:[#allocation12 + $0x2b8] sm:$0xff] }
 0x17f   : > { %3681 = vmatpush3.bf16.msra.mxu0 %v3678_v44  ;;  %3555 = vmatprep.subr.bf16.mxu1 %v3554_v51  ;;  %v1599_v27 = vld [vmem:[#allocation12 + $0x2a8] sm:$0xff]  ;;  %v3578_v29 = vpack.c.bf16 %v666_v24, %v665_v20  ;;  %v1600_v35 = vld [vmem:[#allocation12 + $0x2b0] sm:$0xff]  ;;  %v3582_v33 = vpack.c.bf16 %v668_v34, %v667_v32  ;;  %v669_v38 = vld [vmem:[#allocation12 + $0x40] sm:$0xff] }
 0x180   : > { %3683 = vmatprep.subr.bf16.mxu0 %v3682_v52  ;;  %v5124_v28 = vld [vmem:[#allocation2 + $0x50] sm:$0xff]  ;;  %v5127_v30 = vld [vmem:[#allocation2 + $0x68] sm:$0xff]  ;;  %v3706_v31 = vpack.c.bf16 %v1599_v27, %v1598_v26  ;;  %v3710_v25 = vpack.c.bf16 %v1601_v36, %v1600_v35  ;;  %v672_v47 = vld [vmem:[#allocation12 + $0x58] sm:$0xff] }
 0x181   : > { %v5131_v21 = vld [vmem:[#allocation2 + $0x70] sm:$0xff]  ;;  %v5135_v37 = vld [vmem:[#allocation2 + $0x88] sm:$0xff]  ;;  %v1605_v49 = vld [vmem:[#allocation12 + $0x2d8] sm:$0xff] }
 0x182   : > { %3557 = vmatpush3.bf16.msra.mxu1 %v3554_v51  ;;  %v670_v39 = vld [vmem:[#allocation12 + $0x48] sm:$0xff]  ;;  %v1602_v40 = vld [vmem:[#allocation12 + $0x2c0] sm:$0xff]  ;;  %v671_v46 = vld [vmem:[#allocation12 + $0x50] sm:$0xff] }
 0x183   : > { %3685 = vmatpush3.bf16.msra.mxu0 %v3682_v52  ;;  %3559 = vmatprep.subr.bf16.mxu1 %v3558_v57  ;;  %v1603_v41 = vld [vmem:[#allocation12 + $0x2c8] sm:$0xff]  ;;  %v3586_v43 = vpack.c.bf16 %v670_v39, %v669_v38  ;;  %v1604_v48 = vld [vmem:[#allocation12 + $0x2d0] sm:$0xff]  ;;  %v3590_v51 = vpack.c.bf16 %v672_v47, %v671_v46  ;;  %v673_v54 = vld [vmem:[#allocation12 + $0x60] sm:$0xff] }
 0x184   : > { %3687 = vmatprep.subr.bf16.mxu0 %v3686_v58  ;;  %v5139_v42 = vld [vmem:[#allocation2 + $0x90] sm:$0xff]  ;;  %v5143_v44 = vld [vmem:[#allocation2 + $0xa8] sm:$0xff]  ;;  %v3714_v45 = vpack.c.bf16 %v1603_v41, %v1602_v40  ;;  %v3718_v53 = vpack.c.bf16 %v1605_v49, %v1604_v48  ;;  %v1609_v3 = vld [vmem:[#allocation12 + $0x2f8] sm:$0xff] }
 0x185   : > { %v5151_v52 = vld [vmem:[#allocation2 + $0xc8] sm:$0xff]  ;;  %v675_v62 = vld [vmem:[#allocation12 + $0x70] sm:$0xff]  ;;  %v1018_v18 = vld [vmem:[#allocation12 + $0x118] sm:$0xff] }
 0x186   : > { %3561 = vmatpush3.bf16.msra.mxu1 %v3558_v57  ;;  %v674_v55 = vld [vmem:[#allocation12 + $0x68] sm:$0xff]  ;;  %v1606_v56 = vld [vmem:[#allocation12 + $0x2e0] sm:$0xff]  ;;  %v1021_v40 = vld [vmem:[#allocation12 + $0x130] sm:$0xff] }
 0x187   : > { %3689 = vmatpush3.bf16.msra.mxu0 %v3686_v58  ;;  %3563 = vmatprep.subr.bf16.mxu1 %v3562_v63  ;;  %v1607_v57 = vld [vmem:[#allocation12 + $0x2e8] sm:$0xff]  ;;  %v3594_v59 = vpack.c.bf16 %v674_v55, %v673_v54  ;;  %v1788_v10 = vld [vmem:[#allocation12 + $0x300] sm:$0xff]  ;;  %v1022_v41 = vld [vmem:[#allocation12 + $0x138] sm:$0xff] }
 0x188   : > { %3691 = vmatprep.subr.bf16.mxu0 %v3690_v0  ;;  %v5155_v58 = vld [vmem:[#allocation2 + $0xd0] sm:$0xff]  ;;  %v5159_v60 = vld [vmem:[#allocation2 + $0xe8] sm:$0xff]  ;;  %v3722_v61 = vpack.c.bf16 %v1607_v57, %v1606_v56  ;;  %v1795_v46 = vld [vmem:[#allocation12 + $0x338] sm:$0xff]  ;;  %v3614_v49 = vpack.c.bf16 %v1022_v41, %v1021_v40 }
 0x189   : > { %v5163_v4 = vld [vmem:[#allocation2 + $0xf0] sm:$0xff]  ;;  %v5167_v6 = vld [vmem:[#allocation2 + $0x108] sm:$0xff] }
 0x18a   : > { %3565 = vmatpush3.bf16.msra.mxu1 %v3562_v63  ;;  %v676_v63 = vld [vmem:[#allocation12 + $0x78] sm:$0xff]  ;;  %v1016_v9 = vld [vmem:[#allocation12 + $0x108] sm:$0xff]  ;;  %v1792_v34 = vld [vmem:[#allocation12 + $0x320] sm:$0xff] }
 0x18b   : > { %3693 = vmatpush3.bf16.msra.mxu0 %v3690_v0  ;;  %3567 = vmatprep.subr.bf16.mxu1 %v3566_v7  ;;  %v1608_v0 = vld [vmem:[#allocation12 + $0x2f0] sm:$0xff]  ;;  %v3598_v5 = vpack.c.bf16 %v676_v63, %v675_v62  ;;  %v1789_v11 = vld [vmem:[#allocation12 + $0x308] sm:$0xff]  ;;  %v1023_v54 = vld [vmem:[#allocation12 + $0x140] sm:$0xff] }
 0x18c   : > { %3695 = vmatprep.subr.bf16.mxu0 %v3694_v8  ;;  %v5171_v12 = vld [vmem:[#allocation2 + $0x110] sm:$0xff]  ;;  %v3730_v16 = vpack.c.bf16 %v1789_v11, %v1788_v10  ;;  %v5181_v20 = vld [vmem:[#allocation2 + $0x27] sm:$0xff]  ;;  %v1799_v10 = vld [vmem:[#allocation12 + $0x358] sm:$0xff] }
 0x18d   : > { %v5175_v15 = vld [vmem:[#allocation2 + $0x29] sm:$0xff]  ;;  %v5189_v36 = vld [vmem:[#allocation2 + $0x51] sm:$0xff] }
 0x18e   : > { %3569 = vmatpush3.bf16.msra.mxu1 %v3566_v7  ;;  %v3726_v7 = vpack.c.bf16 %v1609_v3, %v1608_v0  ;;  %v646_v22 = vld [vmem:[#allocation2 + $0xf] sm:$0xff]  ;;  %v5204_v48 = vld [vmem:[#allocation2 + $0x67] sm:$0xff] }
 0x18f   : > { %3697 = vmatpush3.bf16.msra.mxu0 %v3694_v8  ;;  %3571 = vmatprep.subr.bf16.mxu1 %v3570_v13  ;;  %v1015_v8 = vld [vmem:[#allocation12 + $0x100] sm:$0xff]  ;;  %v5186_v32 = vld [vmem:[#allocation2 + $0x2f] sm:$0xff] }
 0x190   : > { %3699 = vmatprep.subr.bf16.mxu0 %v3698_v14  ;;  %v5183_v26 = vld [vmem:[#allocation2 + $0x49] sm:$0xff]  ;;  %v5201_v47 = vld [vmem:[#allocation2 + $0x71] sm:$0xff] }
 0x191   : > { %3067 = vmatmul.mubr.f32.vlgmr.msra.gmra.mrb[0].mxu1 %v678_v17  ;;  %v1017_v17 = vld [vmem:[#allocation12 + $0x110] sm:$0xff]  ;;  %v1793_v35 = vld [vmem:[#allocation12 + $0x328] sm:$0xff]  ;;  %v1796_v57 = vld [vmem:[#allocation12 + $0x340] sm:$0xff] }
 0x192   : > { %3291 = vmatmul.mubr.f32.vlgmr.msra.gmra.mrb[0].mxu0 %v1386_v23  ;;  %3573 = vmatpush3.bf16.msra.mxu1 %v3570_v13  ;;  %v645_v13 = vld [vmem:[#allocation2 + $0x7] sm:$0xff]  ;;  %v3606_v24 = vpack.c.bf16 %v1018_v18, %v1017_v17  ;;  %v3738_v39 = vpack.c.bf16 %v1793_v35, %v1792_v34  ;;  %v5210_v56 = vld [vmem:[#allocation2 + $0x6f] sm:$0xff] }
 0x193   : > { %3701 = vmatpush3.bf16.msra.mxu0 %v3698_v14  ;;  %3069 = vmatprep.mubr.f32.mxu1 %v5118_v50  ;;  %v5147_v50 = vld [vmem:[#allocation2 + $0xb0] sm:$0xff]  ;;  %v3602_v14 = vpack.c.bf16 %v1016_v9, %v1015_v8  ;;  %v5216_v62 = vld [vmem:[#allocation2 + $0x87] sm:$0xff] }
 0x194   : > { %3293 = vmatprep.mubr.f32.mxu0 %v5121_v2  ;;  %3575 = vmatprep.subr.bf16.mxu1 %v3574_v1  ;;  %v5195_v38 = vld [vmem:[#allocation2 + $0x69] sm:$0xff]  ;;  %v1798_v9 = vld [vmem:[#allocation12 + $0x350] sm:$0xff] }
 0x195   : > { %3070 = vmatmul.mubr.f32.gmra.mrb[2].mxu1 %v1386_v23  ;;  %3703 = vmatprep.subr.bf16.mxu0 %v3702_v19  ;;  %v1790_v23 = vld [vmem:[#allocation12 + $0x310] sm:$0xff]  ;;  %v1024_v55 = vld [vmem:[#allocation12 + $0x148] sm:$0xff]  ;;  %v3750_v17 = vpack.c.bf16 %v1799_v10, %v1798_v9  ;;  %v1027_v18 = vld [vmem:[#allocation12 + $0x160] sm:$0xff] }
 0x196   : > { %3294 = vmatmul.mubr.f32.gmra.mrb[2].mxu0 %v5124_v28  ;;  %3577 = vmatpush3.bf16.msra.mxu1 %v3574_v1  ;;  %v1791_v1 = vld [vmem:[#allocation12 + $0x318] sm:$0xff]  ;;  %v3618_v63 = vpack.c.bf16 %v1024_v55, %v1023_v54  ;;  %v5219_v0 = vld [vmem:[#allocation2 + $0xa9] sm:$0xff]  ;;  %v5225_v11 = vld [vmem:[#allocation2 + $0xb1] sm:$0xff] }
 0x197   : > { %3705 = vmatpush3.bf16.msra.mxu0 %v3702_v19  ;;  %3072 = vmatprep.mubr.f32.mxu1 %v5121_v2  ;;  %v5178_v19 = vld [vmem:[#allocation2 + $0x31] sm:$0xff]  ;;  %v3734_v27 = vpack.c.bf16 %v1791_v1, %v1790_v23  ;;  %v1800_v1 = vld [vmem:[#allocation12 + $0x360] sm:$0xff] }
 0x198   : > { %3296 = vmatprep.mubr.f32.mxu0 %v5127_v30  ;;  %3579 = vmatprep.subr.bf16.mxu1 %v3578_v29  ;;  %v5222_v8 = vld [vmem:[#allocation2 + $0x8f] sm:$0xff] }
 0x199   : > { %3073 = vmatmul.mubr.f32.gmra.mrb[4].mxu1 %v5124_v28  ;;  %3707 = vmatprep.subr.bf16.mxu0 %v3706_v31  ;;  %v5234_v23 = vld [vmem:[#allocation2 + $0xaf] sm:$0xff] }
 0x19a   : > { %3297 = vmatmul.mubr.f32.gmra.mrb[4].mxu0 %v5131_v21  ;;  %3581 = vmatpush3.bf16.msra.mxu1 %v3578_v29  ;;  %v1019_v29 = vld [vmem:[#allocation12 + $0x120] sm:$0xff]  ;;  %v5246_v40 = vld [vmem:[#allocation2 + $0xcf] sm:$0xff] }
 0x19b   : > { %3709 = vmatpush3.bf16.msra.mxu0 %v3706_v31  ;;  %3075 = vmatprep.mubr.f32.mxu1 %v5127_v30  ;;  %v1020_v31 = vld [vmem:[#allocation12 + $0x128] sm:$0xff]  ;;  %v1802_v41 = vld [vmem:[#allocation12 + $0x370] sm:$0xff] }
 0x19c   : > { %3299 = vmatprep.mubr.f32.mxu0 %v5135_v37  ;;  %3583 = vmatprep.subr.bf16.mxu1 %v3582_v33  ;;  %v5243_v34 = vld [vmem:[#allocation2 + $0xe9] sm:$0xff] }
 0x19d   : > { %3076 = vmatmul.mubr.f32.gmra.mrb[6].mxu1 %v5131_v21  ;;  %3711 = vmatprep.subr.bf16.mxu0 %v3710_v25  ;;  %v5255_v54 = vld [vmem:[#allocation2 + $0x109] sm:$0xff] }
 0x19e   : > { %3300 = vmatmul.mubr.f32.gmra.mrb[6].mxu0 %v5139_v42  ;;  %3585 = vmatpush3.bf16.msra.mxu1 %v3582_v33  ;;  %v5192_v33 = vld [vmem:[#allocation2 + $0x47] sm:$0xff] }
 0x19f   : > { %3713 = vmatpush3.bf16.msra.mxu0 %v3710_v25  ;;  %3078 = vmatprep.mubr.f32.mxu1 %v5135_v37  ;;  %v3610_v25 = vpack.c.bf16 %v1020_v31, %v1019_v29  ;;  %v5240_v29 = vld [vmem:[#allocation2 + $0xc7] sm:$0xff] }
 0x1a0   : > { %3302 = vmatprep.mubr.f32.mxu0 %v5143_v44  ;;  %3587 = vmatprep.subr.bf16.mxu1 %v3586_v43  ;;  %v999_v9 = vld [vmem:[#allocation2 + $0x9] sm:$0xff] }
 0x1a1   : > { %3079 = vmatmul.mubr.f32.gmra.mrb[8].mxu1 %v5139_v42  ;;  %3715 = vmatprep.subr.bf16.mxu0 %v3714_v45 }
 0x1a2   : > { %3303 = vmatmul.mubr.f32.gmra.mrb[8].mxu0 %v5147_v50  ;;  %3589 = vmatpush3.bf16.msra.mxu1 %v3586_v43  ;;  %v5198_v43 = vld [vmem:[#allocation2 + $0x4f] sm:$0xff] }
 0x1a3   : > { %3717 = vmatpush3.bf16.msra.mxu0 %v3714_v45  ;;  %3081 = vmatprep.mubr.f32.mxu1 %v5143_v44  ;;  %v1794_v45 = vld [vmem:[#allocation12 + $0x330] sm:$0xff] }
 0x1a4   : > { %3305 = vmatprep.mubr.f32.mxu0 %v5151_v52  ;;  %3591 = vmatprep.subr.bf16.mxu1 %v3590_v51 }
 0x1a5   : > { %3082 = vmatmul.mubr.f32.gmra.mrb[10].mxu1 %v5147_v50  ;;  %3719 = vmatprep.subr.bf16.mxu0 %v3718_v53 }
 0x1a6   : > { %3306 = vmatmul.mubr.f32.gmra.mrb[10].mxu0 %v5155_v58  ;;  %3593 = vmatpush3.bf16.msra.mxu1 %v3590_v51  ;;  %v5207_v51 = vld [vmem:[#allocation2 + $0x89] sm:$0xff] }
 0x1a7   : > { %3721 = vmatpush3.bf16.msra.mxu0 %v3718_v53  ;;  %3084 = vmatprep.mubr.f32.mxu1 %v5151_v52  ;;  %v3742_v53 = vpack.c.bf16 %v1795_v46, %v1794_v45  ;;  %v1803_v45 = vld [vmem:[#allocation12 + $0x378] sm:$0xff]  ;;  %v5249_v46 = vld [vmem:[#allocation2 + $0xf1] sm:$0xff] }
 0x1a8   : > { %3308 = vmatprep.mubr.f32.mxu0 %v5159_v60  ;;  %3595 = vmatprep.subr.bf16.mxu1 %v3594_v59  ;;  %v3758_v55 = vpack.c.bf16 %v1803_v45, %v1802_v41  ;;  %v1985_v41 = vld [vmem:[#allocation12 + $0x3a0] sm:$0xff]  ;;  %v1986_v45 = vld [vmem:[#allocation12 + $0x3a8] sm:$0xff] }
 0x1a9   : > { %3085 = vmatmul.mubr.f32.gmra.mrb[12].mxu1 %v5155_v58  ;;  %3723 = vmatprep.subr.bf16.mxu0 %v3722_v61 }
 0x1aa   : > { %3309 = vmatmul.mubr.f32.gmra.mrb[12].mxu0 %v5163_v4  ;;  %3597 = vmatpush3.bf16.msra.mxu1 %v3594_v59  ;;  %v1797_v59 = vld [vmem:[#allocation12 + $0x348] sm:$0xff] }
 0x1ab   : > { %3725 = vmatpush3.bf16.msra.mxu0 %v3722_v61  ;;  %3087 = vmatprep.mubr.f32.mxu1 %v5159_v60  ;;  %v5213_v61 = vld [vmem:[#allocation2 + $0x91] sm:$0xff]  ;;  %v3746_v3 = vpack.c.bf16 %v1797_v59, %v1796_v57  ;;  %v1208_v57 = vld [vmem:[#allocation12 + $0x180] sm:$0xff] }
 0x1ac   : > { %3311 = vmatprep.mubr.f32.mxu0 %v5167_v6  ;;  %3599 = vmatprep.subr.bf16.mxu1 %v3598_v5  ;;  %v1209_v59 = vld [vmem:[#allocation12 + $0x188] sm:$0xff] }
 0x1ad   : > { %3088 = vmatmul.mubr.f32.gmra.mrb[14].mxu1 %v5163_v4  ;;  %3727 = vmatprep.subr.bf16.mxu0 %v3726_v7  ;;  %v3634_v10 = vpack.c.bf16 %v1209_v59, %v1208_v57  ;;  %v1214_v57 = vld [vmem:[#allocation12 + $0x1b0] sm:$0xff]  ;;  %v1215_v59 = vld [vmem:[#allocation12 + $0x1b8] sm:$0xff] }
 0x1ae   : > { %3312 = vmatmul.mubr.f32.gmra.mrb[14].mxu0 %v5171_v12  ;;  %3601 = vmatpush3.bf16.msra.mxu1 %v3598_v5  ;;  %v1025_v5 = vld [vmem:[#allocation12 + $0x150] sm:$0xff] }
 0x1af   : > { %3729 = vmatpush3.bf16.msra.mxu0 %v3726_v7  ;;  %3122 = vmatprep.mubr.f32.mxu1 %v645_v13  ;;  %v1026_v7 = vld [vmem:[#allocation12 + $0x158] sm:$0xff]  ;;  %v5228_v13 = vld [vmem:[#allocation2 + $0xa7] sm:$0xff] }
 0x1b0   : > { %3346 = vmatprep.mubr.f32.mxu0 %v5175_v15  ;;  %3603 = vmatprep.subr.bf16.mxu1 %v3602_v14 }
 0x1b1   : > { %3123 = vmatmul.mubr.f32.vlgmr.msra.gmra.mrb[0].mxu1 %v646_v22  ;;  %3731 = vmatprep.subr.bf16.mxu0 %v3730_v16  ;;  %v1028_v22 = vld [vmem:[#allocation12 + $0x168] sm:$0xff] }
 0x1b2   : > { %3347 = vmatmul.mubr.f32.vlgmr.msra.gmra.mrb[0].mxu0 %v5178_v19  ;;  %3605 = vmatpush3.bf16.msra.mxu1 %v3602_v14  ;;  %v3622_v14 = vpack.c.bf16 %v1026_v7, %v1025_v5  ;;  %v3626_v31 = vpack.c.bf16 %v1028_v22, %v1027_v18  ;;  %v1982_v5 = vld [vmem:[#allocation12 + $0x388] sm:$0xff]  ;;  %v1211_v18 = vld [vmem:[#allocation12 + $0x198] sm:$0xff] }
 0x1b3   : > { %3733 = vmatpush3.bf16.msra.mxu0 %v3730_v16  ;;  %3125 = vmatprep.mubr.f32.mxu1 %v5181_v20  ;;  %v5231_v16 = vld [vmem:[#allocation2 + $0xc9] sm:$0xff]  ;;  %v5261_v7 = vld [vmem:[#allocation2 + $0x111] sm:$0xff] }
 0x1b4   : > { %3349 = vmatprep.mubr.f32.mxu0 %v5183_v26  ;;  %3607 = vmatprep.subr.bf16.mxu1 %v3606_v24  ;;  %v1000_v22 = vld [vmem:[#allocation2 + $0x11] sm:$0xff] }
 0x1b5   : > { %3126 = vmatmul.mubr.f32.gmra.mrb[2].mxu1 %v5186_v32  ;;  %3735 = vmatprep.subr.bf16.mxu0 %v3734_v27 }
 0x1b6   : > { %3350 = vmatmul.mubr.f32.gmra.mrb[2].mxu0 %v5189_v36  ;;  %3609 = vmatpush3.bf16.msra.mxu1 %v3606_v24  ;;  %v1801_v24 = vld [vmem:[#allocation12 + $0x368] sm:$0xff] }
 0x1b7   : > { %3737 = vmatpush3.bf16.msra.mxu0 %v3734_v27  ;;  %3128 = vmatprep.mubr.f32.mxu1 %v5192_v33  ;;  %v5237_v27 = vld [vmem:[#allocation2 + $0xd1] sm:$0xff]  ;;  %v3754_v35 = vpack.c.bf16 %v1801_v24, %v1800_v1  ;;  %v1984_v24 = vld [vmem:[#allocation12 + $0x398] sm:$0xff] }
 0x1b8   : > { %3352 = vmatprep.mubr.f32.mxu0 %v5195_v38  ;;  %3611 = vmatprep.subr.bf16.mxu1 %v3610_v25  ;;  %v1983_v1 = vld [vmem:[#allocation12 + $0x390] sm:$0xff] }
 0x1b9   : > { %3129 = vmatmul.mubr.f32.gmra.mrb[4].mxu1 %v5198_v43  ;;  %3739 = vmatprep.subr.bf16.mxu0 %v3738_v39 }
 0x1ba   : > { %3353 = vmatmul.mubr.f32.gmra.mrb[4].mxu0 %v5201_v47  ;;  %3613 = vmatpush3.bf16.msra.mxu1 %v3610_v25  ;;  %v1029_v25 = vld [vmem:[#allocation12 + $0x170] sm:$0xff] }
 0x1bb   : > { %3741 = vmatpush3.bf16.msra.mxu0 %v3738_v39  ;;  %3131 = vmatprep.mubr.f32.mxu1 %v5204_v48  ;;  %v1030_v39 = vld [vmem:[#allocation12 + $0x178] sm:$0xff] }
 0x1bc   : > { %3355 = vmatprep.mubr.f32.mxu0 %v5207_v51  ;;  %3615 = vmatprep.subr.bf16.mxu1 %v3614_v49 }
 0x1bd   : > { %3132 = vmatmul.mubr.f32.gmra.mrb[6].mxu1 %v5210_v56  ;;  %3743 = vmatprep.subr.bf16.mxu0 %v3742_v53 }
 0x1be   : > { %3356 = vmatmul.mubr.f32.gmra.mrb[6].mxu0 %v5213_v61  ;;  %3617 = vmatpush3.bf16.msra.mxu1 %v3614_v49  ;;  %v5252_v49 = vld [vmem:[#allocation2 + $0xe7] sm:$0xff] }
 0x1bf   : > { %3745 = vmatpush3.bf16.msra.mxu0 %v3742_v53  ;;  %3134 = vmatprep.mubr.f32.mxu1 %v5216_v62  ;;  %v3630_v53 = vpack.c.bf16 %v1030_v39, %v1029_v25  ;;  %v1212_v25 = vld [vmem:[#allocation12 + $0x1a0] sm:$0xff]  ;;  %v1213_v39 = vld [vmem:[#allocation12 + $0x1a8] sm:$0xff] }
 0x1c0   : > { %3358 = vmatprep.mubr.f32.mxu0 %v5219_v0  ;;  %3619 = vmatprep.subr.bf16.mxu1 %v3618_v63 }
 0x1c1   : > { %3135 = vmatmul.mubr.f32.gmra.mrb[8].mxu1 %v5222_v8  ;;  %3747 = vmatprep.subr.bf16.mxu0 %v3746_v3 }
 0x1c2   : > { %3359 = vmatmul.mubr.f32.gmra.mrb[8].mxu0 %v5225_v11  ;;  %3621 = vmatpush3.bf16.msra.mxu1 %v3618_v63  ;;  %v5258_v63 = vld [vmem:[#allocation2 + $0xef] sm:$0xff] }
 0x1c3   : > { %3749 = vmatpush3.bf16.msra.mxu0 %v3746_v3  ;;  %3137 = vmatprep.mubr.f32.mxu1 %v5228_v13  ;;  %v1981_v3 = vld [vmem:[#allocation12 + $0x380] sm:$0xff] }
 0x1c4   : > { %3361 = vmatprep.mubr.f32.mxu0 %v5231_v16  ;;  %3623 = vmatprep.subr.bf16.mxu1 %v3622_v14 }
 0x1c5   : > { %3138 = vmatmul.mubr.f32.gmra.mrb[10].mxu1 %v5234_v23  ;;  %3751 = vmatprep.subr.bf16.mxu0 %v3750_v17 }
 0x1c6   : > { %3362 = vmatmul.mubr.f32.gmra.mrb[10].mxu0 %v5237_v27  ;;  %3625 = vmatpush3.bf16.msra.mxu1 %v3622_v14  ;;  %v3762_v14 = vpack.c.bf16 %v1982_v5, %v1981_v3  ;;  %v1987_v3 = vld [vmem:[#allocation12 + $0x3b0] sm:$0xff]  ;;  %v1988_v5 = vld [vmem:[#allocation12 + $0x3b8] sm:$0xff] }
 0x1c7   : > { %3753 = vmatpush3.bf16.msra.mxu0 %v3750_v17  ;;  %3140 = vmatprep.mubr.f32.mxu1 %v5240_v29  ;;  %v1210_v17 = vld [vmem:[#allocation12 + $0x190] sm:$0xff] }
 0x1c8   : > { %3364 = vmatprep.mubr.f32.mxu0 %v5243_v34  ;;  %3627 = vmatprep.subr.bf16.mxu1 %v3626_v31 }
 0x1c9   : > { %3141 = vmatmul.mubr.f32.gmra.mrb[12].mxu1 %v5246_v40  ;;  %3755 = vmatprep.subr.bf16.mxu0 %v3754_v35 }
 0x1ca   : > { %3365 = vmatmul.mubr.f32.gmra.mrb[12].mxu0 %v5249_v46  ;;  %3629 = vmatpush3.bf16.msra.mxu1 %v3626_v31  ;;  %v3638_v31 = vpack.c.bf16 %v1211_v18, %v1210_v17  ;;  %v1990_v17 = vld [vmem:[#allocation12 + $0x3c8] sm:$0xff] }
 0x1cb   : > { %3757 = vmatpush3.bf16.msra.mxu0 %v3754_v35  ;;  %3143 = vmatprep.mubr.f32.mxu1 %v5252_v49  ;;  %v3766_v35 = vpack.c.bf16 %v1984_v24, %v1983_v1  ;;  %v1218_v1 = vld [vmem:[#allocation12 + $0x1d0] sm:$0xff]  ;;  %v1219_v24 = vld [vmem:[#allocation12 + $0x1d8] sm:$0xff] }
 0x1cc   : > { %3367 = vmatprep.mubr.f32.mxu0 %v5255_v54  ;;  %3631 = vmatprep.subr.bf16.mxu1 %v3630_v53 }
 0x1cd   : > { %3144 = vmatmul.mubr.f32.gmra.mrb[14].mxu1 %v5258_v63  ;;  %3759 = vmatprep.subr.bf16.mxu0 %v3758_v55 }
 0x1ce   : > { %3368 = vmatmul.mubr.f32.gmra.mrb[14].mxu0 %v5261_v7  ;;  %3633 = vmatpush3.bf16.msra.mxu1 %v3630_v53  ;;  %v3642_v53 = vpack.c.bf16 %v1213_v39, %v1212_v25  ;;  %v3654_v25 = vpack.c.bf16 %v1219_v24, %v1218_v1  ;;  %v2175_v1 = vld [vmem:[#allocation12 + $0x408] sm:$0xff] }
 0x1cf   : > { %3761 = vmatpush3.bf16.msra.mxu0 %v3758_v55  ;;  %3178 = vmatprep.mubr.f32.mxu1 %v999_v9  ;;  %v3770_v55 = vpack.c.bf16 %v1986_v45, %v1985_v41  ;;  %v1216_v9 = vld [vmem:[#allocation12 + $0x1c0] sm:$0xff]  ;;  %v1221_v45 = vld [vmem:[#allocation12 + $0x1e8] sm:$0xff] }
 0x1d0   : > { %3402 = vmatprep.mubr.f32.mxu0 %v5192_v33  ;;  %3635 = vmatprep.subr.bf16.mxu1 %v3634_v10  ;;  %v1220_v41 = vld [vmem:[#allocation12 + $0x1e0] sm:$0xff]  ;;  %v1787_v24 = vld [vmem:[#allocation2 + $0x12f] sm:$0xff] }
 0x1d1   : > { %3179 = vmatmul.mubr.f32.vlgmr.msra.gmra.mrb[0].mxu1 %v1000_v22  ;;  %3763 = vmatprep.subr.bf16.mxu0 %v3762_v14 }
 0x1d2   : > { %3403 = vmatmul.mubr.f32.vlgmr.msra.gmra.mrb[0].mxu0 %v5198_v43  ;;  %3637 = vmatpush3.bf16.msra.mxu1 %v3634_v10  ;;  %v1217_v10 = vld [vmem:[#allocation12 + $0x1c8] sm:$0xff] }
 0x1d3   : > { %3765 = vmatpush3.bf16.msra.mxu0 %v3762_v14  ;;  %3181 = vmatprep.mubr.f32.mxu1 %v5175_v15  ;;  %v3646_v15 = vpack.c.bf16 %v1215_v59, %v1214_v57  ;;  %v1989_v14 = vld [vmem:[#allocation12 + $0x3c0] sm:$0xff]  ;;  %v3650_v18 = vpack.c.bf16 %v1217_v10, %v1216_v9  ;;  %v3658_v57 = vpack.c.bf16 %v1221_v45, %v1220_v41  ;;  %v1996_v9 = vld [vmem:[#allocation12 + $0x3f8] sm:$0xff]  ;;  %v5291_v10 = vld [vmem:[#allocation2 + $0x10f] sm:$0xff] }
 0x1d4   : > { %3405 = vmatprep.mubr.f32.mxu0 %v5204_v48  ;;  %3639 = vmatprep.subr.bf16.mxu1 %v3638_v31  ;;  %v3778_v22 = vpack.c.bf16 %v1990_v17, %v1989_v14  ;;  %v5287_v59 = vld [vmem:[#allocation2 + $0x107] sm:$0xff] }
 0x1d5   : > { %3182 = vmatmul.mubr.f32.gmra.mrb[2].mxu1 %v5178_v19  ;;  %3767 = vmatprep.subr.bf16.mxu0 %v3766_v35  ;;  %v3774_v19 = vpack.c.bf16 %v1988_v5, %v1987_v3  ;;  %v1222_v5 = vld [vmem:[#allocation12 + $0x1f0] sm:$0xff]  ;;  %v1786_v17 = vld [vmem:[#allocation2 + $0x127] sm:$0xff] }
 0x1d6   : > { %3406 = vmatmul.mubr.f32.gmra.mrb[2].mxu0 %v5210_v56  ;;  %3641 = vmatpush3.bf16.msra.mxu1 %v3638_v31  ;;  %v1991_v31 = vld [vmem:[#allocation12 + $0x3d0] sm:$0xff]  ;;  %v2178_v41 = vld [vmem:[#allocation12 + $0x420] sm:$0xff]  ;;  %v2179_v45 = vld [vmem:[#allocation12 + $0x428] sm:$0xff] }
 0x1d7   : > { %3769 = vmatpush3.bf16.msra.mxu0 %v3766_v35  ;;  %3184 = vmatprep.mubr.f32.mxu1 %v5183_v26  ;;  %v1992_v35 = vld [vmem:[#allocation12 + $0x3d8] sm:$0xff] }
 0x1d8   : > { %3408 = vmatprep.mubr.f32.mxu0 %v5216_v62  ;;  %3643 = vmatprep.subr.bf16.mxu1 %v3642_v53  ;;  %v3782_v39 = vpack.c.bf16 %v1992_v35, %v1991_v31  ;;  %v2176_v35 = vld [vmem:[#allocation12 + $0x410] sm:$0xff] }
 0x1d9   : > { %3185 = vmatmul.mubr.f32.gmra.mrb[4].mxu1 %v5189_v36  ;;  %3771 = vmatprep.subr.bf16.mxu0 %v3770_v55 }
 0x1da   : > { %3409 = vmatmul.mubr.f32.gmra.mrb[4].mxu0 %v5222_v8  ;;  %3645 = vmatpush3.bf16.msra.mxu1 %v3642_v53  ;;  %v1993_v53 = vld [vmem:[#allocation12 + $0x3e0] sm:$0xff] }
 0x1db   : > { %3773 = vmatpush3.bf16.msra.mxu0 %v3770_v55  ;;  %3187 = vmatprep.mubr.f32.mxu1 %v5195_v38  ;;  %v1994_v55 = vld [vmem:[#allocation12 + $0x3e8] sm:$0xff] }
 0x1dc   : > { %3411 = vmatprep.mubr.f32.mxu0 %v5228_v13  ;;  %3647 = vmatprep.subr.bf16.mxu1 %v3646_v15  ;;  %v3786_v3 = vpack.c.bf16 %v1994_v55, %v1993_v53  ;;  %v3802_v53 = vpack.c.bf16 %v2179_v45, %v2178_v41 }
 0x1dd   : > { %3188 = vmatmul.mubr.f32.gmra.mrb[6].mxu1 %v5201_v47  ;;  %3775 = vmatprep.subr.bf16.mxu0 %v3774_v19 }
 0x1de   : > { %3412 = vmatmul.mubr.f32.gmra.mrb[6].mxu0 %v5234_v23  ;;  %3649 = vmatpush3.bf16.msra.mxu1 %v3646_v15  ;;  %v1223_v15 = vld [vmem:[#allocation12 + $0x1f8] sm:$0xff] }
 0x1df   : > { %3777 = vmatpush3.bf16.msra.mxu0 %v3774_v19  ;;  %3190 = vmatprep.mubr.f32.mxu1 %v5207_v51  ;;  %v1995_v19 = vld [vmem:[#allocation12 + $0x3f0] sm:$0xff]  ;;  %v3662_v14 = vpack.c.bf16 %v1223_v15, %v1222_v5 }
 0x1e0   : > { %3414 = vmatprep.mubr.f32.mxu0 %v5240_v29  ;;  %3651 = vmatprep.subr.bf16.mxu1 %v3650_v18 }
 0x1e1   : > { %3191 = vmatmul.mubr.f32.gmra.mrb[8].mxu1 %v5213_v61  ;;  %3779 = vmatprep.subr.bf16.mxu0 %v3778_v22 }
 0x1e2   : > { %3415 = vmatmul.mubr.f32.gmra.mrb[8].mxu0 %v5246_v40  ;;  %3653 = vmatpush3.bf16.msra.mxu1 %v3650_v18  ;;  %v3790_v18 = vpack.c.bf16 %v1996_v9, %v1995_v19 }
 0x1e3   : > { %3781 = vmatpush3.bf16.msra.mxu0 %v3778_v22  ;;  %3193 = vmatprep.mubr.f32.mxu1 %v5219_v0  ;;  %v2174_v22 = vld [vmem:[#allocation12 + $0x400] sm:$0xff] }
 0x1e4   : > { %3417 = vmatprep.mubr.f32.mxu0 %v5252_v49  ;;  %3655 = vmatprep.subr.bf16.mxu1 %v3654_v25  ;;  %v3794_v31 = vpack.c.bf16 %v2175_v1, %v2174_v22 }
 0x1e5   : > { %3194 = vmatmul.mubr.f32.gmra.mrb[10].mxu1 %v5225_v11  ;;  %3783 = vmatprep.subr.bf16.mxu0 %v3782_v39 }
 0x1e6   : > { %3418 = vmatmul.mubr.f32.gmra.mrb[10].mxu0 %v5258_v63  ;;  %3657 = vmatpush3.bf16.msra.mxu1 %v3654_v25  ;;  %v2177_v25 = vld [vmem:[#allocation12 + $0x418] sm:$0xff] }
 0x1e7   : > { %3785 = vmatpush3.bf16.msra.mxu0 %v3782_v39  ;;  %3196 = vmatprep.mubr.f32.mxu1 %v5231_v16  ;;  %v3798_v39 = vpack.c.bf16 %v2177_v25, %v2176_v35 }
 0x1e8   : > { %3420 = vmatprep.mubr.f32.mxu0 %v5287_v59  ;;  %3659 = vmatprep.subr.bf16.mxu1 %v3658_v57 }
 0x1e9   : > { %3197 = vmatmul.mubr.f32.gmra.mrb[12].mxu1 %v5237_v27  ;;  %3787 = vmatprep.subr.bf16.mxu0 %v3786_v3 }
 0x1ea   : > { %3421 = vmatmul.mubr.f32.gmra.mrb[12].mxu0 %v5291_v10  ;;  %3661 = vmatpush3.bf16.msra.mxu1 %v3658_v57 }
 0x1eb   : > { %3789 = vmatpush3.bf16.msra.mxu0 %v3786_v3  ;;  %3199 = vmatprep.mubr.f32.mxu1 %v5243_v34 }
 0x1ec   : > { %3423 = vmatprep.mubr.f32.mxu0 %v1786_v17  ;;  %3663 = vmatprep.subr.bf16.mxu1 %v3662_v14 }
 0x1ed   : > { %3200 = vmatmul.mubr.f32.gmra.mrb[14].mxu1 %v5249_v46  ;;  %3791 = vmatprep.subr.bf16.mxu0 %v3790_v18 }
 0x1ee   : > { %3424 = vmatmul.mubr.f32.gmra.mrb[14].mxu0 %v1787_v24  ;;  %3665 = vmatpush3.bf16.msra.mxu1 %v3662_v14 }
 0x1ef   : > { %3793 = vmatpush3.bf16.msra.mxu0 %v3790_v18  ;;  %3234 = vmatprep.mubr.f32.mxu1 %v5181_v20  ;;  %v2181_v20 = vld [vmem:[#allocation12 + $0x438] sm:$0xff] }
 0x1f0   : > { %3458 = vmatprep.mubr.f32.mxu0 %v5121_v2  ;;  %3795 = vmatprep.subr.bf16.mxu0 %v3794_v31  ;;  %v2180_v2 = vld [vmem:[#allocation12 + $0x430] sm:$0xff] }
 0x1f1   : > { %3235 = vmatmul.mubr.f32.vlgmr.msra.gmra.mrb[0].mxu1 %v5186_v32  ;;  %3826 = vmatprep.subr.bf16.mxu1 %v3794_v31  ;;  %v2183_v32 = vld [vmem:[#allocation12 + $0x448] sm:$0xff] }
 0x1f2   : > { %3459 = vmatmul.mubr.f32.vlgmr.msra.gmra.mrb[0].mxu0 %v5124_v28  ;;  %3834 = vmatpush3.bf16.msra.mxu1 %v3794_v31  ;;  %v3806_v28 = vpack.c.bf16 %v2181_v20, %v2180_v2 }
 0x1f3   : > { %3797 = vmatpush3.bf16.msra.mxu0 %v3794_v31  ;;  %3237 = vmatprep.mubr.f32.mxu1 %v5192_v33  ;;  %v2185_v33 = vld [vmem:[#allocation12 + $0x458] sm:$0xff] }
 0x1f4   : > { %3461 = vmatprep.mubr.f32.mxu0 %v5127_v30  ;;  %3799 = vmatprep.subr.bf16.mxu0 %v3798_v39  ;;  %v2182_v30 = vld [vmem:[#allocation12 + $0x440] sm:$0xff] }
 0x1f5   : > { %3238 = vmatmul.mubr.f32.gmra.mrb[2].mxu1 %v5198_v43  ;;  %3827 = vmatprep.subr.bf16.mxu1 %v3798_v39  ;;  %v2187_v43 = vld [vmem:[#allocation12 + $0x468] sm:$0xff] }
 0x1f6   : > { %3462 = vmatmul.mubr.f32.gmra.mrb[2].mxu0 %v5131_v21  ;;  %3835 = vmatpush3.bf16.msra.mxu1 %v3798_v39  ;;  %v3810_v21 = vpack.c.bf16 %v2183_v32, %v2182_v30 }
 0x1f7   : > { %3801 = vmatpush3.bf16.msra.mxu0 %v3798_v39  ;;  %3240 = vmatprep.mubr.f32.mxu1 %v5204_v48  ;;  %v2189_v48 = vld [vmem:[#allocation12 + $0x478] sm:$0xff] }
 0x1f8   : > { %3464 = vmatprep.mubr.f32.mxu0 %v5135_v37  ;;  %3803 = vmatprep.subr.bf16.mxu0 %v3802_v53  ;;  %v2184_v37 = vld [vmem:[#allocation12 + $0x450] sm:$0xff] }
 0x1f9   : > { %3241 = vmatmul.mubr.f32.gmra.mrb[4].mxu1 %v5210_v56  ;;  %3828 = vmatprep.subr.bf16.mxu1 %v3802_v53  ;;  %v1980_v56 = vld [vmem:[#allocation2 + $0x130] sm:$0xff] }
 0x1fa   : > { %3465 = vmatmul.mubr.f32.gmra.mrb[4].mxu0 %v5139_v42  ;;  %3836 = vmatpush3.bf16.msra.mxu1 %v3802_v53  ;;  %v3814_v42 = vpack.c.bf16 %v2185_v33, %v2184_v37 }
 0x1fb   : > { %3805 = vmatpush3.bf16.msra.mxu0 %v3802_v53  ;;  %3243 = vmatprep.mubr.f32.mxu1 %v5216_v62 }
 0x1fc   : > { %3467 = vmatprep.mubr.f32.mxu0 %v5143_v44  ;;  %3807 = vmatprep.subr.bf16.mxu0 %v3806_v28  ;;  %v2186_v44 = vld [vmem:[#allocation12 + $0x460] sm:$0xff] }
 0x1fd   : > { %3244 = vmatmul.mubr.f32.gmra.mrb[6].mxu1 %v5222_v8  ;;  %3829 = vmatprep.subr.bf16.mxu1 %v3806_v28 }
 0x1fe   : > { %3468 = vmatmul.mubr.f32.gmra.mrb[6].mxu0 %v5147_v50  ;;  %3837 = vmatpush3.bf16.msra.mxu1 %v3806_v28  ;;  %v3818_v50 = vpack.c.bf16 %v2187_v43, %v2186_v44 }
 0x1ff   : > { %3809 = vmatpush3.bf16.msra.mxu0 %v3806_v28  ;;  %3246 = vmatprep.mubr.f32.mxu1 %v5228_v13 }
 0x200   : > { %3470 = vmatprep.mubr.f32.mxu0 %v5151_v52  ;;  %3811 = vmatprep.subr.bf16.mxu0 %v3810_v21  ;;  %v2188_v52 = vld [vmem:[#allocation12 + $0x470] sm:$0xff] }
 0x201   : > { %3247 = vmatmul.mubr.f32.gmra.mrb[8].mxu1 %v5234_v23  ;;  %3830 = vmatprep.subr.bf16.mxu1 %v3810_v21 }
 0x202   : > { %3471 = vmatmul.mubr.f32.gmra.mrb[8].mxu0 %v5155_v58  ;;  %3838 = vmatpush3.bf16.msra.mxu1 %v3810_v21  ;;  %v3822_v58 = vpack.c.bf16 %v2189_v48, %v2188_v52 }
 0x203   : > { %3813 = vmatpush3.bf16.msra.mxu0 %v3810_v21  ;;  %3249 = vmatprep.mubr.f32.mxu1 %v5240_v29 }
 0x204   : > { %3473 = vmatprep.mubr.f32.mxu0 %v5159_v60  ;;  %3815 = vmatprep.subr.bf16.mxu0 %v3814_v42  ;;  %v1979_v60 = vld [vmem:[#allocation2 + $0x128] sm:$0xff] }
 0x205   : > { %3250 = vmatmul.mubr.f32.gmra.mrb[10].mxu1 %v5246_v40  ;;  %3831 = vmatprep.subr.bf16.mxu1 %v3814_v42 }
 0x206   : > { %3474 = vmatmul.mubr.f32.gmra.mrb[10].mxu0 %v5163_v4  ;;  %3839 = vmatpush3.bf16.msra.mxu1 %v3814_v42  ;;  %v2172_v4 = vld [vmem:[#allocation2 + $0x129] sm:$0xff] }
 0x207   : > { %3817 = vmatpush3.bf16.msra.mxu0 %v3814_v42  ;;  %3252 = vmatprep.mubr.f32.mxu1 %v5252_v49 }
 0x208   : > { %3476 = vmatprep.mubr.f32.mxu0 %v5167_v6  ;;  %3819 = vmatprep.subr.bf16.mxu0 %v3818_v50  ;;  %v2173_v6 = vld [vmem:[#allocation2 + $0x131] sm:$0xff] }
 0x209   : > { %3253 = vmatmul.mubr.f32.gmra.mrb[12].mxu1 %v5258_v63  ;;  %3832 = vmatprep.subr.bf16.mxu1 %v3818_v50 }
 0x20a   : > { %3477 = vmatmul.mubr.f32.gmra.mrb[12].mxu0 %v5171_v12  ;;  %3840 = vmatpush3.bf16.msra.mxu1 %v3818_v50 }
 0x20b   : > { %3821 = vmatpush3.bf16.msra.mxu0 %v3818_v50  ;;  %3255 = vmatprep.mubr.f32.mxu1 %v5287_v59 }
 0x20c   : > { %3479 = vmatprep.mubr.f32.mxu0 %v1979_v60  ;;  %3823 = vmatprep.subr.bf16.mxu0 %v3822_v58 }
 0x20d   : > { %3256 = vmatmul.mubr.f32.gmra.mrb[14].mxu1 %v5291_v10  ;;  %3833 = vmatprep.subr.bf16.mxu1 %v3822_v58 }
 0x20e   : > { %3480 = vmatmul.mubr.f32.gmra.mrb[14].mxu0 %v1980_v56  ;;  %3841 = vmatpush3.bf16.msra.mxu1 %v3822_v58 }
 0x20f   : > { %3825 = vmatpush3.bf16.msra.mxu0 %v3822_v58  ;;  %3514 = vmatprep.mubr.f32.mxu0 %v5183_v26 }
 0x210   : > { %3526 = vmatprep.mubr.f32.mxu1 %v5231_v16 }
 0x211   : > { %3527 = vmatmul.mubr.f32.vlgmr.msra.gmra.mrb[16].mxu1 %v5237_v27 }
 0x212   : > { %3515 = vmatmul.mubr.f32.vlgmr.msra.gmra.mrb[0].mxu0 %v5189_v36  ;;  %3529 = vmatprep.mubr.f32.mxu1 %v5243_v34 }
 0x213   : > { %3517 = vmatprep.mubr.f32.mxu0 %v5195_v38 }
 0x215   : > { %3530 = vmatmul.mubr.f32.gmra.mrb[18].mxu1 %v5249_v46 }
 0x216   : > { %3518 = vmatmul.mubr.f32.gmra.mrb[2].mxu0 %v5201_v47  ;;  %3532 = vmatprep.mubr.f32.mxu1 %v5255_v54 }
 0x217   : > { %3520 = vmatprep.mubr.f32.mxu0 %v5207_v51 }
 0x219   : > { %3533 = vmatmul.mubr.f32.gmra.mrb[20].mxu1 %v5261_v7 }
 0x21a   : > { %3521 = vmatmul.mubr.f32.gmra.mrb[4].mxu0 %v5213_v61  ;;  %3535 = vmatprep.mubr.f32.mxu1 %v2172_v4 }
 0x21b   : > { %3523 = vmatprep.mubr.f32.mxu0 %v5219_v0 }
 0x21d   : > { %3536 = vmatmul.mubr.f32.gmra.mrb[22].mxu1 %v2173_v6 }
 0x21e   : > { %3524 = vmatmul.mubr.f32.gmra.mrb[6].mxu0 %v5225_v11 }
 0x2c4   : > { %v3236_v12 = vpop.f32.mrb[0].mxu1 }
 0x2c5   : > { %v1290_v26 = vpop.f32.mrb[1].mxu1 }
 0x2c8   : > { %v3239_v36 = vpop.f32.mrb[2].mxu1 }
 0x2c9   : > { %v1300_v38 = vpop.f32.mrb[3].mxu1 }
 0x2cc   : > { %v3242_v47 = vpop.f32.mrb[4].mxu1 }
 0x2cd   : > { %v5342_v62 = vpop.f32.mrb[5].mxu1 }
 0x2d0   : > { %v5344_v51 = vpop.f32.mrb[6].mxu1 }
 0x2d1   : > { %v5346_v8 = vpop.f32.mrb[7].mxu1 }
 0x2d4   : > { %v3248_v13 = vpop.f32.mrb[8].mxu1 }
 0x2d5   : > { %v3472_v61 = vpop.f32.mrb[8].mxu0  ;;  %v1330_v16 = vpop.f32.mrb[9].mxu1 }
 0x2d6   : > { %v3850_v23 = vadd.f32 %v3472_v61, %v3248_v13  ;;  %v2103_v27 = vpop.f32.mrb[9].mxu0 }
 0x2d7   : > { %v3852_v0 = vadd.f32 %v2103_v27, %v1330_v16 }
 0x2d8   : > { %v3251_v29 = vpop.f32.mrb[10].mxu1 }
 0x2d9   : > { %v3475_v34 = vpop.f32.mrb[10].mxu0  ;;  %v1340_v11 = vpop.f32.mrb[11].mxu1 }
 0x2da   : > { %v3854_v40 = vadd.f32 %v3475_v34, %v3251_v29  ;;  %v2113_v46 = vpop.f32.mrb[11].mxu0 }
 0x2db   : > { %v3856_v49 = vadd.f32 %v2113_v46, %v1340_v11 }
 0x2dc   : > { %v3254_v54 = vpop.f32.mrb[12].mxu1 }
 0x2dd   : > { %v3478_v63 = vpop.f32.mrb[12].mxu0  ;;  %v1350_v7 = vpop.f32.mrb[13].mxu1 }
 0x2de   : > { %v3858_v55 = vadd.f32 %v3478_v63, %v3254_v54  ;;  %v2123_v57 = vpop.f32.mrb[13].mxu0 }
 0x2df   : > { %v3860_v59 = vadd.f32 %v2123_v57, %v1350_v7 }
 0x2e0   : > { %v3257_v3 = vpop.f32.mrb[14].mxu1 }
 0x2e1   : > { %v3481_v5 = vpop.f32.mrb[14].mxu0  ;;  %v1360_v15 = vpop.f32.mrb[15].mxu1 }
 0x2e2   : > { %v3862_v19 = vadd.f32 %v3481_v5, %v3257_v3  ;;  %v2133_v9 = vpop.f32.mrb[15].mxu0 }
 0x2e3   : > { %v3864_v10 = vadd.f32 %v2133_v9, %v1360_v15 }
 0x2e4   : > { %v3528_v14 = vpop.f32.mrb[16].mxu1 }
 0x2e5   : > { %v3516_v17 = vpop.f32.mrb[0].mxu0  ;;  %v5348_v18 = vadd.f32 %v3850_v23, %v3528_v14  ;;  %v2296_v22 = vpop.f32.mrb[17].mxu1 }
 0x2e6   : > { %v5350_v1 = vadd.f32 %v3516_v17, %v3236_v12  ;;  %v2256_v24 = vpop.f32.mrb[1].mxu0  ;;  %v5352_v31 = vadd.f32 %v3852_v0, %v2296_v22 }
 0x2e7   : > { %2360 = vst [vmem:[%s5100_s15 + $0x48] sm:$0xff] %v5348_v18  ;;  %v5356_v35 = vadd.f32 %v2256_v24, %v1290_v26 }
 0x2e8   : > { %2352 = vst [vmem:[%s5100_s15 + $0x8] sm:$0xff] %v5350_v1  ;;  %2359 = vst [vmem:[%s5100_s15 + $0x40] sm:$0xff] %v5352_v31  ;;  %v3531_v25 = vpop.f32.mrb[18].mxu1 }
 0x2e9   : > { %2351 = vst [vmem:[%s5100_s15] sm:$0xff] %v5356_v35  ;;  %v2367_v39 = vadd.f32 %v5356_v35, %v5350_v1  ;;  %v3519_v41 = vpop.f32.mrb[2].mxu0  ;;  %v5366_v45 = vadd.f32 %v3854_v40, %v3531_v25  ;;  %v2306_v53 = vpop.f32.mrb[19].mxu1 }
 0x2ea   : > { %v5368_v2 = vadd.f32 %v3519_v41, %v3239_v36  ;;  %v2266_v20 = vpop.f32.mrb[3].mxu0  ;;  %v5370_v28 = vadd.f32 %v3856_v49, %v2306_v53 }
 0x2eb   : > { %2362 = vst [vmem:[%s5100_s15 + $0x58] sm:$0xff] %v5366_v45  ;;  %v5376_v30 = vadd.f32 %v2266_v20, %v1300_v38 }
 0x2ec   : > { %2354 = vst [vmem:[%s5100_s15 + $0x18] sm:$0xff] %v5368_v2  ;;  %2361 = vst [vmem:[%s5100_s15 + $0x50] sm:$0xff] %v5370_v28  ;;  %v3534_v32 = vpop.f32.mrb[20].mxu1 }
 0x2ed   : > { %2353 = vst [vmem:[%s5100_s15 + $0x10] sm:$0xff] %v5376_v30  ;;  %v2368_v21 = vadd.f32 %v5376_v30, %v2367_v39  ;;  %v3522_v37 = vpop.f32.mrb[4].mxu0  ;;  %v5385_v33 = vadd.f32 %v3858_v55, %v3534_v32  ;;  %v2316_v42 = vpop.f32.mrb[21].mxu1 }
 0x2ee   : > { %v5387_v44 = vadd.f32 %v3522_v37, %v3242_v47  ;;  %v2276_v43 = vpop.f32.mrb[5].mxu0  ;;  %v5389_v50 = vadd.f32 %v3860_v59, %v2316_v42 }
 0x2ef   : > { %2364 = vst [vmem:[%s5100_s15 + $0x68] sm:$0xff] %v5385_v33  ;;  %v5394_v52 = vadd.f32 %v2276_v43, %v5342_v62  ;;  %v2369_v48 = vadd.f32 %v5368_v2, %v2368_v21 }
 0x2f0   : > { %2356 = vst [vmem:[%s5100_s15 + $0x28] sm:$0xff] %v5387_v44  ;;  %2363 = vst [vmem:[%s5100_s15 + $0x60] sm:$0xff] %v5389_v50  ;;  %v3537_v58 = vpop.f32.mrb[22].mxu1 }
 0x2f1   : > { %2355 = vst [vmem:[%s5100_s15 + $0x20] sm:$0xff] %v5394_v52  ;;  %v2370_v60 = vadd.f32 %v5394_v52, %v2369_v48  ;;  %v3525_v56 = vpop.f32.mrb[6].mxu0  ;;  %v5405_v4 = vadd.f32 %v3862_v19, %v3537_v58  ;;  %v2326_v6 = vpop.f32.mrb[23].mxu1 }
 0x2f2   : > { %v5408_v12 = vadd.f32 %v3525_v56, %v5344_v51  ;;  %v2286_v26 = vpop.f32.mrb[7].mxu0  ;;  %v5410_v36 = vadd.f32 %v3864_v10, %v2326_v6 }
 0x2f3   : > { %2366 = vst [vmem:[%s5100_s15 + $0x78] sm:$0xff] %v5405_v4  ;;  %v3849_v38 = vadd.f32 %v2286_v26, %v5346_v8  ;;  %v2371_v47 = vadd.f32 %v5387_v44, %v2370_v60 }
 0x2f4   : > { %2358 = vst [vmem:[%s5100_s15 + $0x38] sm:$0xff] %v5408_v12  ;;  %2365 = vst [vmem:[%s5100_s15 + $0x70] sm:$0xff] %v5410_v36 }
 0x2f5   : > { %2357 = vst [vmem:[%s5100_s15 + $0x30] sm:$0xff] %v3849_v38  ;;  %v2372_v62 = vadd.f32 %v3849_v38, %v2371_v47 }
 0x2f6   : > { %4336 = shalt.err (!%p4333_p0)
}
 0x2f7   : > { %s4337_s15 = scalar_lea.hbm %s5421_s1, 2048  ;;  %s4341_s0 = scalar_lea.hbm %s5683_s19, 8192 }
 0x2f8   : > { %p4338_p1 = scmp.ne.s32.totalorder %s5421_s1, %s4337_s15  ;;  %p4342_p4 = scmp.lt.u32.totalorder %s5421_s1, %s5683_s19 }
 0x2f9   : > { %p4343_p5 = scmp.lt.u32.totalorder %s4341_s0, %s4337_s15  ;;  %p4345_p8 = scmp.lt.u32.totalorder %s4337_s15, %s5421_s1 }
 0x2fa   : > { %p4339_p3 = pnand %p4338_p1, %p5684_p2 }
 0x2fb   : > { %p4344_p10 = por %p4343_p5, %p4342_p4 }
 0x2fc   : > { %p4340_p12 = pneg %p4339_p3 }
 0x2fd   : > { %p4346_p9 = por %p4345_p8, %p4344_p10 }
 0x2ff   : > { %p4347_p7 = pnand %p4346_p9, %p4340_p12 }
 0x301   : > { %4350 = shalt.err (!%p4347_p7)
}
 0x302   : > { %s4531_s3 = smov 128   ;;  %s4532_s13 = smov 8   ;;  %v2373_v51 = vadd.f32 %v5408_v12, %v2372_v62  ;;  %vm2442_vm0 = vcmask 1040384  }
 0x303   : > { %3988 = dma.vmem_to_hbm [thread:$0]  (%p5684_p2), %s5412_s7, 2048, %s5421_s1, %s2446_s22, %s4531_s3, %s4531_s3, %s4532_s13  }
 0x304   : > { %v2374_v8 = vadd.f32 %v5352_v31, %v2373_v51  ;;  %s2734_s7 = sshll.u32 %s5682_s4, 1  ;;  %s2485_s22 = sshll.u32 %s5104_s17, 4  ;;  %s5487_s22 = int_to_ptr.vmem [resolvable:$true] %s2485_s22 }
 0x305   : > { %s2481_s27 = sadd.s32 %s5681_s12, %s2734_s7  ;;  %s5685_s28 = sld [smem:[#allocation46_spill]] }
 0x306   : > { %v2375_v13 = vadd.f32 %v5348_v18, %v2374_v8  ;;  %s2735_s1 = sshll.u32 %s2481_s27, 5  ;;  %s2451_s12 = scalar_lea.sflag [#allocation16], %s4980_s24 }
 0x307   : > { %s4351_s4 = scalar_lea.vmem %s5487_s22, 32  ;;  %s4533_s18 = smov [#allocation15]  }
 0x308   : > { %v2376_v61 = vadd.f32 %v5370_v28, %v2375_v13  ;;  %p4352_p6 = scmp.ne.s32.totalorder %s5487_s22, %s4351_s4  ;;  %s4355_s5 = sshll.u32 %s4533_s18, 4  ;;  %s4356_s5 = int_to_ptr.vmem [resolvable:$false] %s4355_s5 }
 0x309   : > { %s4357_s0 = scalar_lea.vmem %s4356_s5, 64  ;;  %p4358_p0 = scmp.lt.s32.totalorder %s5487_s22, %s4356_s5 }
 0x30a   : > { %v2377_v16 = vadd.f32 %v5366_v45, %v2376_v61  ;;  %p4353_p13 = pnand %p4352_p6, %p5684_p2  ;;  %p4359_p1 = scmp.lt.s32.totalorder %s4357_s0, %s4351_s4 }
 0x30b   : > { %s5686_s2 = smov %s5685_s28  ;;  %s5485_s15 = scalar_lea.hbm %s5685_s28, %s2735_s1 }
 0x30c   : > { %v2378_v23 = vadd.f32 %v5389_v50, %v2377_v16  ;;  %p4354_p11 = pneg %p4353_p13  ;;  %p4360_p3 = por %p4359_p1, %p4358_p0 }
 0x30e   : > { %v2379_v27 = vadd.f32 %v5385_v33, %v2378_v23  ;;  %p4361_p12 = pnand %p4360_p3, %p4354_p11 }
 0x310   : > { %v2380_v0 = vadd.f32 %v5410_v36, %v2379_v27 }
 0x312   : > { %v2381_v29 = vadd.f32 %v5405_v4, %v2380_v0 }
 0x314   : > { %v2382_v34 = vrot.slane %v2381_v29, 4 }
 0x316   : > { %v2383_v11 = vadd.f32 %v2382_v34, %v2381_v29 }
 0x318   : > { %v2384_v40 = vrot.slane %v2383_v11, 2 }
 0x31a   : > { %v2385_v46 = vadd.f32 %v2384_v40, %v2383_v11 }
 0x31c   : > { %v2386_v49 = vrot.slane %v2385_v46, 1 }
 0x31e   : > { %v5461_v54 = vadd.f32 %v2386_v49, %v2385_v46 }
 0x320   : > { %v2388_v63 = vmul.f32 0.0078125, %v5461_v54 }
 0x322   : > { %v2389_v7 = vsub.f32 %v5356_v35, %v2388_v63  ;;  %v2390_v55 = vsub.f32 %v5350_v1, %v2388_v63  ;;  %v2391_v57 = vsub.f32 %v5376_v30, %v2388_v63  ;;  %v2392_v59 = vsub.f32 %v5368_v2, %v2388_v63 }
 0x323   : > { %v2393_v3 = vsub.f32 %v5394_v52, %v2388_v63  ;;  %v2394_v5 = vsub.f32 %v5387_v44, %v2388_v63  ;;  %v2395_v15 = vsub.f32 %v3849_v38, %v2388_v63  ;;  %v2396_v19 = vsub.f32 %v5408_v12, %v2388_v63 }
 0x324   : > { %v2397_v9 = vsub.f32 %v5352_v31, %v2388_v63  ;;  %v2398_v10 = vsub.f32 %v5348_v18, %v2388_v63  ;;  %v2399_v14 = vsub.f32 %v5370_v28, %v2388_v63  ;;  %v2400_v17 = vsub.f32 %v5366_v45, %v2388_v63 }
 0x325   : > { %v2401_v22 = vsub.f32 %v5389_v50, %v2388_v63  ;;  %v2402_v1 = vsub.f32 %v5385_v33, %v2388_v63  ;;  %v2403_v24 = vsub.f32 %v5410_v36, %v2388_v63  ;;  %v2404_v35 = vsub.f32 %v5405_v4, %v2388_v63 }
 0x326   : > { %v2405_v25 = vmul.f32 %v2389_v7, %v2389_v7  ;;  %v2406_v39 = vmul.f32 %v2390_v55, %v2390_v55  ;;  %v2407_v41 = vmul.f32 %v2391_v57, %v2391_v57  ;;  %v2408_v2 = vmul.f32 %v2392_v59, %v2392_v59 }
 0x327   : > { %v2409_v20 = vmul.f32 %v2393_v3, %v2393_v3  ;;  %v2410_v30 = vmul.f32 %v2394_v5, %v2394_v5  ;;  %v2411_v32 = vmul.f32 %v2395_v15, %v2395_v15  ;;  %v2412_v21 = vmul.f32 %v2396_v19, %v2396_v19 }
 0x328   : > { %v2421_v53 = vadd.f32 %v2406_v39, %v2405_v25  ;;  %v2413_v42 = vmul.f32 %v2397_v9, %v2397_v9  ;;  %v2414_v44 = vmul.f32 %v2398_v10, %v2398_v10  ;;  %v2415_v50 = vmul.f32 %v2399_v14, %v2399_v14 }
 0x329   : > { %v2416_v48 = vmul.f32 %v2400_v17, %v2400_v17  ;;  %v2417_v60 = vmul.f32 %v2401_v22, %v2401_v22  ;;  %v2418_v4 = vmul.f32 %v2402_v1, %v2402_v1  ;;  %v2419_v12 = vmul.f32 %v2403_v24, %v2403_v24 }
 0x32a   : > { %v2422_v31 = vadd.f32 %v2421_v53, %v2407_v41  ;;  %v2420_v36 = vmul.f32 %v2404_v35, %v2404_v35 }
 0x32c   : > { %v2423_v18 = vadd.f32 %v2422_v31, %v2408_v2 }
 0x32e   : > { %v2424_v28 = vadd.f32 %v2423_v18, %v2409_v20 }
 0x330   : > { %v2425_v45 = vadd.f32 %v2424_v28, %v2410_v30 }
 0x332   : > { %v2426_v37 = vadd.f32 %v2425_v45, %v2411_v32 }
 0x334   : > { %v2427_v33 = vadd.f32 %v2426_v37, %v2412_v21 }
 0x336   : > { %v2428_v43 = vadd.f32 %v2427_v33, %v2413_v42 }
 0x338   : > { %v2429_v52 = vadd.f32 %v2428_v43, %v2414_v44 }
 0x33a   : > { %v2430_v58 = vadd.f32 %v2429_v52, %v2415_v50 }
 0x33c   : > { %v2431_v56 = vadd.f32 %v2430_v58, %v2416_v48 }
 0x33e   : > { %v2432_v6 = vadd.f32 %v2431_v56, %v2417_v60 }
 0x340   : > { %v2433_v26 = vadd.f32 %v2432_v6, %v2418_v4 }
 0x342   : > { %v2434_v38 = vadd.f32 %v2433_v26, %v2419_v12 }
 0x344   : > { %v2435_v47 = vadd.f32 %v2434_v38, %v2420_v36 }
 0x346   : > { %v2436_v62 = vrot.slane %v2435_v47, 4 }
 0x348   : > { %v2437_v51 = vadd.f32 %v2436_v62, %v2435_v47 }
 0x34a   : > { %v2438_v8 = vrot.slane %v2437_v51, 2 }
 0x34c   : > { %v2439_v13 = vadd.f32 %v2438_v8, %v2437_v51 }
 0x34e   : > { %v2440_v61 = vrot.slane %v2439_v13, 1 }
 0x350   : > { %v2441_v16 = vadd.f32 %v2440_v61, %v2439_v13 }
 0x352   : > { %v2443_v23 = vsel %vm2442_vm0, %v5461_v54, %v2441_v16 }
 0x353   : > { %2444 = vst [vmem:[%s5104_s17] sm:$0x3] %v2443_v23 }
 0x354   : > { %4364 = shalt.err (!%p4361_p12)
}
 0x355   : > { %s4365_s24 = scalar_lea.hbm %s5485_s15, 32  ;;  %s4369_s6 = scalar_lea.hbm %s5686_s2, 128 }
 0x356   : > { %p4366_p4 = scmp.ne.s32.totalorder %s5485_s15, %s4365_s24  ;;  %p4370_p8 = scmp.lt.u32.totalorder %s5485_s15, %s5686_s2 }
 0x357   : > { %p4371_p9 = scmp.lt.u32.totalorder %s4369_s6, %s4365_s24  ;;  %p4373_p6 = scmp.lt.u32.totalorder %s4365_s24, %s5485_s15 }
 0x358   : > { %p4367_p5 = pnand %p4366_p4, %p5684_p2 }
 0x359   : > { %p4372_p7 = por %p4371_p9, %p4370_p8 }
 0x35a   : > { %p4368_p10 = pneg %p4367_p5 }
 0x35b   : > { %p4374_p13 = por %p4373_p6, %p4372_p7 }
 0x35d   : > { %p4375_p11 = pnand %p4374_p13, %p4368_p10 }
 0x35f   : > { %4378 = shalt.err (!%p4375_p11)
}
 0x360   : > { %3989 = dma.vmem_to_hbm [thread:$0]  (%p5684_p2), %s5487_s22, 32, %s5485_s15, %s2451_s12  }
 0x361 PF: > { %p4026_p0 = scmp.ge.s32.totalorder %s4517_s14, 2  ;;  %s2497_s7 = sand.u32 1, %s4489_s30  }
 0x362   : > { %p5687_p1 = scmp.ne.s32.totalorder %s5648_s10, 0  ;;  %s2498_s27 = scalar_lea.sflag [#allocation5], %s2497_s7 }
 0x364   : > { %p4013_p3 = pnand %p4026_p0, %p5687_p1 }
 0x366   : > { %4456 = dma.done.wait (!%p4013_p3), %s2498_s27, 2048  }
 0x367   : > { %4458 = vsyncadd (!%p4013_p3), %s2498_s27, 4294965248  ;;  %s2507_s1 = scalar_lea.sflag [#allocation16], %s2497_s7 }
 0x368   : > { %4460 = dma.done.wait (!%p4013_p3), %s2507_s1, 32  }
 0x369   : > { %4462 = vsyncadd (!%p4013_p3), %s2507_s1, 4294967264  ;;  %s32_s14 = sadd.s32 1, %s4517_s14   ;;  %s5689_s24 = sld [smem:[#allocation25_spill]] }
 0x36a   : > { %p5518_p12 = scmp.ge.s32.totalorder %s32_s14, 6   ;;  %s5690_s22 = sld [smem:[#allocation26_spill]] }
 0x36b   : > { %s5691_s27 = sld [smem:[#allocation27_spill]]  ;;  %s5692_s30 = smov %s4732_s25 }
 0x36c   : > { %s5693_s10 = sld [smem:[#allocation38_spill]]  ;;  %s5694_s21 = sld [smem:[#allocation30_spill]] }
 0x36d   : > { %s5695_s11 = sld [smem:[#allocation31_spill]]  ;;  %s5696_s12 = sld [smem:[#allocation33_spill]] }
 0x36e   : > { %s5697_s13 = sld [smem:[#allocation34_spill]]  ;;  %s5699_s28 = smov %s4485_s29 }
 0x36f   : > { %s5700_s29 = smov %s5692_s30  ;;  %s5701_s30 = smov %s4493_s8 }
 0x370   : > { %s5698_s25 = smov %s5690_s22  ;;  %s5702_s8 = smov %s4497_s9 }
 0x371   :  { %31 = sbr.rel (!%p5518_p12) target bundleno = 25 (0x19), region = 162 }
 0x372   : > { %s5703_s9 = smov %s5693_s10  ;;  %s5704_s10 = smov %s5694_s21 }
 0x378   :  { %2512 = vsyncpa [#allocation4], 1 }
 0x379   :  { %2514 = vsyncpa [#allocation4 + $0x1], 1 }
 0x37a   :  { %2515 = vsyncpa [#allocation7], 1 }
 0x37b   :  { %2517 = vsyncpa [#allocation7 + $0x1], 1 }
 0x37c   :  { %2518 = vsyncpa [#allocation10], 1 }
 0x37d   :  { %2519 = vsyncpa [#allocation13], 1 }
 0x37e   :  { %2520 = vsyncpa [#allocation5], 1 }
 0x37f   :  { %2522 = vsyncpa [#allocation5 + $0x1], 1 }
 0x380   :  { %2523 = vsyncpa [#allocation16], 1 }
 0x381   :  { %2525 = vsyncpa [#allocation16 + $0x1], 1 }

</bundles_post_ra>
